<compile_context>
chip_gen: v6e
topology: v6e:2x2x1
jax: 0.10.0
libtpu: 0.0.40
codegen_flags: <defaults>
</compile_context>

<pallas_src>
import functools

import jax
import jax.numpy as jnp
from jax.experimental import pallas as pl
from jax.experimental.pallas import tpu as pltpu

D_IN = 84 * 84          # 7056  (flattened 84x84 input / output features)
D_HID = 128
TN = 3584               # fc2 output tile (multiple of 128; 2 tiles cover 7056)
TB_MAX = 256            # max batch tile (MXU-friendly, VMEM-safe)


def _round_up(x, m):
    return (x + m - 1) // m * m


# ----------------------------- kernels --------------------------------------


def fc1_kernel(x_ref, w1_ref, b1_ref, h_ref):
    # Cast x f32 -> bf16 in VMEM right before the MXU dot (avoids a separate
    # host-side pad/cast HBM round trip of x).
    x = x_ref[...].astype(jnp.bfloat16)
    h = jnp.dot(x, w1_ref[...], preferred_element_type=jnp.float32)
    h = jnp.maximum(h + b1_ref[...], 0.0)
    h_ref[...] = h.astype(h_ref.dtype)


def fc2_kernel(h_ref, w2_ref, b2_ref, out_ref):
    y = jnp.dot(h_ref[...], w2_ref[...], preferred_element_type=jnp.float32)
    out_ref[...] = jax.nn.sigmoid(y + b2_ref[...]).astype(out_ref.dtype)


# ----------------------------- wrapper ---------------------------------------


def prepare_params(w1, b1, w2, b2):
    """One-time parameter prep (outside the per-call hot path): cast to bf16/f32."""
    return (w1.astype(jnp.bfloat16), b1.astype(jnp.float32),
            w2.astype(jnp.bfloat16), b2.astype(jnp.float32))


@functools.partial(jax.jit, static_argnames=("out_dtype",))
def sequential_autoencoder(x, w1_bf16, b1_f32, w2_bf16, b2_f32,
                           *, out_dtype=jnp.bfloat16):
    """x: [B, 7056] f32. Returns sigmoid(relu(x@w1+b1)@w2+b2) as [B, 7056] out_dtype."""
    B = x.shape[0]
    # Pad the batch to a multiple of 16 only when needed (bf16 sublane packing
    # for the h / out blocks).  For typical batch sizes this is a no-op.
    b_pad = _round_up(max(B, 1), 16)
    if b_pad != B:
        x = jnp.zeros((b_pad, D_IN), x.dtype).at[:B].set(x)

    tb = min(TB_MAX, b_pad)
    nb = pl.cdiv(b_pad, tb)          # ragged last batch tile is masked by Pallas
    nn = pl.cdiv(D_IN, TN)           # ragged last N tile is masked by Pallas

    # ------------------------- fc1: h = relu(x @ w1 + b1) --------------------
    h = pl.pallas_call(
        fc1_kernel,
        out_shape=jax.ShapeDtypeStruct((b_pad, D_HID), jnp.bfloat16),
        grid_spec=pltpu.PrefetchScalarGridSpec(
            num_scalar_prefetch=0,
            grid=(nb,),
            in_specs=[
                # x batch tile, full (unpadded) feature dim, f32 straight from HBM
                pl.BlockSpec((tb, D_IN), lambda i: (i, 0)),
                # w1 resident: constant block index -> DMA'd exactly once
                pl.BlockSpec((D_IN, D_HID), lambda i: (0, 0)),
                pl.BlockSpec((1, D_HID), lambda i: (0, 0)),
            ],
            out_specs=pl.BlockSpec((tb, D_HID), lambda i: (i, 0)),
        ),
        compiler_params=pltpu.CompilerParams(
            dimension_semantics=("parallel",),
            vmem_limit_bytes=48 << 20,
        ),
        cost_estimate=pl.CostEstimate(
            flops=2 * b_pad * D_IN * D_HID,
            transcendentals=0,
            bytes_accessed=(b_pad * D_IN * 4 + D_IN * D_HID * 2
                            + b_pad * D_HID * 2),
        ),
    )(x, w1_bf16, b1_f32)

    # ------------------------- fc2: y = sigmoid(h @ w2 + b2) -----------------
    out = pl.pallas_call(
        fc2_kernel,
        out_shape=jax.ShapeDtypeStruct((b_pad, D_IN), out_dtype),
        grid_spec=pltpu.PrefetchScalarGridSpec(
            num_scalar_prefetch=0,
            # N axis OUTERMOST: each w2 / b2 tile is fetched once and reused
            # across every batch tile; h re-reads are negligible.
            grid=(nn, nb),
            in_specs=[
                pl.BlockSpec((tb, D_HID), lambda j, i: (i, 0)),   # h tile
                pl.BlockSpec((D_HID, TN), lambda j, i: (0, j)),   # w2 N tile
                pl.BlockSpec((1, TN), lambda j, i: (0, j)),       # b2 N tile
            ],
            out_specs=pl.BlockSpec((tb, TN), lambda j, i: (i, j)),
        ),
        compiler_params=pltpu.CompilerParams(
            dimension_semantics=("parallel", "parallel"),   # megacore on both axes
            vmem_limit_bytes=48 << 20,
        ),
        cost_estimate=pl.CostEstimate(
            flops=2 * b_pad * D_IN * D_HID,
            transcendentals=b_pad * D_IN,
            bytes_accessed=(nn * b_pad * D_HID * 2 + D_HID * D_IN * 2
                            + D_IN * 4
                            + b_pad * D_IN * jnp.dtype(out_dtype).itemsize),
        ),
    )(h, w2_bf16, b2_f32)

    if b_pad != B:
        out = out[:B]
    return out


def init_params(key):
    # Deterministic synthetic init (PyTorch-Linear-like uniform fan-in scaling).
    k1, k2, k3, k4 = jax.random.split(key, 4)
    bound1 = 1.0 / (D_IN ** 0.5)
    bound2 = 1.0 / (D_HID ** 0.5)
    # stored as [in, out] (transpose of PyTorch's [out, in])
    w1 = jax.random.uniform(k1, (D_IN, D_HID), jnp.float32, -bound1, bound1)
    b1 = jax.random.uniform(k2, (1, D_HID), jnp.float32, -bound1, bound1)
    w2 = jax.random.uniform(k3, (D_HID, D_IN), jnp.float32, -bound2, bound2)
    b2 = jax.random.uniform(k4, (1, D_IN), jnp.float32, -bound2, bound2)
    return w1, b1, w2, b2


if __name__ == "__main__":
    key = jax.random.PRNGKey(0)
    kx, kp = jax.random.split(key)

    B = 2
    x = jax.random.uniform(kx, (B, D_IN), jnp.float32)   # flattened 84x84 inputs
    w1, b1, w2, b2 = init_params(kp)
    params = prepare_params(w1, b1, w2, b2)               # one-time cast to bf16/f32

    out = jax.block_until_ready(sequential_autoencoder(x, *params))
    assert out.shape == (B, D_IN)
    assert out.dtype == jnp.bfloat16
    out_f32 = out.astype(jnp.float32)

    # Reference emulating the kernel's bf16 matmul inputs + bf16 hidden state.
    xb = x.astype(jnp.bfloat16).astype(jnp.float32)
    w1b = w1.astype(jnp.bfloat16).astype(jnp.float32)
    w2b = w2.astype(jnp.bfloat16).astype(jnp.float32)
    h_ref = jnp.maximum(xb @ w1b + b1, 0.0)
    h_ref = h_ref.astype(jnp.bfloat16).astype(jnp.float32)
    y_bf16_ref = jax.nn.sigmoid(h_ref @ w2b + b2)
    assert jnp.allclose(out_f32, y_bf16_ref, atol=1e-2, rtol=1e-2)

    # Sanity check against full-f32 math (loose tolerance: bf16 weights + bf16 out).
    y_f32_ref = jax.nn.sigmoid(jnp.maximum(x @ w1 + b1, 0.0) @ w2 + b2)
    assert jnp.allclose(out_f32, y_f32_ref, atol=3e-2)

    print("KERNEL_OK")
</pallas_src>

<mosaic_0001>
module attributes {stable_mosaic.version = 11 : i64} {
  func.func @fc1_kernel(%arg0: i32, %arg1: memref<16x7056xf32, #tpu.memory_space<vmem>>, %arg2: memref<7056x128xbf16, #tpu.memory_space<vmem>>, %arg3: memref<1x128xf32, #tpu.memory_space<vmem>>, %arg4: memref<16x128xbf16, #tpu.memory_space<vmem>>) attributes {dimension_semantics = [#tpu.dimension_semantics<parallel>], iteration_bounds = array<i64: 1>, scalar_prefetch = 0 : i64, scratch_operands = 0 : i64, tpu.core_type = #tpu.core_type<tc>, window_params = [{transform_indices = @transform_0, window_bounds = array<i64: 16, 7056>}, {pipeline_mode = #tpu.pipeline_mode<synchronous>, transform_indices = @transform_1, window_bounds = array<i64: 7056, 128>}, {pipeline_mode = #tpu.pipeline_mode<synchronous>, transform_indices = @transform_2, window_bounds = array<i64: 1, 128>}, {transform_indices = @transform_3, window_bounds = array<i64: 16, 128>}]} {
    %c0 = arith.constant 0 : index
    %c0_0 = arith.constant 0 : index
    %0 = vector.load %arg1[%c0, %c0_0] : memref<16x7056xf32, #tpu.memory_space<vmem>>, vector<16x7056xf32>
    %1 = arith.truncf %0 : vector<16x7056xf32> to vector<16x7056xbf16>
    %c0_1 = arith.constant 0 : index
    %c0_2 = arith.constant 0 : index
    %2 = vector.load %arg2[%c0_1, %c0_2] : memref<7056x128xbf16, #tpu.memory_space<vmem>>, vector<7056x128xbf16>
    %cst = arith.constant dense<0.000000e+00> : vector<16x128xf32>
    %3 = tpu.matmul %1, %2, %cst {dimension_numbers = #tpu.dot_dimension_numbers<[1], [0], [0], [1], [0, 0, 1, 1], [], []>} : vector<16x7056xbf16>, vector<7056x128xbf16>, vector<16x128xf32> -> vector<16x128xf32>
    %c0_3 = arith.constant 0 : index
    %c0_4 = arith.constant 0 : index
    %4 = vector.load %arg3[%c0_3, %c0_4] : memref<1x128xf32, #tpu.memory_space<vmem>>, vector<1x128xf32>
    %5 = vector.broadcast %4 : vector<1x128xf32> to vector<16x128xf32>
    %6 = arith.addf %3, %5 : vector<16x128xf32>
    %cst_5 = arith.constant 0.000000e+00 : f32
    %7 = vector.broadcast %cst_5 : f32 to vector<16x128xf32>
    %8 = arith.maximumf %6, %7 : vector<16x128xf32>
    %9 = arith.truncf %8 : vector<16x128xf32> to vector<16x128xbf16>
    %c0_6 = arith.constant 0 : index
    %c0_7 = arith.constant 0 : index
    %10 = vector.load %arg4[%c0_6, %c0_7] : memref<16x128xbf16, #tpu.memory_space<vmem>>, vector<16x128xbf16>
    tpu.vector_store %arg4[%c0_6, %c0_7], %9 {strides = array<i32>} : memref<16x128xbf16, #tpu.memory_space<vmem>>, vector<16x128xbf16>,
    return
  }
  func.func @transform_0(%arg0: i32) -> (i32, i32) {
    %c0_i32 = arith.constant 0 : i32
    %c0_i32_0 = arith.constant 0 : i32
    return %arg0, %c0_i32 : i32, i32
  }
  func.func @transform_1(%arg0: i32) -> (i32, i32) {
    %c0_i32 = arith.constant 0 : i32
    %c0_i32_0 = arith.constant 0 : i32
    %c0_i32_1 = arith.constant 0 : i32
    return %c0_i32, %c0_i32_0 : i32, i32
  }
  func.func @transform_2(%arg0: i32) -> (i32, i32) {
    %c0_i32 = arith.constant 0 : i32
    %c0_i32_0 = arith.constant 0 : i32
    %c0_i32_1 = arith.constant 0 : i32
    return %c0_i32, %c0_i32_0 : i32, i32
  }
  func.func @transform_3(%arg0: i32) -> (i32, i32) {
    %c0_i32 = arith.constant 0 : i32
    %c0_i32_0 = arith.constant 0 : i32
    return %arg0, %c0_i32 : i32, i32
  }
}

module attributes {stable_mosaic.version = 11 : i64} {
  func.func @fc2_kernel(%arg0: i32, %arg1: i32, %arg2: memref<16x128xbf16, #tpu.memory_space<vmem>>, %arg3: memref<128x3584xbf16, #tpu.memory_space<vmem>>, %arg4: memref<1x3584xf32, #tpu.memory_space<vmem>>, %arg5: memref<16x3584xbf16, #tpu.memory_space<vmem>>) attributes {dimension_semantics = [#tpu.dimension_semantics<parallel>, #tpu.dimension_semantics<parallel>], iteration_bounds = array<i64: 2, 1>, scalar_prefetch = 0 : i64, scratch_operands = 0 : i64, tpu.core_type = #tpu.core_type<tc>, window_params = [{transform_indices = @transform_0, window_bounds = array<i64: 16, 128>}, {transform_indices = @transform_1, window_bounds = array<i64: 128, 3584>}, {transform_indices = @transform_2, window_bounds = array<i64: 1, 3584>}, {transform_indices = @transform_3, window_bounds = array<i64: 16, 3584>}]} {
    %c0 = arith.constant 0 : index
    %c0_0 = arith.constant 0 : index
    %0 = vector.load %arg2[%c0, %c0_0] : memref<16x128xbf16, #tpu.memory_space<vmem>>, vector<16x128xbf16>
    %c0_1 = arith.constant 0 : index
    %c0_2 = arith.constant 0 : index
    %1 = vector.load %arg3[%c0_1, %c0_2] : memref<128x3584xbf16, #tpu.memory_space<vmem>>, vector<128x3584xbf16>
    %cst = arith.constant dense<0.000000e+00> : vector<16x3584xf32>
    %2 = tpu.matmul %0, %1, %cst {dimension_numbers = #tpu.dot_dimension_numbers<[1], [0], [0], [1], [0, 0, 1, 1], [], []>} : vector<16x128xbf16>, vector<128x3584xbf16>, vector<16x3584xf32> -> vector<16x3584xf32>
    %c0_3 = arith.constant 0 : index
    %c0_4 = arith.constant 0 : index
    %3 = vector.load %arg4[%c0_3, %c0_4] : memref<1x3584xf32, #tpu.memory_space<vmem>>, vector<1x3584xf32>
    %4 = vector.broadcast %3 : vector<1x3584xf32> to vector<16x3584xf32>
    %5 = arith.addf %2, %4 : vector<16x3584xf32>
    %6 = arith.negf %5 : vector<16x3584xf32>
    %7 = math.exp %6 : vector<16x3584xf32>
    %cst_5 = arith.constant 1.000000e+00 : f32
    %8 = vector.broadcast %cst_5 : f32 to vector<16x3584xf32>
    %9 = arith.addf %8, %7 : vector<16x3584xf32>
    %10 = arith.divf %8, %9 : vector<16x3584xf32>
    %11 = arith.truncf %10 : vector<16x3584xf32> to vector<16x3584xbf16>
    %c0_6 = arith.constant 0 : index
    %c0_7 = arith.constant 0 : index
    %12 = vector.load %arg5[%c0_6, %c0_7] : memref<16x3584xbf16, #tpu.memory_space<vmem>>, vector<16x3584xbf16>
    tpu.vector_store %arg5[%c0_6, %c0_7], %11 {strides = array<i32>} : memref<16x3584xbf16, #tpu.memory_space<vmem>>, vector<16x3584xbf16>,
    return
  }
  func.func @transform_0(%arg0: i32, %arg1: i32) -> (i32, i32) {
    %c0_i32 = arith.constant 0 : i32
    %c0_i32_0 = arith.constant 0 : i32
    return %arg1, %c0_i32 : i32, i32
  }
  func.func @transform_1(%arg0: i32, %arg1: i32) -> (i32, i32) {
    %c0_i32 = arith.constant 0 : i32
    %c0_i32_0 = arith.constant 0 : i32
    return %c0_i32, %arg0 : i32, i32
  }
  func.func @transform_2(%arg0: i32, %arg1: i32) -> (i32, i32) {
    %c0_i32 = arith.constant 0 : i32
    %c0_i32_0 = arith.constant 0 : i32
    return %c0_i32, %arg0 : i32, i32
  }
  func.func @transform_3(%arg0: i32, %arg1: i32) -> (i32, i32) {
    %c0_i32 = arith.constant 0 : i32
    return %arg1, %arg0 : i32, i32
  }
}

</mosaic_0001>

<bundles_post_ra>
// kernel: sequential_autoencoder.3
= control target key start
LH: loop header
LB: loop body
LE: loop exit
PB: predicated region body
PF: predicated region fallthrough
CT: control target
= control target key end

     0   :  { %s4516_s12 = smov 0   ;;  %s4518_s13 = smov 0   ;;  %s5490_s0 = inlined_call_operand.vmem [shape: bf16[16,128], index: 0, kind: input, shape index: {}]   ;;  %s5491_s1 = inlined_call_operand.vmem [shape: bf16[128,7056], index: 1, kind: input, shape index: {}]   ;;  %s5492_s2 = inlined_call_operand.vmem [shape: f32[1,7056], index: 2, kind: input, shape index: {}]   ;;  %s5493_s3 = inlined_call_operand.vmem [shape: bf16[16,7056], index: 3, kind: output, shape index: {}]  }
   0x1   :  { %s4520_s14 = smov 0   ;;  %s4522_s15 = smov 0  }
   0x2   :  { %s4524_s16 = smov 0  }
   0x3 LB: > { %s25_s17 = sadd.s32 1, %s4489_s15  ;;  %s3500_s18 = sadd.s32 4294967295, %s4493_s16   ;;  %s4493_s16 = sphi %s4524_s16, %s13_s16   ;;  %s4489_s15 = sphi %s4522_s15, %s5498_s15   ;;  %s4485_s14 = sphi %s4520_s14, %s5497_s14   ;;  %s4481_s13 = sphi %s4518_s13, %s5496_s13   ;;  %s4477_s12 = sphi %s4516_s12, %s5495_s12  }
   0x4   : > { %p27_p0 = scmp.ge.s32.totalorder %s25_s17, 2  ;;  %p65_p1 = scmp.ne.s32.totalorder %s4481_s13, %s4477_s12 }
   0x5   : > { %p66_p2 = scmp.eq.s32.totalorder %s4493_s16, 0  ;;  %p123_p4 = scmp.eq.s32.totalorder %s3500_s18, 1 }
   0x6   : > { %s5500_s17 = smov (%p27_p0, %s25_s17), 0  ;;  %s58_s20 = sadd.s32 1, %s4481_s13 }
   0x7   : > { %p67_p3 = por %p66_p2, %p65_p1  ;;  %s55_s19 = ssub.s32 %s4489_s15, %s5500_s17 }
   0x8   : > { %p56_p5 = scmp.eq.s32.totalorder %s55_s19, 0  ;;  %p4551_p6 = por %p123_p4, %p65_p1 }
   0x9   : > { %p3504_p7 = scmp.ge.s32.totalorder %s4493_s16, 2 }
   0xa   : > { %s4556_s22 = scalar_select %p56_p5, %s4481_s13, %s58_s20  }
   0xb   : > { %154 = sbr.rel (%p3504_p7) target bundleno = 133 (0x85), region = 20 }
  0x10   : > { %157 = sbr.rel (!%p67_p3) target bundleno = 133 (0x85), region = 24  ;;  %s159_s23 = sand.u32 (%p67_p3), 1, %s4481_s13  }
  0x11   : > { %s3819_s24 = smul.u32 (%p67_p3), 112, %s4489_s15 }
  0x12   : > { %s3849_s25 = smul.u32 (%p67_p3), 1792, %s159_s23 }
  0x13   : > { %s4564_s28 = scalar_lea.vmem (%p67_p3), %s5491_s1, %s3819_s24 }
  0x14   : > { %v177_v0 = vld [vmem:[%s4564_s28] sm:$0xff] (%p67_p3)  ;;  %v179_v1 = vld [vmem:[%s4564_s28 + $0x8] sm:$0xff] (%p67_p3)  ;;  %v181_v2 = vld [vmem:[%s4564_s28 + $0x10] sm:$0xff] (%p67_p3)  ;;  %s4569_s29 = scalar_lea.vmem (%p67_p3), [#allocation2], %s3849_s25 }
  0x15   : > { %178 = vst [vmem:[%s4569_s29] sm:$0xff] %v177_v0  ;;  %180 = vst [vmem:[%s4569_s29 + $0x8] sm:$0xff] %v179_v1  ;;  %v183_v3 = vld [vmem:[%s4564_s28 + $0x18] sm:$0xff]  ;;  %v185_v4 = vld [vmem:[%s4564_s28 + $0x20] sm:$0xff] }
  0x16   : > { %182 = vst [vmem:[%s4569_s29 + $0x10] sm:$0xff] %v181_v2  ;;  %v187_v5 = vld [vmem:[%s4564_s28 + $0x28] sm:$0xff]  ;;  %184 = vst [vmem:[%s4569_s29 + $0x18] sm:$0xff] %v183_v3  ;;  %v189_v6 = vld [vmem:[%s4564_s28 + $0x30] sm:$0xff] }
  0x17   : > { %186 = vst [vmem:[%s4569_s29 + $0x20] sm:$0xff] %v185_v4  ;;  %188 = vst [vmem:[%s4569_s29 + $0x28] sm:$0xff] %v187_v5  ;;  %v191_v7 = vld [vmem:[%s4564_s28 + $0x38] sm:$0xff]  ;;  %v193_v8 = vld [vmem:[%s4564_s28 + $0x40] sm:$0xff] }
  0x18   : > { %190 = vst [vmem:[%s4569_s29 + $0x30] sm:$0xff] %v189_v6  ;;  %192 = vst [vmem:[%s4569_s29 + $0x38] sm:$0xff] %v191_v7  ;;  %v195_v9 = vld [vmem:[%s4564_s28 + $0x48] sm:$0xff]  ;;  %v197_v10 = vld [vmem:[%s4564_s28 + $0x50] sm:$0xff] }
  0x19   : > { %194 = vst [vmem:[%s4569_s29 + $0x40] sm:$0xff] %v193_v8  ;;  %v199_v11 = vld [vmem:[%s4564_s28 + $0x58] sm:$0xff]  ;;  %196 = vst [vmem:[%s4569_s29 + $0x48] sm:$0xff] %v195_v9  ;;  %v201_v12 = vld [vmem:[%s4564_s28 + $0x60] sm:$0xff] }
  0x1a   : > { %198 = vst [vmem:[%s4569_s29 + $0x50] sm:$0xff] %v197_v10  ;;  %200 = vst [vmem:[%s4569_s29 + $0x58] sm:$0xff] %v199_v11  ;;  %v203_v13 = vld [vmem:[%s4564_s28 + $0x68] sm:$0xff]  ;;  %v205_v14 = vld [vmem:[%s4564_s28 + $0xe0] sm:$0xff] }
  0x1b   : > { %202 = vst [vmem:[%s4569_s29 + $0x60] sm:$0xff] %v201_v12  ;;  %204 = vst [vmem:[%s4569_s29 + $0x68] sm:$0xff] %v203_v13  ;;  %v207_v15 = vld [vmem:[%s4564_s28 + $0xe8] sm:$0xff]  ;;  %v209_v16 = vld [vmem:[%s4564_s28 + $0xf0] sm:$0xff] }
  0x1c   : > { %206 = vst [vmem:[%s4569_s29 + $0x70] sm:$0xff] %v205_v14  ;;  %v211_v17 = vld [vmem:[%s4564_s28 + $0xf8] sm:$0xff]  ;;  %208 = vst [vmem:[%s4569_s29 + $0x78] sm:$0xff] %v207_v15  ;;  %v213_v18 = vld [vmem:[%s4564_s28 + $0x100] sm:$0xff] }
  0x1d   : > { %210 = vst [vmem:[%s4569_s29 + $0x80] sm:$0xff] %v209_v16  ;;  %212 = vst [vmem:[%s4569_s29 + $0x88] sm:$0xff] %v211_v17  ;;  %v215_v19 = vld [vmem:[%s4564_s28 + $0x108] sm:$0xff]  ;;  %v217_v20 = vld [vmem:[%s4564_s28 + $0x110] sm:$0xff] }
  0x1e   : > { %214 = vst [vmem:[%s4569_s29 + $0x90] sm:$0xff] %v213_v18  ;;  %216 = vst [vmem:[%s4569_s29 + $0x98] sm:$0xff] %v215_v19  ;;  %v219_v21 = vld [vmem:[%s4564_s28 + $0x118] sm:$0xff]  ;;  %v221_v22 = vld [vmem:[%s4564_s28 + $0x120] sm:$0xff] }
  0x1f   : > { %218 = vst [vmem:[%s4569_s29 + $0xa0] sm:$0xff] %v217_v20  ;;  %v223_v23 = vld [vmem:[%s4564_s28 + $0x128] sm:$0xff]  ;;  %220 = vst [vmem:[%s4569_s29 + $0xa8] sm:$0xff] %v219_v21  ;;  %v225_v24 = vld [vmem:[%s4564_s28 + $0x130] sm:$0xff] }
  0x20   : > { %222 = vst [vmem:[%s4569_s29 + $0xb0] sm:$0xff] %v221_v22  ;;  %224 = vst [vmem:[%s4569_s29 + $0xb8] sm:$0xff] %v223_v23  ;;  %v227_v25 = vld [vmem:[%s4564_s28 + $0x138] sm:$0xff]  ;;  %v229_v26 = vld [vmem:[%s4564_s28 + $0x140] sm:$0xff] }
  0x21   : > { %226 = vst [vmem:[%s4569_s29 + $0xc0] sm:$0xff] %v225_v24  ;;  %228 = vst [vmem:[%s4569_s29 + $0xc8] sm:$0xff] %v227_v25  ;;  %v231_v27 = vld [vmem:[%s4564_s28 + $0x148] sm:$0xff]  ;;  %v233_v28 = vld [vmem:[%s4564_s28 + $0x1c0] sm:$0xff] }
  0x22   : > { %230 = vst [vmem:[%s4569_s29 + $0xd0] sm:$0xff] %v229_v26  ;;  %v235_v29 = vld [vmem:[%s4564_s28 + $0x1c8] sm:$0xff]  ;;  %232 = vst [vmem:[%s4569_s29 + $0xd8] sm:$0xff] %v231_v27  ;;  %v237_v30 = vld [vmem:[%s4564_s28 + $0x1d0] sm:$0xff] }
  0x23   : > { %234 = vst [vmem:[%s4569_s29 + $0xe0] sm:$0xff] %v233_v28  ;;  %236 = vst [vmem:[%s4569_s29 + $0xe8] sm:$0xff] %v235_v29  ;;  %v239_v31 = vld [vmem:[%s4564_s28 + $0x1d8] sm:$0xff]  ;;  %v241_v32 = vld [vmem:[%s4564_s28 + $0x1e0] sm:$0xff] }
  0x24   : > { %238 = vst [vmem:[%s4569_s29 + $0xf0] sm:$0xff] %v237_v30  ;;  %240 = vst [vmem:[%s4569_s29 + $0xf8] sm:$0xff] %v239_v31  ;;  %v243_v33 = vld [vmem:[%s4564_s28 + $0x1e8] sm:$0xff]  ;;  %v245_v34 = vld [vmem:[%s4564_s28 + $0x1f0] sm:$0xff] }
  0x25   : > { %242 = vst [vmem:[%s4569_s29 + $0x100] sm:$0xff] %v241_v32  ;;  %v247_v35 = vld [vmem:[%s4564_s28 + $0x1f8] sm:$0xff]  ;;  %244 = vst [vmem:[%s4569_s29 + $0x108] sm:$0xff] %v243_v33  ;;  %v249_v36 = vld [vmem:[%s4564_s28 + $0x200] sm:$0xff] }
  0x26   : > { %246 = vst [vmem:[%s4569_s29 + $0x110] sm:$0xff] %v245_v34  ;;  %248 = vst [vmem:[%s4569_s29 + $0x118] sm:$0xff] %v247_v35  ;;  %v251_v37 = vld [vmem:[%s4564_s28 + $0x208] sm:$0xff]  ;;  %v253_v38 = vld [vmem:[%s4564_s28 + $0x210] sm:$0xff] }
  0x27   : > { %250 = vst [vmem:[%s4569_s29 + $0x120] sm:$0xff] %v249_v36  ;;  %252 = vst [vmem:[%s4569_s29 + $0x128] sm:$0xff] %v251_v37  ;;  %v255_v39 = vld [vmem:[%s4564_s28 + $0x218] sm:$0xff]  ;;  %v257_v40 = vld [vmem:[%s4564_s28 + $0x220] sm:$0xff] }
  0x28   : > { %254 = vst [vmem:[%s4569_s29 + $0x130] sm:$0xff] %v253_v38  ;;  %v259_v41 = vld [vmem:[%s4564_s28 + $0x228] sm:$0xff]  ;;  %256 = vst [vmem:[%s4569_s29 + $0x138] sm:$0xff] %v255_v39  ;;  %v261_v42 = vld [vmem:[%s4564_s28 + $0x2a0] sm:$0xff] }
  0x29   : > { %258 = vst [vmem:[%s4569_s29 + $0x140] sm:$0xff] %v257_v40  ;;  %260 = vst [vmem:[%s4569_s29 + $0x148] sm:$0xff] %v259_v41  ;;  %v263_v43 = vld [vmem:[%s4564_s28 + $0x2a8] sm:$0xff]  ;;  %v265_v44 = vld [vmem:[%s4564_s28 + $0x2b0] sm:$0xff] }
  0x2a   : > { %262 = vst [vmem:[%s4569_s29 + $0x150] sm:$0xff] %v261_v42  ;;  %264 = vst [vmem:[%s4569_s29 + $0x158] sm:$0xff] %v263_v43  ;;  %v267_v45 = vld [vmem:[%s4564_s28 + $0x2b8] sm:$0xff]  ;;  %v269_v46 = vld [vmem:[%s4564_s28 + $0x2c0] sm:$0xff] }
  0x2b   : > { %266 = vst [vmem:[%s4569_s29 + $0x160] sm:$0xff] %v265_v44  ;;  %v271_v47 = vld [vmem:[%s4564_s28 + $0x2c8] sm:$0xff]  ;;  %268 = vst [vmem:[%s4569_s29 + $0x168] sm:$0xff] %v267_v45  ;;  %v273_v48 = vld [vmem:[%s4564_s28 + $0x2d0] sm:$0xff] }
  0x2c   : > { %270 = vst [vmem:[%s4569_s29 + $0x170] sm:$0xff] %v269_v46  ;;  %272 = vst [vmem:[%s4569_s29 + $0x178] sm:$0xff] %v271_v47  ;;  %v275_v49 = vld [vmem:[%s4564_s28 + $0x2d8] sm:$0xff]  ;;  %v277_v50 = vld [vmem:[%s4564_s28 + $0x2e0] sm:$0xff] }
  0x2d   : > { %274 = vst [vmem:[%s4569_s29 + $0x180] sm:$0xff] %v273_v48  ;;  %276 = vst [vmem:[%s4569_s29 + $0x188] sm:$0xff] %v275_v49  ;;  %v279_v51 = vld [vmem:[%s4564_s28 + $0x2e8] sm:$0xff]  ;;  %v281_v52 = vld [vmem:[%s4564_s28 + $0x2f0] sm:$0xff] }
  0x2e   : > { %278 = vst [vmem:[%s4569_s29 + $0x190] sm:$0xff] %v277_v50  ;;  %v283_v53 = vld [vmem:[%s4564_s28 + $0x2f8] sm:$0xff]  ;;  %280 = vst [vmem:[%s4569_s29 + $0x198] sm:$0xff] %v279_v51  ;;  %v285_v54 = vld [vmem:[%s4564_s28 + $0x300] sm:$0xff] }
  0x2f   : > { %282 = vst [vmem:[%s4569_s29 + $0x1a0] sm:$0xff] %v281_v52  ;;  %284 = vst [vmem:[%s4569_s29 + $0x1a8] sm:$0xff] %v283_v53  ;;  %v287_v55 = vld [vmem:[%s4564_s28 + $0x308] sm:$0xff]  ;;  %v289_v56 = vld [vmem:[%s4564_s28 + $0x380] sm:$0xff] }
  0x30   : > { %286 = vst [vmem:[%s4569_s29 + $0x1b0] sm:$0xff] %v285_v54  ;;  %288 = vst [vmem:[%s4569_s29 + $0x1b8] sm:$0xff] %v287_v55  ;;  %v291_v57 = vld [vmem:[%s4564_s28 + $0x388] sm:$0xff]  ;;  %v293_v58 = vld [vmem:[%s4564_s28 + $0x390] sm:$0xff] }
  0x31   : > { %290 = vst [vmem:[%s4569_s29 + $0x1c0] sm:$0xff] %v289_v56  ;;  %v295_v59 = vld [vmem:[%s4564_s28 + $0x398] sm:$0xff]  ;;  %292 = vst [vmem:[%s4569_s29 + $0x1c8] sm:$0xff] %v291_v57  ;;  %v297_v60 = vld [vmem:[%s4564_s28 + $0x3a0] sm:$0xff] }
  0x32   : > { %294 = vst [vmem:[%s4569_s29 + $0x1d0] sm:$0xff] %v293_v58  ;;  %296 = vst [vmem:[%s4569_s29 + $0x1d8] sm:$0xff] %v295_v59  ;;  %v299_v61 = vld [vmem:[%s4564_s28 + $0x3a8] sm:$0xff]  ;;  %v301_v62 = vld [vmem:[%s4564_s28 + $0x3b0] sm:$0xff] }
  0x33   : > { %298 = vst [vmem:[%s4569_s29 + $0x1e0] sm:$0xff] %v297_v60  ;;  %300 = vst [vmem:[%s4569_s29 + $0x1e8] sm:$0xff] %v299_v61  ;;  %v303_v63 = vld [vmem:[%s4564_s28 + $0x3b8] sm:$0xff]  ;;  %v305_v0 = vld [vmem:[%s4564_s28 + $0x3c0] sm:$0xff] }
  0x34   : > { %302 = vst [vmem:[%s4569_s29 + $0x1f0] sm:$0xff] %v301_v62  ;;  %v307_v1 = vld [vmem:[%s4564_s28 + $0x3c8] sm:$0xff]  ;;  %304 = vst [vmem:[%s4569_s29 + $0x1f8] sm:$0xff] %v303_v63  ;;  %v309_v2 = vld [vmem:[%s4564_s28 + $0x3d0] sm:$0xff] }
  0x35   : > { %306 = vst [vmem:[%s4569_s29 + $0x200] sm:$0xff] %v305_v0  ;;  %308 = vst [vmem:[%s4569_s29 + $0x208] sm:$0xff] %v307_v1  ;;  %v311_v3 = vld [vmem:[%s4564_s28 + $0x3d8] sm:$0xff]  ;;  %v313_v4 = vld [vmem:[%s4564_s28 + $0x3e0] sm:$0xff] }
  0x36   : > { %310 = vst [vmem:[%s4569_s29 + $0x210] sm:$0xff] %v309_v2  ;;  %312 = vst [vmem:[%s4569_s29 + $0x218] sm:$0xff] %v311_v3  ;;  %v315_v5 = vld [vmem:[%s4564_s28 + $0x3e8] sm:$0xff]  ;;  %v317_v6 = vld [vmem:[%s4564_s28 + $0x460] sm:$0xff] }
  0x37   : > { %314 = vst [vmem:[%s4569_s29 + $0x220] sm:$0xff] %v313_v4  ;;  %v319_v7 = vld [vmem:[%s4564_s28 + $0x468] sm:$0xff]  ;;  %316 = vst [vmem:[%s4569_s29 + $0x228] sm:$0xff] %v315_v5  ;;  %v321_v8 = vld [vmem:[%s4564_s28 + $0x470] sm:$0xff] }
  0x38   : > { %318 = vst [vmem:[%s4569_s29 + $0x230] sm:$0xff] %v317_v6  ;;  %320 = vst [vmem:[%s4569_s29 + $0x238] sm:$0xff] %v319_v7  ;;  %v323_v9 = vld [vmem:[%s4564_s28 + $0x478] sm:$0xff]  ;;  %v325_v10 = vld [vmem:[%s4564_s28 + $0x480] sm:$0xff] }
  0x39   : > { %322 = vst [vmem:[%s4569_s29 + $0x240] sm:$0xff] %v321_v8  ;;  %324 = vst [vmem:[%s4569_s29 + $0x248] sm:$0xff] %v323_v9  ;;  %v327_v11 = vld [vmem:[%s4564_s28 + $0x488] sm:$0xff]  ;;  %v329_v12 = vld [vmem:[%s4564_s28 + $0x490] sm:$0xff] }
  0x3a   : > { %326 = vst [vmem:[%s4569_s29 + $0x250] sm:$0xff] %v325_v10  ;;  %v331_v13 = vld [vmem:[%s4564_s28 + $0x498] sm:$0xff]  ;;  %328 = vst [vmem:[%s4569_s29 + $0x258] sm:$0xff] %v327_v11  ;;  %v333_v14 = vld [vmem:[%s4564_s28 + $0x4a0] sm:$0xff] }
  0x3b   : > { %330 = vst [vmem:[%s4569_s29 + $0x260] sm:$0xff] %v329_v12  ;;  %332 = vst [vmem:[%s4569_s29 + $0x268] sm:$0xff] %v331_v13  ;;  %v335_v15 = vld [vmem:[%s4564_s28 + $0x4a8] sm:$0xff]  ;;  %v337_v16 = vld [vmem:[%s4564_s28 + $0x4b0] sm:$0xff] }
  0x3c   : > { %334 = vst [vmem:[%s4569_s29 + $0x270] sm:$0xff] %v333_v14  ;;  %336 = vst [vmem:[%s4569_s29 + $0x278] sm:$0xff] %v335_v15  ;;  %v339_v17 = vld [vmem:[%s4564_s28 + $0x4b8] sm:$0xff]  ;;  %v341_v18 = vld [vmem:[%s4564_s28 + $0x4c0] sm:$0xff] }
  0x3d   : > { %338 = vst [vmem:[%s4569_s29 + $0x280] sm:$0xff] %v337_v16  ;;  %v343_v19 = vld [vmem:[%s4564_s28 + $0x4c8] sm:$0xff]  ;;  %340 = vst [vmem:[%s4569_s29 + $0x288] sm:$0xff] %v339_v17  ;;  %v345_v20 = vld [vmem:[%s4564_s28 + $0x540] sm:$0xff] }
  0x3e   : > { %342 = vst [vmem:[%s4569_s29 + $0x290] sm:$0xff] %v341_v18  ;;  %344 = vst [vmem:[%s4569_s29 + $0x298] sm:$0xff] %v343_v19  ;;  %v347_v21 = vld [vmem:[%s4564_s28 + $0x548] sm:$0xff]  ;;  %v349_v22 = vld [vmem:[%s4564_s28 + $0x550] sm:$0xff] }
  0x3f   : > { %346 = vst [vmem:[%s4569_s29 + $0x2a0] sm:$0xff] %v345_v20  ;;  %348 = vst [vmem:[%s4569_s29 + $0x2a8] sm:$0xff] %v347_v21  ;;  %v351_v23 = vld [vmem:[%s4564_s28 + $0x558] sm:$0xff]  ;;  %v353_v24 = vld [vmem:[%s4564_s28 + $0x560] sm:$0xff] }
  0x40   : > { %350 = vst [vmem:[%s4569_s29 + $0x2b0] sm:$0xff] %v349_v22  ;;  %v355_v25 = vld [vmem:[%s4564_s28 + $0x568] sm:$0xff]  ;;  %352 = vst [vmem:[%s4569_s29 + $0x2b8] sm:$0xff] %v351_v23  ;;  %v357_v26 = vld [vmem:[%s4564_s28 + $0x570] sm:$0xff] }
  0x41   : > { %354 = vst [vmem:[%s4569_s29 + $0x2c0] sm:$0xff] %v353_v24  ;;  %356 = vst [vmem:[%s4569_s29 + $0x2c8] sm:$0xff] %v355_v25  ;;  %v359_v27 = vld [vmem:[%s4564_s28 + $0x578] sm:$0xff]  ;;  %v361_v28 = vld [vmem:[%s4564_s28 + $0x580] sm:$0xff] }
  0x42   : > { %358 = vst [vmem:[%s4569_s29 + $0x2d0] sm:$0xff] %v357_v26  ;;  %360 = vst [vmem:[%s4569_s29 + $0x2d8] sm:$0xff] %v359_v27  ;;  %v363_v29 = vld [vmem:[%s4564_s28 + $0x588] sm:$0xff]  ;;  %v365_v30 = vld [vmem:[%s4564_s28 + $0x590] sm:$0xff] }
  0x43   : > { %362 = vst [vmem:[%s4569_s29 + $0x2e0] sm:$0xff] %v361_v28  ;;  %v367_v31 = vld [vmem:[%s4564_s28 + $0x598] sm:$0xff]  ;;  %364 = vst [vmem:[%s4569_s29 + $0x2e8] sm:$0xff] %v363_v29  ;;  %v369_v32 = vld [vmem:[%s4564_s28 + $0x5a0] sm:$0xff] }
  0x44   : > { %366 = vst [vmem:[%s4569_s29 + $0x2f0] sm:$0xff] %v365_v30  ;;  %368 = vst [vmem:[%s4569_s29 + $0x2f8] sm:$0xff] %v367_v31  ;;  %v371_v33 = vld [vmem:[%s4564_s28 + $0x5a8] sm:$0xff]  ;;  %v373_v34 = vld [vmem:[%s4564_s28 + $0x620] sm:$0xff] }
  0x45   : > { %370 = vst [vmem:[%s4569_s29 + $0x300] sm:$0xff] %v369_v32  ;;  %372 = vst [vmem:[%s4569_s29 + $0x308] sm:$0xff] %v371_v33  ;;  %v375_v35 = vld [vmem:[%s4564_s28 + $0x628] sm:$0xff]  ;;  %v377_v36 = vld [vmem:[%s4564_s28 + $0x630] sm:$0xff] }
  0x46   : > { %374 = vst [vmem:[%s4569_s29 + $0x310] sm:$0xff] %v373_v34  ;;  %v379_v37 = vld [vmem:[%s4564_s28 + $0x638] sm:$0xff]  ;;  %376 = vst [vmem:[%s4569_s29 + $0x318] sm:$0xff] %v375_v35  ;;  %v381_v38 = vld [vmem:[%s4564_s28 + $0x640] sm:$0xff] }
  0x47   : > { %378 = vst [vmem:[%s4569_s29 + $0x320] sm:$0xff] %v377_v36  ;;  %380 = vst [vmem:[%s4569_s29 + $0x328] sm:$0xff] %v379_v37  ;;  %v383_v39 = vld [vmem:[%s4564_s28 + $0x648] sm:$0xff]  ;;  %v385_v40 = vld [vmem:[%s4564_s28 + $0x650] sm:$0xff] }
  0x48   : > { %382 = vst [vmem:[%s4569_s29 + $0x330] sm:$0xff] %v381_v38  ;;  %384 = vst [vmem:[%s4569_s29 + $0x338] sm:$0xff] %v383_v39  ;;  %v387_v41 = vld [vmem:[%s4564_s28 + $0x658] sm:$0xff]  ;;  %v389_v42 = vld [vmem:[%s4564_s28 + $0x660] sm:$0xff] }
  0x49   : > { %386 = vst [vmem:[%s4569_s29 + $0x340] sm:$0xff] %v385_v40  ;;  %v391_v43 = vld [vmem:[%s4564_s28 + $0x668] sm:$0xff]  ;;  %388 = vst [vmem:[%s4569_s29 + $0x348] sm:$0xff] %v387_v41  ;;  %v393_v44 = vld [vmem:[%s4564_s28 + $0x670] sm:$0xff] }
  0x4a   : > { %390 = vst [vmem:[%s4569_s29 + $0x350] sm:$0xff] %v389_v42  ;;  %392 = vst [vmem:[%s4569_s29 + $0x358] sm:$0xff] %v391_v43  ;;  %v395_v45 = vld [vmem:[%s4564_s28 + $0x678] sm:$0xff]  ;;  %v397_v46 = vld [vmem:[%s4564_s28 + $0x680] sm:$0xff] }
  0x4b   : > { %394 = vst [vmem:[%s4569_s29 + $0x360] sm:$0xff] %v393_v44  ;;  %396 = vst [vmem:[%s4569_s29 + $0x368] sm:$0xff] %v395_v45  ;;  %v399_v47 = vld [vmem:[%s4564_s28 + $0x688] sm:$0xff]  ;;  %v401_v48 = vld [vmem:[%s4564_s28 + $0x700] sm:$0xff] }
  0x4c   : > { %398 = vst [vmem:[%s4569_s29 + $0x370] sm:$0xff] %v397_v46  ;;  %v403_v49 = vld [vmem:[%s4564_s28 + $0x708] sm:$0xff]  ;;  %400 = vst [vmem:[%s4569_s29 + $0x378] sm:$0xff] %v399_v47  ;;  %v405_v50 = vld [vmem:[%s4564_s28 + $0x710] sm:$0xff] }
  0x4d   : > { %402 = vst [vmem:[%s4569_s29 + $0x380] sm:$0xff] %v401_v48  ;;  %404 = vst [vmem:[%s4569_s29 + $0x388] sm:$0xff] %v403_v49  ;;  %v407_v51 = vld [vmem:[%s4564_s28 + $0x718] sm:$0xff]  ;;  %v409_v52 = vld [vmem:[%s4564_s28 + $0x720] sm:$0xff] }
  0x4e   : > { %406 = vst [vmem:[%s4569_s29 + $0x390] sm:$0xff] %v405_v50  ;;  %408 = vst [vmem:[%s4569_s29 + $0x398] sm:$0xff] %v407_v51  ;;  %v411_v53 = vld [vmem:[%s4564_s28 + $0x728] sm:$0xff]  ;;  %v413_v54 = vld [vmem:[%s4564_s28 + $0x730] sm:$0xff] }
  0x4f   : > { %410 = vst [vmem:[%s4569_s29 + $0x3a0] sm:$0xff] %v409_v52  ;;  %v415_v55 = vld [vmem:[%s4564_s28 + $0x738] sm:$0xff]  ;;  %412 = vst [vmem:[%s4569_s29 + $0x3a8] sm:$0xff] %v411_v53  ;;  %v417_v56 = vld [vmem:[%s4564_s28 + $0x740] sm:$0xff] }
  0x50   : > { %414 = vst [vmem:[%s4569_s29 + $0x3b0] sm:$0xff] %v413_v54  ;;  %416 = vst [vmem:[%s4569_s29 + $0x3b8] sm:$0xff] %v415_v55  ;;  %v419_v57 = vld [vmem:[%s4564_s28 + $0x748] sm:$0xff]  ;;  %v421_v58 = vld [vmem:[%s4564_s28 + $0x750] sm:$0xff] }
  0x51   : > { %418 = vst [vmem:[%s4569_s29 + $0x3c0] sm:$0xff] %v417_v56  ;;  %420 = vst [vmem:[%s4569_s29 + $0x3c8] sm:$0xff] %v419_v57  ;;  %v423_v59 = vld [vmem:[%s4564_s28 + $0x758] sm:$0xff]  ;;  %v425_v60 = vld [vmem:[%s4564_s28 + $0x760] sm:$0xff] }
  0x52   : > { %422 = vst [vmem:[%s4569_s29 + $0x3d0] sm:$0xff] %v421_v58  ;;  %v427_v61 = vld [vmem:[%s4564_s28 + $0x768] sm:$0xff]  ;;  %424 = vst [vmem:[%s4569_s29 + $0x3d8] sm:$0xff] %v423_v59  ;;  %v429_v62 = vld [vmem:[%s4564_s28 + $0x7e0] sm:$0xff] }
  0x53   : > { %426 = vst [vmem:[%s4569_s29 + $0x3e0] sm:$0xff] %v425_v60  ;;  %428 = vst [vmem:[%s4569_s29 + $0x3e8] sm:$0xff] %v427_v61  ;;  %v431_v63 = vld [vmem:[%s4564_s28 + $0x7e8] sm:$0xff]  ;;  %v433_v0 = vld [vmem:[%s4564_s28 + $0x7f0] sm:$0xff] }
  0x54   : > { %430 = vst [vmem:[%s4569_s29 + $0x3f0] sm:$0xff] %v429_v62  ;;  %432 = vst [vmem:[%s4569_s29 + $0x3f8] sm:$0xff] %v431_v63  ;;  %v435_v1 = vld [vmem:[%s4564_s28 + $0x7f8] sm:$0xff]  ;;  %v437_v2 = vld [vmem:[%s4564_s28 + $0x800] sm:$0xff] }
  0x55   : > { %434 = vst [vmem:[%s4569_s29 + $0x400] sm:$0xff] %v433_v0  ;;  %v439_v3 = vld [vmem:[%s4564_s28 + $0x808] sm:$0xff]  ;;  %436 = vst [vmem:[%s4569_s29 + $0x408] sm:$0xff] %v435_v1  ;;  %v441_v4 = vld [vmem:[%s4564_s28 + $0x810] sm:$0xff] }
  0x56   : > { %438 = vst [vmem:[%s4569_s29 + $0x410] sm:$0xff] %v437_v2  ;;  %440 = vst [vmem:[%s4569_s29 + $0x418] sm:$0xff] %v439_v3  ;;  %v443_v5 = vld [vmem:[%s4564_s28 + $0x818] sm:$0xff]  ;;  %v445_v6 = vld [vmem:[%s4564_s28 + $0x820] sm:$0xff] }
  0x57   : > { %442 = vst [vmem:[%s4569_s29 + $0x420] sm:$0xff] %v441_v4  ;;  %444 = vst [vmem:[%s4569_s29 + $0x428] sm:$0xff] %v443_v5  ;;  %v447_v7 = vld [vmem:[%s4564_s28 + $0x828] sm:$0xff]  ;;  %v449_v8 = vld [vmem:[%s4564_s28 + $0x830] sm:$0xff] }
  0x58   : > { %446 = vst [vmem:[%s4569_s29 + $0x430] sm:$0xff] %v445_v6  ;;  %v451_v9 = vld [vmem:[%s4564_s28 + $0x838] sm:$0xff]  ;;  %448 = vst [vmem:[%s4569_s29 + $0x438] sm:$0xff] %v447_v7  ;;  %v453_v10 = vld [vmem:[%s4564_s28 + $0x840] sm:$0xff] }
  0x59   : > { %450 = vst [vmem:[%s4569_s29 + $0x440] sm:$0xff] %v449_v8  ;;  %452 = vst [vmem:[%s4569_s29 + $0x448] sm:$0xff] %v451_v9  ;;  %v455_v11 = vld [vmem:[%s4564_s28 + $0x848] sm:$0xff]  ;;  %v457_v12 = vld [vmem:[%s4564_s28 + $0x8c0] sm:$0xff] }
  0x5a   : > { %454 = vst [vmem:[%s4569_s29 + $0x450] sm:$0xff] %v453_v10  ;;  %456 = vst [vmem:[%s4569_s29 + $0x458] sm:$0xff] %v455_v11  ;;  %v459_v13 = vld [vmem:[%s4564_s28 + $0x8c8] sm:$0xff]  ;;  %v461_v14 = vld [vmem:[%s4564_s28 + $0x8d0] sm:$0xff] }
  0x5b   : > { %458 = vst [vmem:[%s4569_s29 + $0x460] sm:$0xff] %v457_v12  ;;  %v463_v15 = vld [vmem:[%s4564_s28 + $0x8d8] sm:$0xff]  ;;  %460 = vst [vmem:[%s4569_s29 + $0x468] sm:$0xff] %v459_v13  ;;  %v465_v16 = vld [vmem:[%s4564_s28 + $0x8e0] sm:$0xff] }
  0x5c   : > { %462 = vst [vmem:[%s4569_s29 + $0x470] sm:$0xff] %v461_v14  ;;  %464 = vst [vmem:[%s4569_s29 + $0x478] sm:$0xff] %v463_v15  ;;  %v467_v17 = vld [vmem:[%s4564_s28 + $0x8e8] sm:$0xff]  ;;  %v469_v18 = vld [vmem:[%s4564_s28 + $0x8f0] sm:$0xff] }
  0x5d   : > { %466 = vst [vmem:[%s4569_s29 + $0x480] sm:$0xff] %v465_v16  ;;  %468 = vst [vmem:[%s4569_s29 + $0x488] sm:$0xff] %v467_v17  ;;  %v471_v19 = vld [vmem:[%s4564_s28 + $0x8f8] sm:$0xff]  ;;  %v473_v20 = vld [vmem:[%s4564_s28 + $0x900] sm:$0xff] }
  0x5e   : > { %470 = vst [vmem:[%s4569_s29 + $0x490] sm:$0xff] %v469_v18  ;;  %v475_v21 = vld [vmem:[%s4564_s28 + $0x908] sm:$0xff]  ;;  %472 = vst [vmem:[%s4569_s29 + $0x498] sm:$0xff] %v471_v19  ;;  %v477_v22 = vld [vmem:[%s4564_s28 + $0x910] sm:$0xff] }
  0x5f   : > { %474 = vst [vmem:[%s4569_s29 + $0x4a0] sm:$0xff] %v473_v20  ;;  %476 = vst [vmem:[%s4569_s29 + $0x4a8] sm:$0xff] %v475_v21  ;;  %v479_v23 = vld [vmem:[%s4564_s28 + $0x918] sm:$0xff]  ;;  %v481_v24 = vld [vmem:[%s4564_s28 + $0x920] sm:$0xff] }
  0x60   : > { %478 = vst [vmem:[%s4569_s29 + $0x4b0] sm:$0xff] %v477_v22  ;;  %480 = vst [vmem:[%s4569_s29 + $0x4b8] sm:$0xff] %v479_v23  ;;  %v483_v25 = vld [vmem:[%s4564_s28 + $0x928] sm:$0xff]  ;;  %v485_v26 = vld [vmem:[%s4564_s28 + $0x9a0] sm:$0xff] }
  0x61   : > { %482 = vst [vmem:[%s4569_s29 + $0x4c0] sm:$0xff] %v481_v24  ;;  %v487_v27 = vld [vmem:[%s4564_s28 + $0x9a8] sm:$0xff]  ;;  %484 = vst [vmem:[%s4569_s29 + $0x4c8] sm:$0xff] %v483_v25  ;;  %v489_v28 = vld [vmem:[%s4564_s28 + $0x9b0] sm:$0xff] }
  0x62   : > { %486 = vst [vmem:[%s4569_s29 + $0x4d0] sm:$0xff] %v485_v26  ;;  %488 = vst [vmem:[%s4569_s29 + $0x4d8] sm:$0xff] %v487_v27  ;;  %v491_v29 = vld [vmem:[%s4564_s28 + $0x9b8] sm:$0xff]  ;;  %v493_v30 = vld [vmem:[%s4564_s28 + $0x9c0] sm:$0xff] }
  0x63   : > { %490 = vst [vmem:[%s4569_s29 + $0x4e0] sm:$0xff] %v489_v28  ;;  %492 = vst [vmem:[%s4569_s29 + $0x4e8] sm:$0xff] %v491_v29  ;;  %v495_v31 = vld [vmem:[%s4564_s28 + $0x9c8] sm:$0xff]  ;;  %v497_v32 = vld [vmem:[%s4564_s28 + $0x9d0] sm:$0xff] }
  0x64   : > { %494 = vst [vmem:[%s4569_s29 + $0x4f0] sm:$0xff] %v493_v30  ;;  %v499_v33 = vld [vmem:[%s4564_s28 + $0x9d8] sm:$0xff]  ;;  %496 = vst [vmem:[%s4569_s29 + $0x4f8] sm:$0xff] %v495_v31  ;;  %v501_v34 = vld [vmem:[%s4564_s28 + $0x9e0] sm:$0xff] }
  0x65   : > { %498 = vst [vmem:[%s4569_s29 + $0x500] sm:$0xff] %v497_v32  ;;  %500 = vst [vmem:[%s4569_s29 + $0x508] sm:$0xff] %v499_v33  ;;  %v503_v35 = vld [vmem:[%s4564_s28 + $0x9e8] sm:$0xff]  ;;  %v505_v36 = vld [vmem:[%s4564_s28 + $0x9f0] sm:$0xff] }
  0x66   : > { %502 = vst [vmem:[%s4569_s29 + $0x510] sm:$0xff] %v501_v34  ;;  %504 = vst [vmem:[%s4569_s29 + $0x518] sm:$0xff] %v503_v35  ;;  %v507_v37 = vld [vmem:[%s4564_s28 + $0x9f8] sm:$0xff]  ;;  %v509_v38 = vld [vmem:[%s4564_s28 + $0xa00] sm:$0xff] }
  0x67   : > { %506 = vst [vmem:[%s4569_s29 + $0x520] sm:$0xff] %v505_v36  ;;  %v511_v39 = vld [vmem:[%s4564_s28 + $0xa08] sm:$0xff]  ;;  %508 = vst [vmem:[%s4569_s29 + $0x528] sm:$0xff] %v507_v37  ;;  %v513_v40 = vld [vmem:[%s4564_s28 + $0xa80] sm:$0xff] }
  0x68   : > { %510 = vst [vmem:[%s4569_s29 + $0x530] sm:$0xff] %v509_v38  ;;  %512 = vst [vmem:[%s4569_s29 + $0x538] sm:$0xff] %v511_v39  ;;  %v515_v41 = vld [vmem:[%s4564_s28 + $0xa88] sm:$0xff]  ;;  %v517_v42 = vld [vmem:[%s4564_s28 + $0xa90] sm:$0xff] }
  0x69   : > { %514 = vst [vmem:[%s4569_s29 + $0x540] sm:$0xff] %v513_v40  ;;  %516 = vst [vmem:[%s4569_s29 + $0x548] sm:$0xff] %v515_v41  ;;  %v519_v43 = vld [vmem:[%s4564_s28 + $0xa98] sm:$0xff]  ;;  %v521_v44 = vld [vmem:[%s4564_s28 + $0xaa0] sm:$0xff] }
  0x6a   : > { %518 = vst [vmem:[%s4569_s29 + $0x550] sm:$0xff] %v517_v42  ;;  %v523_v45 = vld [vmem:[%s4564_s28 + $0xaa8] sm:$0xff]  ;;  %520 = vst [vmem:[%s4569_s29 + $0x558] sm:$0xff] %v519_v43  ;;  %v525_v46 = vld [vmem:[%s4564_s28 + $0xab0] sm:$0xff] }
  0x6b   : > { %522 = vst [vmem:[%s4569_s29 + $0x560] sm:$0xff] %v521_v44  ;;  %524 = vst [vmem:[%s4569_s29 + $0x568] sm:$0xff] %v523_v45  ;;  %v527_v47 = vld [vmem:[%s4564_s28 + $0xab8] sm:$0xff]  ;;  %v529_v48 = vld [vmem:[%s4564_s28 + $0xac0] sm:$0xff] }
  0x6c   : > { %526 = vst [vmem:[%s4569_s29 + $0x570] sm:$0xff] %v525_v46  ;;  %528 = vst [vmem:[%s4569_s29 + $0x578] sm:$0xff] %v527_v47  ;;  %v531_v49 = vld [vmem:[%s4564_s28 + $0xac8] sm:$0xff]  ;;  %v533_v50 = vld [vmem:[%s4564_s28 + $0xad0] sm:$0xff] }
  0x6d   : > { %530 = vst [vmem:[%s4569_s29 + $0x580] sm:$0xff] %v529_v48  ;;  %v535_v51 = vld [vmem:[%s4564_s28 + $0xad8] sm:$0xff]  ;;  %532 = vst [vmem:[%s4569_s29 + $0x588] sm:$0xff] %v531_v49  ;;  %v537_v52 = vld [vmem:[%s4564_s28 + $0xae0] sm:$0xff] }
  0x6e   : > { %534 = vst [vmem:[%s4569_s29 + $0x590] sm:$0xff] %v533_v50  ;;  %536 = vst [vmem:[%s4569_s29 + $0x598] sm:$0xff] %v535_v51  ;;  %v539_v53 = vld [vmem:[%s4564_s28 + $0xae8] sm:$0xff]  ;;  %v541_v54 = vld [vmem:[%s4564_s28 + $0xb60] sm:$0xff] }
  0x6f   : > { %538 = vst [vmem:[%s4569_s29 + $0x5a0] sm:$0xff] %v537_v52  ;;  %540 = vst [vmem:[%s4569_s29 + $0x5a8] sm:$0xff] %v539_v53  ;;  %v543_v55 = vld [vmem:[%s4564_s28 + $0xb68] sm:$0xff]  ;;  %v545_v56 = vld [vmem:[%s4564_s28 + $0xb70] sm:$0xff] }
  0x70   : > { %542 = vst [vmem:[%s4569_s29 + $0x5b0] sm:$0xff] %v541_v54  ;;  %v547_v57 = vld [vmem:[%s4564_s28 + $0xb78] sm:$0xff]  ;;  %544 = vst [vmem:[%s4569_s29 + $0x5b8] sm:$0xff] %v543_v55  ;;  %v549_v58 = vld [vmem:[%s4564_s28 + $0xb80] sm:$0xff] }
  0x71   : > { %546 = vst [vmem:[%s4569_s29 + $0x5c0] sm:$0xff] %v545_v56  ;;  %548 = vst [vmem:[%s4569_s29 + $0x5c8] sm:$0xff] %v547_v57  ;;  %v551_v59 = vld [vmem:[%s4564_s28 + $0xb88] sm:$0xff]  ;;  %v553_v60 = vld [vmem:[%s4564_s28 + $0xb90] sm:$0xff] }
  0x72   : > { %550 = vst [vmem:[%s4569_s29 + $0x5d0] sm:$0xff] %v549_v58  ;;  %552 = vst [vmem:[%s4569_s29 + $0x5d8] sm:$0xff] %v551_v59  ;;  %v555_v61 = vld [vmem:[%s4564_s28 + $0xb98] sm:$0xff]  ;;  %v557_v62 = vld [vmem:[%s4564_s28 + $0xba0] sm:$0xff] }
  0x73   : > { %554 = vst [vmem:[%s4569_s29 + $0x5e0] sm:$0xff] %v553_v60  ;;  %v559_v63 = vld [vmem:[%s4564_s28 + $0xba8] sm:$0xff]  ;;  %556 = vst [vmem:[%s4569_s29 + $0x5e8] sm:$0xff] %v555_v61  ;;  %v561_v0 = vld [vmem:[%s4564_s28 + $0xbb0] sm:$0xff] }
  0x74   : > { %558 = vst [vmem:[%s4569_s29 + $0x5f0] sm:$0xff] %v557_v62  ;;  %560 = vst [vmem:[%s4569_s29 + $0x5f8] sm:$0xff] %v559_v63  ;;  %v563_v1 = vld [vmem:[%s4564_s28 + $0xbb8] sm:$0xff]  ;;  %v565_v2 = vld [vmem:[%s4564_s28 + $0xbc0] sm:$0xff] }
  0x75   : > { %562 = vst [vmem:[%s4569_s29 + $0x600] sm:$0xff] %v561_v0  ;;  %564 = vst [vmem:[%s4569_s29 + $0x608] sm:$0xff] %v563_v1  ;;  %v567_v3 = vld [vmem:[%s4564_s28 + $0xbc8] sm:$0xff]  ;;  %v569_v4 = vld [vmem:[%s4564_s28 + $0xc40] sm:$0xff] }
  0x76   : > { %566 = vst [vmem:[%s4569_s29 + $0x610] sm:$0xff] %v565_v2  ;;  %v571_v5 = vld [vmem:[%s4564_s28 + $0xc48] sm:$0xff]  ;;  %568 = vst [vmem:[%s4569_s29 + $0x618] sm:$0xff] %v567_v3  ;;  %v573_v6 = vld [vmem:[%s4564_s28 + $0xc50] sm:$0xff] }
  0x77   : > { %570 = vst [vmem:[%s4569_s29 + $0x620] sm:$0xff] %v569_v4  ;;  %572 = vst [vmem:[%s4569_s29 + $0x628] sm:$0xff] %v571_v5  ;;  %v575_v7 = vld [vmem:[%s4564_s28 + $0xc58] sm:$0xff]  ;;  %v577_v8 = vld [vmem:[%s4564_s28 + $0xc60] sm:$0xff] }
  0x78   : > { %574 = vst [vmem:[%s4569_s29 + $0x630] sm:$0xff] %v573_v6  ;;  %576 = vst [vmem:[%s4569_s29 + $0x638] sm:$0xff] %v575_v7  ;;  %v579_v9 = vld [vmem:[%s4564_s28 + $0xc68] sm:$0xff]  ;;  %v581_v10 = vld [vmem:[%s4564_s28 + $0xc70] sm:$0xff] }
  0x79   : > { %578 = vst [vmem:[%s4569_s29 + $0x640] sm:$0xff] %v577_v8  ;;  %v583_v11 = vld [vmem:[%s4564_s28 + $0xc78] sm:$0xff]  ;;  %580 = vst [vmem:[%s4569_s29 + $0x648] sm:$0xff] %v579_v9  ;;  %v585_v12 = vld [vmem:[%s4564_s28 + $0xc80] sm:$0xff] }
  0x7a   : > { %582 = vst [vmem:[%s4569_s29 + $0x650] sm:$0xff] %v581_v10  ;;  %584 = vst [vmem:[%s4569_s29 + $0x658] sm:$0xff] %v583_v11  ;;  %v587_v13 = vld [vmem:[%s4564_s28 + $0xc88] sm:$0xff]  ;;  %v589_v14 = vld [vmem:[%s4564_s28 + $0xc90] sm:$0xff] }
  0x7b   : > { %586 = vst [vmem:[%s4569_s29 + $0x660] sm:$0xff] %v585_v12  ;;  %588 = vst [vmem:[%s4569_s29 + $0x668] sm:$0xff] %v587_v13  ;;  %v591_v15 = vld [vmem:[%s4564_s28 + $0xc98] sm:$0xff]  ;;  %v593_v16 = vld [vmem:[%s4564_s28 + $0xca0] sm:$0xff] }
  0x7c   : > { %590 = vst [vmem:[%s4569_s29 + $0x670] sm:$0xff] %v589_v14  ;;  %v595_v17 = vld [vmem:[%s4564_s28 + $0xca8] sm:$0xff]  ;;  %592 = vst [vmem:[%s4569_s29 + $0x678] sm:$0xff] %v591_v15  ;;  %v597_v18 = vld [vmem:[%s4564_s28 + $0xd20] sm:$0xff] }
  0x7d   : > { %594 = vst [vmem:[%s4569_s29 + $0x680] sm:$0xff] %v593_v16  ;;  %596 = vst [vmem:[%s4569_s29 + $0x688] sm:$0xff] %v595_v17  ;;  %v599_v19 = vld [vmem:[%s4564_s28 + $0xd28] sm:$0xff]  ;;  %v601_v20 = vld [vmem:[%s4564_s28 + $0xd30] sm:$0xff] }
  0x7e   : > { %598 = vst [vmem:[%s4569_s29 + $0x690] sm:$0xff] %v597_v18  ;;  %600 = vst [vmem:[%s4569_s29 + $0x698] sm:$0xff] %v599_v19  ;;  %v603_v21 = vld [vmem:[%s4564_s28 + $0xd38] sm:$0xff]  ;;  %v605_v22 = vld [vmem:[%s4564_s28 + $0xd40] sm:$0xff] }
  0x7f   : > { %602 = vst [vmem:[%s4569_s29 + $0x6a0] sm:$0xff] %v601_v20  ;;  %v607_v23 = vld [vmem:[%s4564_s28 + $0xd48] sm:$0xff]  ;;  %604 = vst [vmem:[%s4569_s29 + $0x6a8] sm:$0xff] %v603_v21  ;;  %v609_v24 = vld [vmem:[%s4564_s28 + $0xd50] sm:$0xff] }
  0x80   : > { %606 = vst [vmem:[%s4569_s29 + $0x6b0] sm:$0xff] %v605_v22  ;;  %608 = vst [vmem:[%s4569_s29 + $0x6b8] sm:$0xff] %v607_v23  ;;  %v611_v25 = vld [vmem:[%s4564_s28 + $0xd58] sm:$0xff]  ;;  %v613_v26 = vld [vmem:[%s4564_s28 + $0xd60] sm:$0xff] }
  0x81   : > { %610 = vst [vmem:[%s4569_s29 + $0x6c0] sm:$0xff] %v609_v24  ;;  %612 = vst [vmem:[%s4569_s29 + $0x6c8] sm:$0xff] %v611_v25  ;;  %v615_v27 = vld [vmem:[%s4564_s28 + $0xd68] sm:$0xff]  ;;  %v617_v28 = vld [vmem:[%s4564_s28 + $0xd70] sm:$0xff] }
  0x82   : > { %614 = vst [vmem:[%s4569_s29 + $0x6d0] sm:$0xff] %v613_v26  ;;  %v619_v29 = vld [vmem:[%s4564_s28 + $0xd78] sm:$0xff]  ;;  %616 = vst [vmem:[%s4569_s29 + $0x6d8] sm:$0xff] %v615_v27  ;;  %v621_v30 = vld [vmem:[%s4564_s28 + $0xd80] sm:$0xff] }
  0x83   : > { %618 = vst [vmem:[%s4569_s29 + $0x6e0] sm:$0xff] %v617_v28  ;;  %620 = vst [vmem:[%s4569_s29 + $0x6e8] sm:$0xff] %v619_v29  ;;  %v623_v31 = vld [vmem:[%s4564_s28 + $0xd88] sm:$0xff] }
  0x84   : > { %622 = vst [vmem:[%s4569_s29 + $0x6f0] sm:$0xff] %v621_v30  ;;  %624 = vst [vmem:[%s4569_s29 + $0x6f8] sm:$0xff] %v623_v31 }
  0x85 PF: > { %p3506_p8 = scmp.ge.s32.totalorder %s4493_s16, 1  ;;  %p637_p9 = scmp.lt.s32.totalorder %s4493_s16, 3 }
  0x87   : > { %p638_p10 = pnand %p3506_p8, %p637_p9 }
  0x88   : > { %s644_s30 = sand.u32 (!%p638_p10), 1, %s4477_s12   ;;  %s682_s10 = smul.u32 (!%p638_p10), 28, %s4485_s14 }
  0x89   : > { %641 = sbr.rel (%p638_p10) target bundleno = 613 (0x265), region = 51 }
  0x8a   : > { %s3850_s4 = smul.u32 (!%p638_p10), 1792, %s644_s30  ;;  %p683_p11 = scmp.lt.s32.totalorder (!%p638_p10), %s682_s10, 55 }
  0x8b   : > { %s3851_s20 = smul.u32 (!%p638_p10), 224, %s644_s30 }
  0x8c   : > { %s5023_s5 = scalar_lea.vmem (!%p638_p10), [#allocation2], %s3850_s4 }
  0x8d   : > { %s5338_s12 = scalar_lea.vmem (!%p638_p10), [#allocation3], %s3851_s20 }
  0x8e   : > { %v4495_v32 = vmov 0   ;;  %v3893_v33 = vld [vmem:[%s5023_s5 + $0x624] ss:$112 sps:$4 sm:$0xff]   ;;  %v3895_v34 = vld [vmem:[%s5023_s5 + $0x62c] ss:$112 sps:$4 sm:$0xff]   ;;  %s5502_s10 = smov (!%p683_p11, %s682_s10), 55 }
  0x8f   : > { %2222 = vmatprep.mubr.bf16.mxu0 %v4495_v32  ;;  %2265 = vmatprep.mubr.bf16.mxu1 %v4495_v32  ;;  %v3897_v35 = vld [vmem:[%s5023_s5 + $0x620] ss:$112 sps:$4 sm:$0xff]   ;;  %v3898_v36 = vld [vmem:[%s5023_s5 + $0x628] ss:$112 sps:$4 sm:$0xff]   ;;  %v3899_v37 = vld [vmem:[%s5023_s5 + $0x544] ss:$112 sps:$4 sm:$0xff]   ;;  %s5287_s19 = scalar_lea.vmem %s5492_s2, %s5502_s10 }
  0x90   : > { %2190 = vmatprep.subr.bf16.mxu0 %v3893_v33  ;;  %2233 = vmatprep.subr.bf16.mxu1 %v3895_v34  ;;  %v3901_v38 = vld [vmem:[%s5023_s5 + $0x54c] ss:$112 sps:$4 sm:$0xff]   ;;  %v3903_v39 = vld [vmem:[%s5023_s5 + $0x540] ss:$112 sps:$4 sm:$0xff]   ;;  %v3904_v40 = vld [vmem:[%s5023_s5 + $0x548] ss:$112 sps:$4 sm:$0xff]  }
  0x91   : > { %2191 = vmatpush1.bf16.msra.mxu0 %v3897_v35  ;;  %2234 = vmatpush1.bf16.msra.mxu1 %v3898_v36  ;;  %v3905_v41 = vld [vmem:[%s5023_s5 + $0x464] ss:$112 sps:$4 sm:$0xff]   ;;  %v3907_v42 = vld [vmem:[%s5023_s5 + $0x46c] ss:$112 sps:$4 sm:$0xff]   ;;  %v3909_v43 = vld [vmem:[%s5023_s5 + $0x460] ss:$112 sps:$4 sm:$0xff]  }
  0x92   : > { %2192 = vmatprep.subr.bf16.mxu0 %v3899_v37  ;;  %2235 = vmatprep.subr.bf16.mxu1 %v3901_v38  ;;  %v3910_v44 = vld [vmem:[%s5023_s5 + $0x468] ss:$112 sps:$4 sm:$0xff]   ;;  %v3911_v45 = vld [vmem:[%s5023_s5 + $0x384] ss:$112 sps:$4 sm:$0xff]   ;;  %v3913_v46 = vld [vmem:[%s5023_s5 + $0x38c] ss:$112 sps:$4 sm:$0xff]  }
  0x93   : > { %v3915_v47 = vld [vmem:[%s5023_s5 + $0x380] ss:$112 sps:$4 sm:$0xff]   ;;  %v3916_v48 = vld [vmem:[%s5023_s5 + $0x388] ss:$112 sps:$4 sm:$0xff]   ;;  %v3917_v49 = vld [vmem:[%s5023_s5 + $0x2a4] ss:$112 sps:$4 sm:$0xff]  }
  0x94   : > { %v3919_v50 = vld [vmem:[%s5023_s5 + $0x2ac] ss:$112 sps:$4 sm:$0xff]   ;;  %v3921_v51 = vld [vmem:[%s5023_s5 + $0x2a0] ss:$112 sps:$4 sm:$0xff]   ;;  %v3922_v52 = vld [vmem:[%s5023_s5 + $0x2a8] ss:$112 sps:$4 sm:$0xff]  }
  0x95   : > { %2193 = vmatpush1.bf16.msra.mxu0 %v3903_v39  ;;  %2236 = vmatpush1.bf16.msra.mxu1 %v3904_v40  ;;  %v3923_v53 = vld [vmem:[%s5023_s5 + $0x1c4] ss:$112 sps:$4 sm:$0xff]   ;;  %v3925_v54 = vld [vmem:[%s5023_s5 + $0x1cc] ss:$112 sps:$4 sm:$0xff]   ;;  %v3927_v55 = vld [vmem:[%s5023_s5 + $0x1c0] ss:$112 sps:$4 sm:$0xff]  }
  0x96   : > { %2194 = vmatprep.subr.bf16.mxu0 %v3905_v41  ;;  %2237 = vmatprep.subr.bf16.mxu1 %v3907_v42  ;;  %v3928_v56 = vld [vmem:[%s5023_s5 + $0x1c8] ss:$112 sps:$4 sm:$0xff]   ;;  %v3929_v57 = vld [vmem:[%s5023_s5 + $0xe4] ss:$112 sps:$4 sm:$0xff]   ;;  %v3931_v58 = vld [vmem:[%s5023_s5 + $0xec] ss:$112 sps:$4 sm:$0xff]  }
  0x97   : > { %v3933_v59 = vld [vmem:[%s5023_s5 + $0xe0] ss:$112 sps:$4 sm:$0xff]   ;;  %v3934_v60 = vld [vmem:[%s5023_s5 + $0xe8] ss:$112 sps:$4 sm:$0xff]   ;;  %v3935_v61 = vld [vmem:[%s5023_s5 + $0x4] ss:$112 sps:$4 sm:$0xff]  }
  0x98   : > { %v3937_v62 = vld [vmem:[%s5023_s5 + $0xc] ss:$112 sps:$4 sm:$0xff]   ;;  %v3939_v63 = vld [vmem:[%s5023_s5] ss:$112 sps:$4 sm:$0xff]   ;;  %v3940_v0 = vld [vmem:[%s5023_s5 + $0x8] ss:$112 sps:$4 sm:$0xff]  }
  0x99   : > { %2195 = vmatpush1.bf16.msra.mxu0 %v3909_v43  ;;  %2238 = vmatpush1.bf16.msra.mxu1 %v3910_v44  ;;  %v3944_v1 = vld [vmem:[%s5023_s5 + $0x634] ss:$112 sps:$4 sm:$0xff]   ;;  %v3947_v2 = vld [vmem:[%s5023_s5 + $0x63c] ss:$112 sps:$4 sm:$0xff]   ;;  %v3942_v4 = vld [vmem:[%s5023_s5 + $0x630] ss:$112 sps:$4 sm:$0xff]  }
  0x9a   : > { %2196 = vmatprep.subr.bf16.mxu0 %v3911_v45  ;;  %2239 = vmatprep.subr.bf16.mxu1 %v3913_v46  ;;  %v5062_v3 = vld [vmem:[%s5490_s0] sm:$0xff]   ;;  %v3945_v5 = vld [vmem:[%s5023_s5 + $0x638] ss:$112 sps:$4 sm:$0xff]   ;;  %v3953_v7 = vld [vmem:[%s5023_s5 + $0x55c] ss:$112 sps:$4 sm:$0xff]   ;;  %s3848_s23 = smul.u32 (%p4551_p6), 112, %s4485_s14 }
  0x9b   : > { %v3950_v6 = vld [vmem:[%s5023_s5 + $0x554] ss:$112 sps:$4 sm:$0xff]   ;;  %v3948_v8 = vld [vmem:[%s5023_s5 + $0x550] ss:$112 sps:$4 sm:$0xff]   ;;  %v3951_v9 = vld [vmem:[%s5023_s5 + $0x558] ss:$112 sps:$4 sm:$0xff]  }
  0x9c   : > { %v3956_v10 = vld [vmem:[%s5023_s5 + $0x474] ss:$112 sps:$4 sm:$0xff]   ;;  %v3959_v11 = vld [vmem:[%s5023_s5 + $0x47c] ss:$112 sps:$4 sm:$0xff]   ;;  %v3954_v12 = vld [vmem:[%s5023_s5 + $0x470] ss:$112 sps:$4 sm:$0xff]   ;;  %s5423_s25 = scalar_lea.vmem (%p4551_p6), %s5493_s3, %s3848_s23 }
  0x9d   : > { %2197 = vmatpush1.bf16.msra.mxu0 %v3915_v47  ;;  %2240 = vmatpush1.bf16.msra.mxu1 %v3916_v48  ;;  %v3957_v13 = vld [vmem:[%s5023_s5 + $0x478] ss:$112 sps:$4 sm:$0xff]   ;;  %v3962_v14 = vld [vmem:[%s5023_s5 + $0x394] ss:$112 sps:$4 sm:$0xff]   ;;  %v3965_v15 = vld [vmem:[%s5023_s5 + $0x39c] ss:$112 sps:$4 sm:$0xff]  }
  0x9e   : > { %2198 = vmatprep.subr.bf16.mxu0 %v3917_v49  ;;  %2241 = vmatprep.subr.bf16.mxu1 %v3919_v50  ;;  %v3960_v16 = vld [vmem:[%s5023_s5 + $0x390] ss:$112 sps:$4 sm:$0xff]   ;;  %v3963_v17 = vld [vmem:[%s5023_s5 + $0x398] ss:$112 sps:$4 sm:$0xff]   ;;  %v3968_v18 = vld [vmem:[%s5023_s5 + $0x2b4] ss:$112 sps:$4 sm:$0xff]  }
  0x9f   : > { %v3971_v19 = vld [vmem:[%s5023_s5 + $0x2bc] ss:$112 sps:$4 sm:$0xff]   ;;  %v3966_v20 = vld [vmem:[%s5023_s5 + $0x2b0] ss:$112 sps:$4 sm:$0xff]   ;;  %v3969_v21 = vld [vmem:[%s5023_s5 + $0x2b8] ss:$112 sps:$4 sm:$0xff]  }
  0xa0   : > { %v3974_v22 = vld [vmem:[%s5023_s5 + $0x1d4] ss:$112 sps:$4 sm:$0xff]   ;;  %v3977_v23 = vld [vmem:[%s5023_s5 + $0x1dc] ss:$112 sps:$4 sm:$0xff]   ;;  %v3972_v24 = vld [vmem:[%s5023_s5 + $0x1d0] ss:$112 sps:$4 sm:$0xff]  }
  0xa1   : > { %2199 = vmatpush1.bf16.msra.mxu0 %v3921_v51  ;;  %2242 = vmatpush1.bf16.msra.mxu1 %v3922_v52  ;;  %v3975_v25 = vld [vmem:[%s5023_s5 + $0x1d8] ss:$112 sps:$4 sm:$0xff]   ;;  %v3980_v26 = vld [vmem:[%s5023_s5 + $0xf4] ss:$112 sps:$4 sm:$0xff]   ;;  %v3983_v27 = vld [vmem:[%s5023_s5 + $0xfc] ss:$112 sps:$4 sm:$0xff]  }
  0xa2   : > { %2200 = vmatprep.subr.bf16.mxu0 %v3923_v53  ;;  %2243 = vmatprep.subr.bf16.mxu1 %v3925_v54  ;;  %v3978_v28 = vld [vmem:[%s5023_s5 + $0xf0] ss:$112 sps:$4 sm:$0xff]   ;;  %v3981_v29 = vld [vmem:[%s5023_s5 + $0xf8] ss:$112 sps:$4 sm:$0xff]   ;;  %v3986_v30 = vld [vmem:[%s5023_s5 + $0x14] ss:$112 sps:$4 sm:$0xff]  }
  0xa3   : > { %v3989_v31 = vld [vmem:[%s5023_s5 + $0x1c] ss:$112 sps:$4 sm:$0xff]   ;;  %v3984_v33 = vld [vmem:[%s5023_s5 + $0x10] ss:$112 sps:$4 sm:$0xff]   ;;  %v3987_v34 = vld [vmem:[%s5023_s5 + $0x18] ss:$112 sps:$4 sm:$0xff]  }
  0xa4   : > { %v3992_v35 = vld [vmem:[%s5023_s5 + $0x644] ss:$112 sps:$4 sm:$0xff]   ;;  %v3995_v36 = vld [vmem:[%s5023_s5 + $0x64c] ss:$112 sps:$4 sm:$0xff]   ;;  %v3990_v37 = vld [vmem:[%s5023_s5 + $0x640] ss:$112 sps:$4 sm:$0xff]  }
  0xa5   : > { %2201 = vmatpush1.bf16.msra.mxu0 %v3927_v55  ;;  %2244 = vmatpush1.bf16.msra.mxu1 %v3928_v56  ;;  %v3993_v38 = vld [vmem:[%s5023_s5 + $0x648] ss:$112 sps:$4 sm:$0xff]   ;;  %v3998_v39 = vld [vmem:[%s5023_s5 + $0x564] ss:$112 sps:$4 sm:$0xff]   ;;  %v4001_v40 = vld [vmem:[%s5023_s5 + $0x56c] ss:$112 sps:$4 sm:$0xff]  }
  0xa6   : > { %2202 = vmatprep.subr.bf16.mxu0 %v3929_v57  ;;  %2245 = vmatprep.subr.bf16.mxu1 %v3931_v58  ;;  %v3996_v41 = vld [vmem:[%s5023_s5 + $0x560] ss:$112 sps:$4 sm:$0xff]   ;;  %v3999_v42 = vld [vmem:[%s5023_s5 + $0x568] ss:$112 sps:$4 sm:$0xff]   ;;  %v4004_v43 = vld [vmem:[%s5023_s5 + $0x484] ss:$112 sps:$4 sm:$0xff]  }
  0xa7   : > { %v4007_v44 = vld [vmem:[%s5023_s5 + $0x48c] ss:$112 sps:$4 sm:$0xff]   ;;  %v4002_v45 = vld [vmem:[%s5023_s5 + $0x480] ss:$112 sps:$4 sm:$0xff]   ;;  %v4005_v46 = vld [vmem:[%s5023_s5 + $0x488] ss:$112 sps:$4 sm:$0xff]  }
  0xa8   : > { %v4010_v47 = vld [vmem:[%s5023_s5 + $0x3a4] ss:$112 sps:$4 sm:$0xff]   ;;  %v4013_v48 = vld [vmem:[%s5023_s5 + $0x3ac] ss:$112 sps:$4 sm:$0xff]   ;;  %v4008_v49 = vld [vmem:[%s5023_s5 + $0x3a0] ss:$112 sps:$4 sm:$0xff]  }
  0xa9   : > { %2203 = vmatpush1.bf16.msra.mxu0 %v3933_v59  ;;  %2246 = vmatpush1.bf16.msra.mxu1 %v3934_v60  ;;  %v4011_v50 = vld [vmem:[%s5023_s5 + $0x3a8] ss:$112 sps:$4 sm:$0xff]   ;;  %v4016_v51 = vld [vmem:[%s5023_s5 + $0x2c4] ss:$112 sps:$4 sm:$0xff]   ;;  %v4019_v52 = vld [vmem:[%s5023_s5 + $0x2cc] ss:$112 sps:$4 sm:$0xff]  }
  0xaa   : > { %2204 = vmatprep.subr.bf16.mxu0 %v3935_v61  ;;  %2247 = vmatprep.subr.bf16.mxu1 %v3937_v62  ;;  %v4014_v53 = vld [vmem:[%s5023_s5 + $0x2c0] ss:$112 sps:$4 sm:$0xff]   ;;  %v4017_v54 = vld [vmem:[%s5023_s5 + $0x2c8] ss:$112 sps:$4 sm:$0xff]   ;;  %v4022_v55 = vld [vmem:[%s5023_s5 + $0x1e4] ss:$112 sps:$4 sm:$0xff]  }
  0xab   : > { %v4025_v56 = vld [vmem:[%s5023_s5 + $0x1ec] ss:$112 sps:$4 sm:$0xff]   ;;  %v4020_v57 = vld [vmem:[%s5023_s5 + $0x1e0] ss:$112 sps:$4 sm:$0xff]   ;;  %v4023_v58 = vld [vmem:[%s5023_s5 + $0x1e8] ss:$112 sps:$4 sm:$0xff]  }
  0xac   : > { %v4028_v59 = vld [vmem:[%s5023_s5 + $0x104] ss:$112 sps:$4 sm:$0xff]   ;;  %v4031_v60 = vld [vmem:[%s5023_s5 + $0x10c] ss:$112 sps:$4 sm:$0xff]   ;;  %v4026_v61 = vld [vmem:[%s5023_s5 + $0x100] ss:$112 sps:$4 sm:$0xff]  }
  0xad   : > { %2205 = vmatpush1.bf16.msra.mxu0 %v3939_v63  ;;  %2248 = vmatpush1.bf16.msra.mxu1 %v3940_v0  ;;  %v4029_v62 = vld [vmem:[%s5023_s5 + $0x108] ss:$112 sps:$4 sm:$0xff]   ;;  %v4034_v63 = vld [vmem:[%s5023_s5 + $0x24] ss:$112 sps:$4 sm:$0xff]   ;;  %v4037_v0 = vld [vmem:[%s5023_s5 + $0x2c] ss:$112 sps:$4 sm:$0xff]  }
  0xae   : > { %2276 = vmatprep.subr.bf16.mxu0 %v3944_v1  ;;  %2319 = vmatprep.subr.bf16.mxu1 %v3947_v2  ;;  %v4032_v1 = vld [vmem:[%s5023_s5 + $0x20] ss:$112 sps:$4 sm:$0xff]   ;;  %v4035_v2 = vld [vmem:[%s5023_s5 + $0x28] ss:$112 sps:$4 sm:$0xff]  }
  0xb0   : > { %2223 = vmatmul.mubr.bf16.vlgmr.msra.gmra.mxu0 %v5062_v3  ;;  %2266 = vmatmul.mubr.bf16.vlgmr.msra.gmra.mxu1 %v5062_v3 }
  0xb1   : > { %2277 = vmatpush1.bf16.msra.mxu0 %v3942_v4  ;;  %2320 = vmatpush1.bf16.msra.mxu1 %v3945_v5  ;;  %v4040_v4 = vld [vmem:[%s5023_s5 + $0x654] ss:$112 sps:$4 sm:$0xff]   ;;  %v4043_v5 = vld [vmem:[%s5023_s5 + $0x65c] ss:$112 sps:$4 sm:$0xff]  }
  0xb2   : > { %2278 = vmatprep.subr.bf16.mxu0 %v3950_v6  ;;  %2321 = vmatprep.subr.bf16.mxu1 %v3953_v7  ;;  %v4038_v6 = vld [vmem:[%s5023_s5 + $0x650] ss:$112 sps:$4 sm:$0xff]   ;;  %v4041_v7 = vld [vmem:[%s5023_s5 + $0x658] ss:$112 sps:$4 sm:$0xff]  }
  0xb3   : > { %2308 = vmatprep.mubr.bf16.mxu0 %v4495_v32  ;;  %2351 = vmatprep.mubr.bf16.mxu1 %v4495_v32 }
  0xb5   : > { %2279 = vmatpush1.bf16.msra.mxu0 %v3948_v8  ;;  %2322 = vmatpush1.bf16.msra.mxu1 %v3951_v9  ;;  %v4046_v8 = vld [vmem:[%s5023_s5 + $0x574] ss:$112 sps:$4 sm:$0xff]   ;;  %v4049_v9 = vld [vmem:[%s5023_s5 + $0x57c] ss:$112 sps:$4 sm:$0xff]  }
  0xb6   : > { %2280 = vmatprep.subr.bf16.mxu0 %v3956_v10  ;;  %2323 = vmatprep.subr.bf16.mxu1 %v3959_v11  ;;  %v4044_v10 = vld [vmem:[%s5023_s5 + $0x570] ss:$112 sps:$4 sm:$0xff]   ;;  %v4047_v11 = vld [vmem:[%s5023_s5 + $0x578] ss:$112 sps:$4 sm:$0xff]  }
  0xb9   : > { %2281 = vmatpush1.bf16.msra.mxu0 %v3954_v12  ;;  %2324 = vmatpush1.bf16.msra.mxu1 %v3957_v13  ;;  %v4052_v12 = vld [vmem:[%s5023_s5 + $0x494] ss:$112 sps:$4 sm:$0xff]   ;;  %v4055_v13 = vld [vmem:[%s5023_s5 + $0x49c] ss:$112 sps:$4 sm:$0xff]  }
  0xba   : > { %2282 = vmatprep.subr.bf16.mxu0 %v3962_v14  ;;  %2325 = vmatprep.subr.bf16.mxu1 %v3965_v15  ;;  %v4050_v14 = vld [vmem:[%s5023_s5 + $0x490] ss:$112 sps:$4 sm:$0xff]   ;;  %v4053_v15 = vld [vmem:[%s5023_s5 + $0x498] ss:$112 sps:$4 sm:$0xff]  }
  0xbd   : > { %2283 = vmatpush1.bf16.msra.mxu0 %v3960_v16  ;;  %2326 = vmatpush1.bf16.msra.mxu1 %v3963_v17  ;;  %v4058_v16 = vld [vmem:[%s5023_s5 + $0x3b4] ss:$112 sps:$4 sm:$0xff]   ;;  %v4061_v17 = vld [vmem:[%s5023_s5 + $0x3bc] ss:$112 sps:$4 sm:$0xff]  }
  0xbe   : > { %2284 = vmatprep.subr.bf16.mxu0 %v3968_v18  ;;  %2327 = vmatprep.subr.bf16.mxu1 %v3971_v19  ;;  %v4056_v18 = vld [vmem:[%s5023_s5 + $0x3b0] ss:$112 sps:$4 sm:$0xff]   ;;  %v4059_v19 = vld [vmem:[%s5023_s5 + $0x3b8] ss:$112 sps:$4 sm:$0xff]  }
  0xc1   : > { %2285 = vmatpush1.bf16.msra.mxu0 %v3966_v20  ;;  %2328 = vmatpush1.bf16.msra.mxu1 %v3969_v21  ;;  %v4064_v20 = vld [vmem:[%s5023_s5 + $0x2d4] ss:$112 sps:$4 sm:$0xff]   ;;  %v4067_v21 = vld [vmem:[%s5023_s5 + $0x2dc] ss:$112 sps:$4 sm:$0xff]  }
  0xc2   : > { %2286 = vmatprep.subr.bf16.mxu0 %v3974_v22  ;;  %2329 = vmatprep.subr.bf16.mxu1 %v3977_v23  ;;  %v4062_v22 = vld [vmem:[%s5023_s5 + $0x2d0] ss:$112 sps:$4 sm:$0xff]   ;;  %v4065_v23 = vld [vmem:[%s5023_s5 + $0x2d8] ss:$112 sps:$4 sm:$0xff]  }
  0xc5   : > { %2287 = vmatpush1.bf16.msra.mxu0 %v3972_v24  ;;  %2330 = vmatpush1.bf16.msra.mxu1 %v3975_v25  ;;  %v4070_v24 = vld [vmem:[%s5023_s5 + $0x1f4] ss:$112 sps:$4 sm:$0xff]   ;;  %v4073_v25 = vld [vmem:[%s5023_s5 + $0x1fc] ss:$112 sps:$4 sm:$0xff]  }
  0xc6   : > { %2288 = vmatprep.subr.bf16.mxu0 %v3980_v26  ;;  %2331 = vmatprep.subr.bf16.mxu1 %v3983_v27  ;;  %v4068_v26 = vld [vmem:[%s5023_s5 + $0x1f0] ss:$112 sps:$4 sm:$0xff]   ;;  %v4071_v27 = vld [vmem:[%s5023_s5 + $0x1f8] ss:$112 sps:$4 sm:$0xff]  }
  0xc9   : > { %2289 = vmatpush1.bf16.msra.mxu0 %v3978_v28  ;;  %2332 = vmatpush1.bf16.msra.mxu1 %v3981_v29  ;;  %v4076_v28 = vld [vmem:[%s5023_s5 + $0x114] ss:$112 sps:$4 sm:$0xff]   ;;  %v4079_v29 = vld [vmem:[%s5023_s5 + $0x11c] ss:$112 sps:$4 sm:$0xff]  }
  0xca   : > { %2290 = vmatprep.subr.bf16.mxu0 %v3986_v30  ;;  %2333 = vmatprep.subr.bf16.mxu1 %v3989_v31  ;;  %v4074_v30 = vld [vmem:[%s5023_s5 + $0x110] ss:$112 sps:$4 sm:$0xff]   ;;  %v4077_v31 = vld [vmem:[%s5023_s5 + $0x118] ss:$112 sps:$4 sm:$0xff]  }
  0xcd   : > { %2291 = vmatpush1.bf16.msra.mxu0 %v3984_v33  ;;  %2334 = vmatpush1.bf16.msra.mxu1 %v3987_v34  ;;  %v4082_v33 = vld [vmem:[%s5023_s5 + $0x34] ss:$112 sps:$4 sm:$0xff]   ;;  %v4085_v34 = vld [vmem:[%s5023_s5 + $0x3c] ss:$112 sps:$4 sm:$0xff]  }
  0xce   : > { %2362 = vmatprep.subr.bf16.mxu0 %v3992_v35  ;;  %2405 = vmatprep.subr.bf16.mxu1 %v3995_v36  ;;  %v4080_v35 = vld [vmem:[%s5023_s5 + $0x30] ss:$112 sps:$4 sm:$0xff]   ;;  %v4083_v36 = vld [vmem:[%s5023_s5 + $0x38] ss:$112 sps:$4 sm:$0xff]  }
  0xd0   : > { %2309 = vmatmul.mubr.bf16.vlgmr.msra.gmra.mxu0 %v5062_v3  ;;  %2352 = vmatmul.mubr.bf16.vlgmr.msra.gmra.mxu1 %v5062_v3 }
  0xd1   : > { %2363 = vmatpush1.bf16.msra.mxu0 %v3990_v37  ;;  %2406 = vmatpush1.bf16.msra.mxu1 %v3993_v38  ;;  %v4088_v37 = vld [vmem:[%s5023_s5 + $0x664] ss:$112 sps:$4 sm:$0xff]   ;;  %v4091_v38 = vld [vmem:[%s5023_s5 + $0x66c] ss:$112 sps:$4 sm:$0xff]  }
  0xd2   : > { %2364 = vmatprep.subr.bf16.mxu0 %v3998_v39  ;;  %2407 = vmatprep.subr.bf16.mxu1 %v4001_v40  ;;  %v4086_v39 = vld [vmem:[%s5023_s5 + $0x660] ss:$112 sps:$4 sm:$0xff]   ;;  %v4089_v40 = vld [vmem:[%s5023_s5 + $0x668] ss:$112 sps:$4 sm:$0xff]  }
  0xd3   : > { %2394 = vmatprep.mubr.bf16.mxu0 %v4495_v32  ;;  %2437 = vmatprep.mubr.bf16.mxu1 %v4495_v32 }
  0xd5   : > { %2365 = vmatpush1.bf16.msra.mxu0 %v3996_v41  ;;  %2408 = vmatpush1.bf16.msra.mxu1 %v3999_v42  ;;  %v4094_v41 = vld [vmem:[%s5023_s5 + $0x584] ss:$112 sps:$4 sm:$0xff]   ;;  %v4097_v42 = vld [vmem:[%s5023_s5 + $0x58c] ss:$112 sps:$4 sm:$0xff]  }
  0xd6   : > { %2366 = vmatprep.subr.bf16.mxu0 %v4004_v43  ;;  %2409 = vmatprep.subr.bf16.mxu1 %v4007_v44  ;;  %v4092_v43 = vld [vmem:[%s5023_s5 + $0x580] ss:$112 sps:$4 sm:$0xff]   ;;  %v4095_v44 = vld [vmem:[%s5023_s5 + $0x588] ss:$112 sps:$4 sm:$0xff]  }
  0xd9   : > { %2367 = vmatpush1.bf16.msra.mxu0 %v4002_v45  ;;  %2410 = vmatpush1.bf16.msra.mxu1 %v4005_v46  ;;  %v4100_v45 = vld [vmem:[%s5023_s5 + $0x4a4] ss:$112 sps:$4 sm:$0xff]   ;;  %v4103_v46 = vld [vmem:[%s5023_s5 + $0x4ac] ss:$112 sps:$4 sm:$0xff]  }
  0xda   : > { %2368 = vmatprep.subr.bf16.mxu0 %v4010_v47  ;;  %2411 = vmatprep.subr.bf16.mxu1 %v4013_v48  ;;  %v4098_v47 = vld [vmem:[%s5023_s5 + $0x4a0] ss:$112 sps:$4 sm:$0xff]   ;;  %v4101_v48 = vld [vmem:[%s5023_s5 + $0x4a8] ss:$112 sps:$4 sm:$0xff]  }
  0xdd   : > { %2369 = vmatpush1.bf16.msra.mxu0 %v4008_v49  ;;  %2412 = vmatpush1.bf16.msra.mxu1 %v4011_v50  ;;  %v4106_v49 = vld [vmem:[%s5023_s5 + $0x3c4] ss:$112 sps:$4 sm:$0xff]   ;;  %v4109_v50 = vld [vmem:[%s5023_s5 + $0x3cc] ss:$112 sps:$4 sm:$0xff]  }
  0xde   : > { %2370 = vmatprep.subr.bf16.mxu0 %v4016_v51  ;;  %2413 = vmatprep.subr.bf16.mxu1 %v4019_v52  ;;  %v4104_v51 = vld [vmem:[%s5023_s5 + $0x3c0] ss:$112 sps:$4 sm:$0xff]   ;;  %v4107_v52 = vld [vmem:[%s5023_s5 + $0x3c8] ss:$112 sps:$4 sm:$0xff]  }
  0xe1   : > { %2371 = vmatpush1.bf16.msra.mxu0 %v4014_v53  ;;  %2414 = vmatpush1.bf16.msra.mxu1 %v4017_v54  ;;  %v4112_v53 = vld [vmem:[%s5023_s5 + $0x2e4] ss:$112 sps:$4 sm:$0xff]   ;;  %v4115_v54 = vld [vmem:[%s5023_s5 + $0x2ec] ss:$112 sps:$4 sm:$0xff]  }
  0xe2   : > { %2372 = vmatprep.subr.bf16.mxu0 %v4022_v55  ;;  %2415 = vmatprep.subr.bf16.mxu1 %v4025_v56  ;;  %v4110_v55 = vld [vmem:[%s5023_s5 + $0x2e0] ss:$112 sps:$4 sm:$0xff]   ;;  %v4113_v56 = vld [vmem:[%s5023_s5 + $0x2e8] ss:$112 sps:$4 sm:$0xff]  }
  0xe5   : > { %2373 = vmatpush1.bf16.msra.mxu0 %v4020_v57  ;;  %2416 = vmatpush1.bf16.msra.mxu1 %v4023_v58  ;;  %v4118_v57 = vld [vmem:[%s5023_s5 + $0x204] ss:$112 sps:$4 sm:$0xff]   ;;  %v4121_v58 = vld [vmem:[%s5023_s5 + $0x20c] ss:$112 sps:$4 sm:$0xff]  }
  0xe6   : > { %2374 = vmatprep.subr.bf16.mxu0 %v4028_v59  ;;  %2417 = vmatprep.subr.bf16.mxu1 %v4031_v60  ;;  %v4116_v59 = vld [vmem:[%s5023_s5 + $0x200] ss:$112 sps:$4 sm:$0xff]   ;;  %v4119_v60 = vld [vmem:[%s5023_s5 + $0x208] ss:$112 sps:$4 sm:$0xff]  }
  0xe9   : > { %2375 = vmatpush1.bf16.msra.mxu0 %v4026_v61  ;;  %2418 = vmatpush1.bf16.msra.mxu1 %v4029_v62  ;;  %v4124_v61 = vld [vmem:[%s5023_s5 + $0x124] ss:$112 sps:$4 sm:$0xff]   ;;  %v4127_v62 = vld [vmem:[%s5023_s5 + $0x12c] ss:$112 sps:$4 sm:$0xff]  }
  0xea   : > { %2376 = vmatprep.subr.bf16.mxu0 %v4034_v63  ;;  %2419 = vmatprep.subr.bf16.mxu1 %v4037_v0  ;;  %v4122_v63 = vld [vmem:[%s5023_s5 + $0x120] ss:$112 sps:$4 sm:$0xff]   ;;  %v4125_v0 = vld [vmem:[%s5023_s5 + $0x128] ss:$112 sps:$4 sm:$0xff]  }
  0xed   : > { %2377 = vmatpush1.bf16.msra.mxu0 %v4032_v1  ;;  %2420 = vmatpush1.bf16.msra.mxu1 %v4035_v2  ;;  %v4130_v1 = vld [vmem:[%s5023_s5 + $0x44] ss:$112 sps:$4 sm:$0xff]   ;;  %v4133_v2 = vld [vmem:[%s5023_s5 + $0x4c] ss:$112 sps:$4 sm:$0xff]  }
  0xee   : > { %2448 = vmatprep.subr.bf16.mxu0 %v4040_v4  ;;  %2491 = vmatprep.subr.bf16.mxu1 %v4043_v5  ;;  %v4128_v4 = vld [vmem:[%s5023_s5 + $0x40] ss:$112 sps:$4 sm:$0xff]   ;;  %v4131_v5 = vld [vmem:[%s5023_s5 + $0x48] ss:$112 sps:$4 sm:$0xff]  }
  0xf0   : > { %2395 = vmatmul.mubr.bf16.vlgmr.msra.gmra.mxu0 %v5062_v3  ;;  %2438 = vmatmul.mubr.bf16.vlgmr.msra.gmra.mxu1 %v5062_v3 }
  0xf1   : > { %2449 = vmatpush1.bf16.msra.mxu0 %v4038_v6  ;;  %2492 = vmatpush1.bf16.msra.mxu1 %v4041_v7  ;;  %v4136_v6 = vld [vmem:[%s5023_s5 + $0x674] ss:$112 sps:$4 sm:$0xff]   ;;  %v4139_v7 = vld [vmem:[%s5023_s5 + $0x67c] ss:$112 sps:$4 sm:$0xff]  }
  0xf2   : > { %2450 = vmatprep.subr.bf16.mxu0 %v4046_v8  ;;  %2493 = vmatprep.subr.bf16.mxu1 %v4049_v9  ;;  %v4134_v8 = vld [vmem:[%s5023_s5 + $0x670] ss:$112 sps:$4 sm:$0xff]   ;;  %v4137_v9 = vld [vmem:[%s5023_s5 + $0x678] ss:$112 sps:$4 sm:$0xff]  }
  0xf3   : > { %2480 = vmatprep.mubr.bf16.mxu0 %v4495_v32  ;;  %2523 = vmatprep.mubr.bf16.mxu1 %v4495_v32 }
  0xf5   : > { %2451 = vmatpush1.bf16.msra.mxu0 %v4044_v10  ;;  %2494 = vmatpush1.bf16.msra.mxu1 %v4047_v11  ;;  %v4142_v10 = vld [vmem:[%s5023_s5 + $0x594] ss:$112 sps:$4 sm:$0xff]   ;;  %v4145_v11 = vld [vmem:[%s5023_s5 + $0x59c] ss:$112 sps:$4 sm:$0xff]  }
  0xf6   : > { %2452 = vmatprep.subr.bf16.mxu0 %v4052_v12  ;;  %2495 = vmatprep.subr.bf16.mxu1 %v4055_v13  ;;  %v4140_v12 = vld [vmem:[%s5023_s5 + $0x590] ss:$112 sps:$4 sm:$0xff]   ;;  %v4143_v13 = vld [vmem:[%s5023_s5 + $0x598] ss:$112 sps:$4 sm:$0xff]  }
  0xf9   : > { %2453 = vmatpush1.bf16.msra.mxu0 %v4050_v14  ;;  %2496 = vmatpush1.bf16.msra.mxu1 %v4053_v15  ;;  %v4148_v14 = vld [vmem:[%s5023_s5 + $0x4b4] ss:$112 sps:$4 sm:$0xff]   ;;  %v4151_v15 = vld [vmem:[%s5023_s5 + $0x4bc] ss:$112 sps:$4 sm:$0xff]  }
  0xfa   : > { %2454 = vmatprep.subr.bf16.mxu0 %v4058_v16  ;;  %2497 = vmatprep.subr.bf16.mxu1 %v4061_v17  ;;  %v4149_v16 = vld [vmem:[%s5023_s5 + $0x4b8] ss:$112 sps:$4 sm:$0xff]   ;;  %v4154_v17 = vld [vmem:[%s5023_s5 + $0x3d4] ss:$112 sps:$4 sm:$0xff]  }
  0xfd   : > { %2455 = vmatpush1.bf16.msra.mxu0 %v4056_v18  ;;  %2498 = vmatpush1.bf16.msra.mxu1 %v4059_v19  ;;  %v4157_v18 = vld [vmem:[%s5023_s5 + $0x3dc] ss:$112 sps:$4 sm:$0xff]   ;;  %v4152_v19 = vld [vmem:[%s5023_s5 + $0x3d0] ss:$112 sps:$4 sm:$0xff]  }
  0xfe   : > { %2456 = vmatprep.subr.bf16.mxu0 %v4064_v20  ;;  %2499 = vmatprep.subr.bf16.mxu1 %v4067_v21  ;;  %v4155_v20 = vld [vmem:[%s5023_s5 + $0x3d8] ss:$112 sps:$4 sm:$0xff]   ;;  %v4160_v21 = vld [vmem:[%s5023_s5 + $0x2f4] ss:$112 sps:$4 sm:$0xff]  }
 0x101   : > { %2457 = vmatpush1.bf16.msra.mxu0 %v4062_v22  ;;  %2500 = vmatpush1.bf16.msra.mxu1 %v4065_v23  ;;  %v4163_v22 = vld [vmem:[%s5023_s5 + $0x2fc] ss:$112 sps:$4 sm:$0xff]   ;;  %v4158_v23 = vld [vmem:[%s5023_s5 + $0x2f0] ss:$112 sps:$4 sm:$0xff]  }
 0x102   : > { %2458 = vmatprep.subr.bf16.mxu0 %v4070_v24  ;;  %2501 = vmatprep.subr.bf16.mxu1 %v4073_v25  ;;  %v4161_v24 = vld [vmem:[%s5023_s5 + $0x2f8] ss:$112 sps:$4 sm:$0xff]   ;;  %v4166_v25 = vld [vmem:[%s5023_s5 + $0x214] ss:$112 sps:$4 sm:$0xff]  }
 0x105   : > { %2459 = vmatpush1.bf16.msra.mxu0 %v4068_v26  ;;  %2502 = vmatpush1.bf16.msra.mxu1 %v4071_v27  ;;  %v4169_v26 = vld [vmem:[%s5023_s5 + $0x21c] ss:$112 sps:$4 sm:$0xff]   ;;  %v4164_v27 = vld [vmem:[%s5023_s5 + $0x210] ss:$112 sps:$4 sm:$0xff]  }
 0x106   : > { %2460 = vmatprep.subr.bf16.mxu0 %v4076_v28  ;;  %2503 = vmatprep.subr.bf16.mxu1 %v4079_v29  ;;  %v4167_v28 = vld [vmem:[%s5023_s5 + $0x218] ss:$112 sps:$4 sm:$0xff]   ;;  %v4172_v29 = vld [vmem:[%s5023_s5 + $0x134] ss:$112 sps:$4 sm:$0xff]  }
 0x109   : > { %2461 = vmatpush1.bf16.msra.mxu0 %v4074_v30  ;;  %2504 = vmatpush1.bf16.msra.mxu1 %v4077_v31  ;;  %v4175_v30 = vld [vmem:[%s5023_s5 + $0x13c] ss:$112 sps:$4 sm:$0xff]   ;;  %v4170_v31 = vld [vmem:[%s5023_s5 + $0x130] ss:$112 sps:$4 sm:$0xff]  }
 0x10a   : > { %2462 = vmatprep.subr.bf16.mxu0 %v4082_v33  ;;  %2505 = vmatprep.subr.bf16.mxu1 %v4085_v34  ;;  %v4173_v33 = vld [vmem:[%s5023_s5 + $0x138] ss:$112 sps:$4 sm:$0xff]   ;;  %v4178_v34 = vld [vmem:[%s5023_s5 + $0x54] ss:$112 sps:$4 sm:$0xff]  }
 0x10d   : > { %2463 = vmatpush1.bf16.msra.mxu0 %v4080_v35  ;;  %2506 = vmatpush1.bf16.msra.mxu1 %v4083_v36  ;;  %v4181_v35 = vld [vmem:[%s5023_s5 + $0x5c] ss:$112 sps:$4 sm:$0xff]   ;;  %v4176_v36 = vld [vmem:[%s5023_s5 + $0x50] ss:$112 sps:$4 sm:$0xff]  }
 0x10e   : > { %2534 = vmatprep.subr.bf16.mxu0 %v4088_v37  ;;  %2577 = vmatprep.subr.bf16.mxu1 %v4091_v38  ;;  %v4179_v37 = vld [vmem:[%s5023_s5 + $0x58] ss:$112 sps:$4 sm:$0xff]   ;;  %v4184_v38 = vld [vmem:[%s5023_s5 + $0x684] ss:$112 sps:$4 sm:$0xff]  }
 0x110   : > { %2481 = vmatmul.mubr.bf16.vlgmr.msra.gmra.mxu0 %v5062_v3  ;;  %2524 = vmatmul.mubr.bf16.vlgmr.msra.gmra.mxu1 %v5062_v3 }
 0x111   : > { %2535 = vmatpush1.bf16.msra.mxu0 %v4086_v39  ;;  %2578 = vmatpush1.bf16.msra.mxu1 %v4089_v40  ;;  %v4187_v39 = vld [vmem:[%s5023_s5 + $0x68c] ss:$112 sps:$4 sm:$0xff]   ;;  %v4182_v40 = vld [vmem:[%s5023_s5 + $0x680] ss:$112 sps:$4 sm:$0xff]  }
 0x112   : > { %2536 = vmatprep.subr.bf16.mxu0 %v4094_v41  ;;  %2579 = vmatprep.subr.bf16.mxu1 %v4097_v42  ;;  %v4185_v41 = vld [vmem:[%s5023_s5 + $0x688] ss:$112 sps:$4 sm:$0xff]   ;;  %v4190_v42 = vld [vmem:[%s5023_s5 + $0x5a4] ss:$112 sps:$4 sm:$0xff]  }
 0x113   : > { %2566 = vmatprep.mubr.bf16.mxu0 %v4495_v32  ;;  %2609 = vmatprep.mubr.bf16.mxu1 %v4495_v32 }
 0x115   : > { %2537 = vmatpush1.bf16.msra.mxu0 %v4092_v43  ;;  %2580 = vmatpush1.bf16.msra.mxu1 %v4095_v44  ;;  %v4193_v43 = vld [vmem:[%s5023_s5 + $0x5ac] ss:$112 sps:$4 sm:$0xff]   ;;  %v5251_v44 = vld [vmem:[%s5490_s0] sm:$0xff]  }
 0x116   : > { %2538 = vmatprep.subr.bf16.mxu0 %v4100_v45  ;;  %2581 = vmatprep.subr.bf16.mxu1 %v4103_v46  ;;  %v4188_v45 = vld [vmem:[%s5023_s5 + $0x5a0] ss:$112 sps:$4 sm:$0xff]   ;;  %v4191_v46 = vld [vmem:[%s5023_s5 + $0x5a8] ss:$112 sps:$4 sm:$0xff]  }
 0x119   : > { %2539 = vmatpush1.bf16.msra.mxu0 %v4098_v47  ;;  %2582 = vmatpush1.bf16.msra.mxu1 %v4101_v48  ;;  %v4196_v47 = vld [vmem:[%s5023_s5 + $0x4c4] ss:$112 sps:$4 sm:$0xff]   ;;  %v4199_v48 = vld [vmem:[%s5023_s5 + $0x4cc] ss:$112 sps:$4 sm:$0xff]  }
 0x11a   : > { %2540 = vmatprep.subr.bf16.mxu0 %v4106_v49  ;;  %2583 = vmatprep.subr.bf16.mxu1 %v4109_v50  ;;  %v4194_v49 = vld [vmem:[%s5023_s5 + $0x4c0] ss:$112 sps:$4 sm:$0xff]   ;;  %v4197_v50 = vld [vmem:[%s5023_s5 + $0x4c8] ss:$112 sps:$4 sm:$0xff]  }
 0x11d   : > { %2541 = vmatpush1.bf16.msra.mxu0 %v4104_v51  ;;  %2584 = vmatpush1.bf16.msra.mxu1 %v4107_v52  ;;  %v4202_v51 = vld [vmem:[%s5023_s5 + $0x3e4] ss:$112 sps:$4 sm:$0xff]   ;;  %v4205_v52 = vld [vmem:[%s5023_s5 + $0x3ec] ss:$112 sps:$4 sm:$0xff]  }
 0x11e   : > { %2542 = vmatprep.subr.bf16.mxu0 %v4112_v53  ;;  %2585 = vmatprep.subr.bf16.mxu1 %v4115_v54  ;;  %v4200_v53 = vld [vmem:[%s5023_s5 + $0x3e0] ss:$112 sps:$4 sm:$0xff]   ;;  %v4203_v54 = vld [vmem:[%s5023_s5 + $0x3e8] ss:$112 sps:$4 sm:$0xff]  }
 0x121   : > { %2543 = vmatpush1.bf16.msra.mxu0 %v4110_v55  ;;  %2586 = vmatpush1.bf16.msra.mxu1 %v4113_v56  ;;  %v4211_v55 = vld [vmem:[%s5023_s5 + $0x30c] ss:$112 sps:$4 sm:$0xff]   ;;  %v4206_v56 = vld [vmem:[%s5023_s5 + $0x300] ss:$112 sps:$4 sm:$0xff]  }
 0x122   : > { %2544 = vmatprep.subr.bf16.mxu0 %v4118_v57  ;;  %2587 = vmatprep.subr.bf16.mxu1 %v4121_v58  ;;  %v4209_v57 = vld [vmem:[%s5023_s5 + $0x308] ss:$112 sps:$4 sm:$0xff]   ;;  %v4214_v58 = vld [vmem:[%s5023_s5 + $0x224] ss:$112 sps:$4 sm:$0xff]  }
 0x125   : > { %2545 = vmatpush1.bf16.msra.mxu0 %v4116_v59  ;;  %2588 = vmatpush1.bf16.msra.mxu1 %v4119_v60  ;;  %v4217_v59 = vld [vmem:[%s5023_s5 + $0x22c] ss:$112 sps:$4 sm:$0xff]   ;;  %v4212_v60 = vld [vmem:[%s5023_s5 + $0x220] ss:$112 sps:$4 sm:$0xff]  }
 0x126   : > { %2546 = vmatprep.subr.bf16.mxu0 %v4124_v61  ;;  %2589 = vmatprep.subr.bf16.mxu1 %v4127_v62  ;;  %v4215_v61 = vld [vmem:[%s5023_s5 + $0x228] ss:$112 sps:$4 sm:$0xff]   ;;  %v924_v62 = vlaneseq }
 0x129   : > { %2547 = vmatpush1.bf16.msra.mxu0 %v4122_v63  ;;  %2590 = vmatpush1.bf16.msra.mxu1 %v4125_v0  ;;  %v4220_v63 = vld [vmem:[%s5023_s5 + $0x144] ss:$112 sps:$4 sm:$0xff]   ;;  %v4223_v0 = vld [vmem:[%s5023_s5 + $0x14c] ss:$112 sps:$4 sm:$0xff]  }
 0x12a   : > { %2548 = vmatprep.subr.bf16.mxu0 %v4130_v1  ;;  %2591 = vmatprep.subr.bf16.mxu1 %v4133_v2  ;;  %v4218_v1 = vld [vmem:[%s5023_s5 + $0x140] ss:$112 sps:$4 sm:$0xff]   ;;  %v4221_v2 = vld [vmem:[%s5023_s5 + $0x148] ss:$112 sps:$4 sm:$0xff]  }
 0x12d   : > { %2549 = vmatpush1.bf16.msra.mxu0 %v4128_v4  ;;  %2592 = vmatpush1.bf16.msra.mxu1 %v4131_v5  ;;  %v5280_v4 = vshrl.u32 %v924_v62, 7  ;;  %v4226_v5 = vld [vmem:[%s5023_s5 + $0x64] ss:$112 sps:$4 sm:$0xff]  }
 0x12e   : > { %2620 = vmatprep.subr.bf16.mxu0 %v4136_v6  ;;  %2663 = vmatprep.subr.bf16.mxu1 %v4139_v7  ;;  %v4229_v6 = vld [vmem:[%s5023_s5 + $0x6c] ss:$112 sps:$4 sm:$0xff]   ;;  %v4224_v7 = vld [vmem:[%s5023_s5 + $0x60] ss:$112 sps:$4 sm:$0xff]  }
 0x130   : > { %2567 = vmatmul.mubr.bf16.vlgmr.msra.gmra.mxu0 %v5062_v3  ;;  %2610 = vmatmul.mubr.bf16.vlgmr.msra.gmra.mxu1 %v5062_v3  ;;  %v4146_v3 = vld [vmem:[%s5023_s5 + $0x4b0] ss:$112 sps:$4 sm:$0xff]  }
 0x131   : > { %2621 = vmatpush1.bf16.msra.mxu0 %v4134_v8  ;;  %2664 = vmatpush1.bf16.msra.mxu1 %v4137_v9  ;;  %v4227_v8 = vld [vmem:[%s5023_s5 + $0x68] ss:$112 sps:$4 sm:$0xff]   ;;  %v5292_v9 = vsub.s32 0, %v5280_v4 }
 0x132   : > { %2622 = vmatprep.subr.bf16.mxu0 %v4142_v10  ;;  %2665 = vmatprep.subr.bf16.mxu1 %v4145_v11  ;;  %v5295_v10 = vsub.s32 2, %v5280_v4  ;;  %v5298_v11 = vld [vmem:[%s5287_s19] sm:$0xff] }
 0x133   : > { %2652 = vmatprep.mubr.bf16.mxu0 %v4495_v32  ;;  %2695 = vmatprep.mubr.bf16.mxu1 %v4495_v32 }
 0x135   : > { %2623 = vmatpush1.bf16.msra.mxu0 %v4140_v12  ;;  %2666 = vmatpush1.bf16.msra.mxu1 %v4143_v13  ;;  %v5301_v12 = vsub.s32 1, %v5280_v4  ;;  %v5304_v13 = vsub.s32 3, %v5280_v4 }
 0x136   : > { %2624 = vmatprep.subr.bf16.mxu0 %v4148_v14  ;;  %2667 = vmatprep.subr.bf16.mxu1 %v4151_v15  ;;  %v927_v14 = vrot.slane %v5298_v11, %v5292_v9  ;;  %v935_v15 = vrot.slane %v5298_v11, %v5295_v10 }
 0x139   : > { %2625 = vmatpush1.bf16.msra.mxu0 %v4146_v3  ;;  %2668 = vmatpush1.bf16.msra.mxu1 %v4149_v16  ;;  %v931_v3 = vrot.slane %v5298_v11, %v5301_v12  ;;  %v939_v16 = vrot.slane %v5298_v11, %v5304_v13 }
 0x13a   : > { %2626 = vmatprep.subr.bf16.mxu0 %v4154_v17  ;;  %2669 = vmatprep.subr.bf16.mxu1 %v4157_v18 }
 0x13d   : > { %2627 = vmatpush1.bf16.msra.mxu0 %v4152_v19  ;;  %2670 = vmatpush1.bf16.msra.mxu1 %v4155_v20 }
 0x13e   : > { %2628 = vmatprep.subr.bf16.mxu0 %v4160_v21  ;;  %2671 = vmatprep.subr.bf16.mxu1 %v4163_v22 }
 0x141   : > { %2629 = vmatpush1.bf16.msra.mxu0 %v4158_v23  ;;  %2672 = vmatpush1.bf16.msra.mxu1 %v4161_v24 }
 0x142   : > { %2630 = vmatprep.subr.bf16.mxu0 %v4166_v25  ;;  %2673 = vmatprep.subr.bf16.mxu1 %v4169_v26 }
 0x145   : > { %2631 = vmatpush1.bf16.msra.mxu0 %v4164_v27  ;;  %2674 = vmatpush1.bf16.msra.mxu1 %v4167_v28 }
 0x146   : > { %2632 = vmatprep.subr.bf16.mxu0 %v4172_v29  ;;  %2675 = vmatprep.subr.bf16.mxu1 %v4175_v30 }
 0x149   : > { %2633 = vmatpush1.bf16.msra.mxu0 %v4170_v31  ;;  %2676 = vmatpush1.bf16.msra.mxu1 %v4173_v33 }
 0x14a   : > { %2634 = vmatprep.subr.bf16.mxu0 %v4178_v34  ;;  %2677 = vmatprep.subr.bf16.mxu1 %v4181_v35 }
 0x14d   : > { %2635 = vmatpush1.bf16.msra.mxu0 %v4176_v36  ;;  %2678 = vmatpush1.bf16.msra.mxu1 %v4179_v37 }
 0x14e   : > { %2706 = vmatprep.subr.bf16.mxu0 %v4184_v38  ;;  %2749 = vmatprep.subr.bf16.mxu1 %v4187_v39 }
 0x150   : > { %2653 = vmatmul.mubr.bf16.vlgmr.msra.gmra.mxu0 %v5251_v44  ;;  %2696 = vmatmul.mubr.bf16.vlgmr.msra.gmra.mxu1 %v5251_v44 }
 0x151   : > { %2707 = vmatpush1.bf16.msra.mxu0 %v4182_v40  ;;  %2750 = vmatpush1.bf16.msra.mxu1 %v4185_v41 }
 0x152   : > { %2708 = vmatprep.subr.bf16.mxu0 %v4190_v42  ;;  %2751 = vmatprep.subr.bf16.mxu1 %v4193_v43 }
 0x153   : > { %2738 = vmatprep.mubr.bf16.mxu0 %v4495_v32  ;;  %2781 = vmatprep.mubr.bf16.mxu1 %v4495_v32  ;;  %v4208_v32 = vld [vmem:[%s5023_s5 + $0x304] ss:$112 sps:$4 sm:$0xff]  }
 0x155   : > { %2709 = vmatpush1.bf16.msra.mxu0 %v4188_v45  ;;  %2752 = vmatpush1.bf16.msra.mxu1 %v4191_v46 }
 0x156   : > { %2710 = vmatprep.subr.bf16.mxu0 %v4196_v47  ;;  %2753 = vmatprep.subr.bf16.mxu1 %v4199_v48 }
 0x159   : > { %2711 = vmatpush1.bf16.msra.mxu0 %v4194_v49  ;;  %2754 = vmatpush1.bf16.msra.mxu1 %v4197_v50 }
 0x15a   : > { %2712 = vmatprep.subr.bf16.mxu0 %v4202_v51  ;;  %2755 = vmatprep.subr.bf16.mxu1 %v4205_v52 }
 0x15d   : > { %2713 = vmatpush1.bf16.msra.mxu0 %v4200_v53  ;;  %2756 = vmatpush1.bf16.msra.mxu1 %v4203_v54 }
 0x15e   : > { %2714 = vmatprep.subr.bf16.mxu0 %v4208_v32  ;;  %2757 = vmatprep.subr.bf16.mxu1 %v4211_v55 }
 0x161   : > { %2715 = vmatpush1.bf16.msra.mxu0 %v4206_v56  ;;  %2758 = vmatpush1.bf16.msra.mxu1 %v4209_v57  ;;  %v5317_v56 = vsub.s32 4, %v5280_v4  ;;  %v5320_v57 = vsub.s32 6, %v5280_v4 }
 0x162   : > { %2716 = vmatprep.subr.bf16.mxu0 %v4214_v58  ;;  %2759 = vmatprep.subr.bf16.mxu1 %v4217_v59  ;;  %v5323_v59 = vsub.s32 5, %v5280_v4 }
 0x163   : > { %v951_v62 = vrot.slane %v5298_v11, %v5320_v57 }
 0x165   : > { %2717 = vmatpush1.bf16.msra.mxu0 %v4212_v60  ;;  %2760 = vmatpush1.bf16.msra.mxu1 %v4215_v61  ;;  %v5326_v60 = vsub.s32 7, %v5280_v4  ;;  %v943_v61 = vrot.slane %v5298_v11, %v5317_v56 }
 0x166   : > { %2718 = vmatprep.subr.bf16.mxu0 %v4220_v63  ;;  %2761 = vmatprep.subr.bf16.mxu1 %v4223_v0  ;;  %v947_v63 = vrot.slane %v5298_v11, %v5323_v59 }
 0x167   : > { %v955_v0 = vrot.slane %v5298_v11, %v5326_v60 }
 0x169   : > { %2719 = vmatpush1.bf16.msra.mxu0 %v4218_v1  ;;  %2762 = vmatpush1.bf16.msra.mxu1 %v4221_v2 }
 0x16a   : > { %2720 = vmatprep.subr.bf16.mxu0 %v4226_v5  ;;  %2763 = vmatprep.subr.bf16.mxu1 %v4229_v6 }
 0x16d   : > { %2721 = vmatpush1.bf16.msra.mxu0 %v4224_v7  ;;  %2764 = vmatpush1.bf16.msra.mxu1 %v4227_v8 }
 0x170   : > { %v2224_v17 = vpop.f32.mrf.mxu0  ;;  %v2267_v18 = vpop.f32.mrf.mxu1  ;;  %2739 = vmatmul.mubr.bf16.vlgmr.msra.gmra.mxu0 %v5251_v44  ;;  %2782 = vmatmul.mubr.bf16.vlgmr.msra.gmra.mxu1 %v5251_v44 }
 0x171   : > { %v2225_v19 = vadd.f32 %v2224_v17, %v927_v14  ;;  %v2268_v20 = vadd.f32 %v2267_v18, %v935_v15 }
 0x172   : > { %v2226_v21 = vpop.f32.mrf.mxu0  ;;  %v2269_v22 = vpop.f32.mrf.mxu1 }
 0x173   : > { %v3732_v23 = vmul.f32 -1.442695, %v2225_v19  ;;  %v3734_v24 = vmul.f32 -1.442695, %v2268_v20  ;;  %v2227_v25 = vadd.f32 %v2226_v21, %v931_v3  ;;  %v2270_v26 = vadd.f32 %v2269_v22, %v939_v16 }
 0x174   : > { %v2228_v27 = vpop.f32.mrf.mxu0  ;;  %v2271_v28 = vpop.f32.mrf.mxu1 }
 0x175   : > { %4230 = vpow2.f32 %v3732_v23  ;;  %v3733_v29 = vmul.f32 -1.442695, %v2227_v25  ;;  %v3735_v30 = vmul.f32 -1.442695, %v2270_v26  ;;  %v2229_v31 = vadd.f32 %v2228_v27, %v927_v14 }
 0x176   : > { %4232 = vpow2.f32 %v3734_v24  ;;  %v2272_v33 = vadd.f32 %v2271_v28, %v935_v15  ;;  %v2230_v34 = vpop.f32.mrf.mxu0  ;;  %v2273_v35 = vpop.f32.mrf.mxu1 }
 0x177   : > { %4234 = vpow2.f32 %v3733_v29  ;;  %v3760_v36 = vmul.f32 -1.442695, %v2229_v31  ;;  %v2231_v37 = vadd.f32 %v2230_v34, %v931_v3  ;;  %v2274_v38 = vadd.f32 %v2273_v35, %v939_v16 }
 0x178   : > { %4236 = vpow2.f32 %v3735_v30  ;;  %v3762_v39 = vmul.f32 -1.442695, %v2272_v33 }
 0x179   : > { %4238 = vpow2.f32 %v3760_v36  ;;  %v3761_v40 = vmul.f32 -1.442695, %v2231_v37  ;;  %v3763_v41 = vmul.f32 -1.442695, %v2274_v38 }
 0x17a   : > { %4240 = vpow2.f32 %v3762_v39 }
 0x17b   : > { %4242 = vpow2.f32 %v3761_v40 }
 0x17c   : > { %4244 = vpow2.f32 %v3763_v41 }
 0x182   : > { %v4231_v42 = vpop.eup %4230 }
 0x183   : > { %v4233_v43 = vpop.eup %4232  ;;  %v2960_v44 = vadd.f32 1.0, %v4231_v42 }
 0x184   : > { %v4235_v45 = vpop.eup %4234  ;;  %v2962_v46 = vadd.f32 1.0, %v4233_v43 }
 0x185   : > { %v4237_v47 = vpop.eup %4236  ;;  %4246 = vrcp.f32 %v2960_v44  ;;  %v2961_v48 = vadd.f32 1.0, %v4235_v45 }
 0x186   : > { %v4239_v49 = vpop.eup %4238  ;;  %4248 = vrcp.f32 %v2962_v46  ;;  %v2963_v50 = vadd.f32 1.0, %v4237_v47 }
 0x187   : > { %v4241_v51 = vpop.eup %4240  ;;  %4250 = vrcp.f32 %v2961_v48  ;;  %v2988_v52 = vadd.f32 1.0, %v4239_v49 }
 0x188   : > { %v4243_v53 = vpop.eup %4242  ;;  %4252 = vrcp.f32 %v2963_v50  ;;  %v2990_v54 = vadd.f32 1.0, %v4241_v51 }
 0x189   : > { %v4245_v32 = vpop.eup %4244  ;;  %4254 = vrcp.f32 %v2988_v52  ;;  %v2989_v55 = vadd.f32 1.0, %v4243_v53 }
 0x18a   : > { %4256 = vrcp.f32 %v2990_v54  ;;  %v2991_v58 = vadd.f32 1.0, %v4245_v32 }
 0x18b   : > { %4258 = vrcp.f32 %v2989_v55 }
 0x18c   : > { %4260 = vrcp.f32 %v2991_v58  ;;  %v5345_v58 = vld [vmem:[%s5287_s19 + $0x8] sm:$0xff] }
 0x190   : > { %v2310_v1 = vpop.f32.mrf.mxu0  ;;  %v2353_v2 = vpop.f32.mrf.mxu1 }
 0x191   : > { %v2311_v5 = vadd.f32 %v2310_v1, %v943_v61  ;;  %v2354_v4 = vadd.f32 %v2353_v2, %v951_v62  ;;  %v971_v1 = vrot.slane %v5345_v58, %v5304_v13 }
 0x192   : > { %v4247_v6 = vpop.eup %4246  ;;  %v2312_v7 = vpop.f32.mrf.mxu0 }
 0x193   : > { %v2355_v8 = vpop.f32.mrf.mxu1  ;;  %v4249_v14 = vpop.eup %4248  ;;  %v3736_v15 = vmul.f32 -1.442695, %v2311_v5  ;;  %v3738_v3 = vmul.f32 -1.442695, %v2354_v4  ;;  %v2313_v16 = vadd.f32 %v2312_v7, %v947_v63 }
 0x194   : > { %v2356_v17 = vadd.f32 %v2355_v8, %v955_v0  ;;  %v4251_v18 = vpop.eup %4250  ;;  %v2314_v19 = vpop.f32.mrf.mxu0 }
 0x195   : > { %v2357_v20 = vpop.f32.mrf.mxu1  ;;  %v4253_v21 = vpop.eup %4252  ;;  %v3820_v22 = vpack.c.bf16 %v4251_v18, %v4247_v6  ;;  %4262 = vpow2.f32 %v3736_v15  ;;  %v3737_v11 = vmul.f32 -1.442695, %v2313_v16  ;;  %v2315_v26 = vadd.f32 %v2314_v19, %v943_v61 }
 0x196   : > { %v3739_v23 = vmul.f32 -1.442695, %v2356_v17  ;;  %v4255_v24 = vpop.eup %4254  ;;  %v3821_v25 = vpack.c.bf16 %v4253_v21, %v4249_v14  ;;  %4264 = vpow2.f32 %v3738_v3  ;;  %v2358_v27 = vadd.f32 %v2357_v20, %v951_v62  ;;  %v2316_v28 = vpop.f32.mrf.mxu0 }
 0x197   : > { %v2359_v29 = vpop.f32.mrf.mxu1  ;;  %v4257_v30 = vpop.eup %4256  ;;  %3296 = vst [vmem:[%s5338_s12] sm:$0xff] %v3820_v22  ;;  %4266 = vpow2.f32 %v3737_v11  ;;  %v2317_v31 = vadd.f32 %v2316_v28, %v947_v63  ;;  %v3764_v35 = vmul.f32 -1.442695, %v2315_v26  ;;  %v959_v62 = vrot.slane %v5345_v58, %v5292_v9 }
 0x198   : > { %v2360_v33 = vadd.f32 %v2359_v29, %v955_v0  ;;  %v4259_v34 = vpop.eup %4258  ;;  %3297 = vst [vmem:[%s5338_s12 + $0x8] sm:$0xff] %v3821_v25  ;;  %4268 = vpow2.f32 %v3739_v23  ;;  %v3766_v36 = vmul.f32 -1.442695, %v2358_v27  ;;  %v967_v63 = vrot.slane %v5345_v58, %v5295_v10 }
 0x199   : > { %v4261_v37 = vpop.eup %4260  ;;  %v3834_v38 = vpack.c.bf16 %v4259_v34, %v4255_v24  ;;  %v3765_v39 = vmul.f32 -1.442695, %v2317_v31  ;;  %4270 = vpow2.f32 %v3764_v35  ;;  %v963_v0 = vrot.slane %v5345_v58, %v5301_v12 }
 0x19a   : > { %v3767_v40 = vmul.f32 -1.442695, %v2360_v33  ;;  %v3835_v41 = vpack.c.bf16 %v4261_v37, %v4257_v30  ;;  %4272 = vpow2.f32 %v3766_v36 }
 0x19b   : > { %3310 = vst [vmem:[%s5338_s12 + $0x70] sm:$0xff] %v3834_v38  ;;  %4274 = vpow2.f32 %v3765_v39 }
 0x19c   : > { %3311 = vst [vmem:[%s5338_s12 + $0x78] sm:$0xff] %v3835_v41  ;;  %4276 = vpow2.f32 %v3767_v40 }
 0x1a2   : > { %v4263_v42 = vpop.eup %4262 }
 0x1a3   : > { %v4265_v43 = vpop.eup %4264  ;;  %v2964_v44 = vadd.f32 1.0, %v4263_v42 }
 0x1a4   : > { %v4267_v45 = vpop.eup %4266  ;;  %v2966_v46 = vadd.f32 1.0, %v4265_v43 }
 0x1a5   : > { %v4269_v47 = vpop.eup %4268  ;;  %4278 = vrcp.f32 %v2964_v44  ;;  %v2965_v48 = vadd.f32 1.0, %v4267_v45 }
 0x1a6   : > { %4280 = vrcp.f32 %v2966_v46  ;;  %v2967_v49 = vadd.f32 1.0, %v4269_v47  ;;  %v4271_v50 = vpop.eup %4270 }
 0x1a7   : > { %4282 = vrcp.f32 %v2965_v48  ;;  %v4273_v51 = vpop.eup %4272  ;;  %v2992_v52 = vadd.f32 1.0, %v4271_v50 }
 0x1a8   : > { %4284 = vrcp.f32 %v2967_v49  ;;  %v4275_v53 = vpop.eup %4274  ;;  %v2994_v54 = vadd.f32 1.0, %v4273_v51 }
 0x1a9   : > { %v4277_v32 = vpop.eup %4276  ;;  %4286 = vrcp.f32 %v2992_v52  ;;  %v2993_v55 = vadd.f32 1.0, %v4275_v53 }
 0x1aa   : > { %4288 = vrcp.f32 %v2994_v54  ;;  %v2995_v61 = vadd.f32 1.0, %v4277_v32 }
 0x1ab   : > { %4290 = vrcp.f32 %v2993_v55 }
 0x1ac   : > { %4292 = vrcp.f32 %v2995_v61 }
 0x1b0   : > { %v2396_v2 = vpop.f32.mrf.mxu0  ;;  %v2439_v5 = vpop.f32.mrf.mxu1 }
 0x1b1   : > { %v2397_v4 = vadd.f32 %v2396_v2, %v959_v62  ;;  %v2440_v6 = vadd.f32 %v2439_v5, %v967_v63  ;;  %v987_v2 = vrot.slane %v5345_v58, %v5326_v60 }
 0x1b2   : > { %v4279_v7 = vpop.eup %4278  ;;  %v2398_v8 = vpop.f32.mrf.mxu0 }
 0x1b3   : > { %v2441_v14 = vpop.f32.mrf.mxu1  ;;  %v4281_v15 = vpop.eup %4280  ;;  %v3740_v3 = vmul.f32 -1.442695, %v2397_v4  ;;  %v3742_v16 = vmul.f32 -1.442695, %v2440_v6  ;;  %v2399_v17 = vadd.f32 %v2398_v8, %v963_v0 }
 0x1b4   : > { %v2442_v18 = vadd.f32 %v2441_v14, %v971_v1  ;;  %v4283_v19 = vpop.eup %4282  ;;  %v2400_v20 = vpop.f32.mrf.mxu0 }
 0x1b5   : > { %v2443_v21 = vpop.f32.mrf.mxu1  ;;  %v4285_v22 = vpop.eup %4284  ;;  %v3822_v11 = vpack.c.bf16 %v4283_v19, %v4279_v7  ;;  %4294 = vpow2.f32 %v3740_v3  ;;  %v3741_v23 = vmul.f32 -1.442695, %v2399_v17  ;;  %v2401_v26 = vadd.f32 %v2400_v20, %v959_v62 }
 0x1b6   : > { %v3743_v24 = vmul.f32 -1.442695, %v2442_v18  ;;  %v3823_v25 = vpack.c.bf16 %v4285_v22, %v4281_v15  ;;  %4296 = vpow2.f32 %v3742_v16  ;;  %v2444_v27 = vadd.f32 %v2443_v21, %v967_v63  ;;  %v2402_v28 = vpop.f32.mrf.mxu0  ;;  %v4287_v30 = vpop.eup %4286 }
 0x1b7   : > { %v2445_v29 = vpop.f32.mrf.mxu1  ;;  %3298 = vst [vmem:[%s5338_s12 + $0x10] sm:$0xff] %v3822_v11  ;;  %4298 = vpow2.f32 %v3741_v23  ;;  %v2403_v31 = vadd.f32 %v2402_v28, %v963_v0  ;;  %v4289_v34 = vpop.eup %4288  ;;  %v3768_v35 = vmul.f32 -1.442695, %v2401_v26  ;;  %v975_v63 = vrot.slane %v5345_v58, %v5317_v56 }
 0x1b8   : > { %v2446_v33 = vadd.f32 %v2445_v29, %v971_v1  ;;  %3299 = vst [vmem:[%s5338_s12 + $0x18] sm:$0xff] %v3823_v25  ;;  %4300 = vpow2.f32 %v3743_v24  ;;  %v3770_v36 = vmul.f32 -1.442695, %v2444_v27  ;;  %v4291_v37 = vpop.eup %4290  ;;  %v983_v0 = vrot.slane %v5345_v58, %v5320_v57 }
 0x1b9   : > { %v3769_v38 = vmul.f32 -1.442695, %v2403_v31  ;;  %v4293_v40 = vpop.eup %4292  ;;  %v3836_v41 = vpack.c.bf16 %v4291_v37, %v4287_v30  ;;  %4302 = vpow2.f32 %v3768_v35  ;;  %v979_v1 = vrot.slane %v5345_v58, %v5323_v59 }
 0x1ba   : > { %v3771_v39 = vmul.f32 -1.442695, %v2446_v33  ;;  %v3837_v42 = vpack.c.bf16 %v4293_v40, %v4289_v34  ;;  %4304 = vpow2.f32 %v3770_v36 }
 0x1bb   : > { %3312 = vst [vmem:[%s5338_s12 + $0x80] sm:$0xff] %v3836_v41  ;;  %4306 = vpow2.f32 %v3769_v38 }
 0x1bc   : > { %3313 = vst [vmem:[%s5338_s12 + $0x88] sm:$0xff] %v3837_v42  ;;  %4308 = vpow2.f32 %v3771_v39 }
 0x1c2   : > { %v4295_v43 = vpop.eup %4294 }
 0x1c3   : > { %v4297_v44 = vpop.eup %4296  ;;  %v2968_v45 = vadd.f32 1.0, %v4295_v43 }
 0x1c4   : > { %v4299_v46 = vpop.eup %4298  ;;  %v2970_v47 = vadd.f32 1.0, %v4297_v44 }
 0x1c5   : > { %v4301_v48 = vpop.eup %4300  ;;  %4310 = vrcp.f32 %v2968_v45  ;;  %v2969_v49 = vadd.f32 1.0, %v4299_v46 }
 0x1c6   : > { %4312 = vrcp.f32 %v2970_v47  ;;  %v2971_v50 = vadd.f32 1.0, %v4301_v48  ;;  %v4303_v51 = vpop.eup %4302 }
 0x1c7   : > { %4314 = vrcp.f32 %v2969_v49  ;;  %v4305_v52 = vpop.eup %4304  ;;  %v2996_v53 = vadd.f32 1.0, %v4303_v51 }
 0x1c8   : > { %4316 = vrcp.f32 %v2971_v50  ;;  %v4307_v54 = vpop.eup %4306  ;;  %v2998_v32 = vadd.f32 1.0, %v4305_v52 }
 0x1c9   : > { %v4309_v55 = vpop.eup %4308  ;;  %4318 = vrcp.f32 %v2996_v53  ;;  %v2997_v61 = vadd.f32 1.0, %v4307_v54 }
 0x1ca   : > { %4320 = vrcp.f32 %v2998_v32  ;;  %v2999_v62 = vadd.f32 1.0, %v4309_v55 }
 0x1cb   : > { %4322 = vrcp.f32 %v2997_v61 }
 0x1cc   : > { %4324 = vrcp.f32 %v2999_v62  ;;  %v5372_v62 = vld [vmem:[%s5287_s19 + $0x10] sm:$0xff] }
 0x1d0   : > { %v2482_v5 = vpop.f32.mrf.mxu0  ;;  %v2525_v4 = vpop.f32.mrf.mxu1 }
 0x1d1   : > { %v2483_v6 = vadd.f32 %v2482_v5, %v975_v63  ;;  %v2526_v7 = vadd.f32 %v2525_v4, %v983_v0  ;;  %v1003_v5 = vrot.slane %v5372_v62, %v5304_v13 }
 0x1d2   : > { %v4311_v8 = vpop.eup %4310  ;;  %v2484_v14 = vpop.f32.mrf.mxu0 }
 0x1d3   : > { %v2527_v15 = vpop.f32.mrf.mxu1  ;;  %v4313_v3 = vpop.eup %4312  ;;  %v3744_v16 = vmul.f32 -1.442695, %v2483_v6  ;;  %v3746_v17 = vmul.f32 -1.442695, %v2526_v7  ;;  %v2485_v18 = vadd.f32 %v2484_v14, %v979_v1 }
 0x1d4   : > { %v2528_v19 = vadd.f32 %v2527_v15, %v987_v2  ;;  %v4315_v20 = vpop.eup %4314  ;;  %v2486_v21 = vpop.f32.mrf.mxu0 }
 0x1d5   : > { %v2529_v22 = vpop.f32.mrf.mxu1  ;;  %v4317_v11 = vpop.eup %4316  ;;  %v3824_v23 = vpack.c.bf16 %v4315_v20, %v4311_v8  ;;  %4326 = vpow2.f32 %v3744_v16  ;;  %v3745_v58 = vmul.f32 -1.442695, %v2485_v18  ;;  %v2487_v26 = vadd.f32 %v2486_v21, %v975_v63 }
 0x1d6   : > { %v3747_v24 = vmul.f32 -1.442695, %v2528_v19  ;;  %v3825_v25 = vpack.c.bf16 %v4317_v11, %v4313_v3  ;;  %4328 = vpow2.f32 %v3746_v17  ;;  %v2530_v27 = vadd.f32 %v2529_v22, %v983_v0  ;;  %v2488_v28 = vpop.f32.mrf.mxu0  ;;  %v4319_v30 = vpop.eup %4318 }
 0x1d7   : > { %v2531_v29 = vpop.f32.mrf.mxu1  ;;  %3300 = vst [vmem:[%s5338_s12 + $0x20] sm:$0xff] %v3824_v23  ;;  %4330 = vpow2.f32 %v3745_v58  ;;  %v2489_v31 = vadd.f32 %v2488_v28, %v979_v1  ;;  %v4321_v34 = vpop.eup %4320  ;;  %v3772_v35 = vmul.f32 -1.442695, %v2487_v26  ;;  %v991_v0 = vrot.slane %v5372_v62, %v5292_v9 }
 0x1d8   : > { %v2532_v33 = vadd.f32 %v2531_v29, %v987_v2  ;;  %3301 = vst [vmem:[%s5338_s12 + $0x28] sm:$0xff] %v3825_v25  ;;  %4332 = vpow2.f32 %v3747_v24  ;;  %v3774_v36 = vmul.f32 -1.442695, %v2530_v27  ;;  %v4323_v37 = vpop.eup %4322  ;;  %v999_v1 = vrot.slane %v5372_v62, %v5295_v10 }
 0x1d9   : > { %v3773_v38 = vmul.f32 -1.442695, %v2489_v31  ;;  %v4325_v40 = vpop.eup %4324  ;;  %v3838_v41 = vpack.c.bf16 %v4323_v37, %v4319_v30  ;;  %4334 = vpow2.f32 %v3772_v35  ;;  %v995_v2 = vrot.slane %v5372_v62, %v5301_v12 }
 0x1da   : > { %v3775_v39 = vmul.f32 -1.442695, %v2532_v33  ;;  %v3839_v42 = vpack.c.bf16 %v4325_v40, %v4321_v34  ;;  %4336 = vpow2.f32 %v3774_v36 }
 0x1db   : > { %3314 = vst [vmem:[%s5338_s12 + $0x90] sm:$0xff] %v3838_v41  ;;  %4338 = vpow2.f32 %v3773_v38 }
 0x1dc   : > { %3315 = vst [vmem:[%s5338_s12 + $0x98] sm:$0xff] %v3839_v42  ;;  %4340 = vpow2.f32 %v3775_v39 }
 0x1e2   : > { %v4327_v43 = vpop.eup %4326 }
 0x1e3   : > { %v4329_v44 = vpop.eup %4328  ;;  %v2972_v45 = vadd.f32 1.0, %v4327_v43 }
 0x1e4   : > { %v4331_v46 = vpop.eup %4330  ;;  %v2974_v47 = vadd.f32 1.0, %v4329_v44 }
 0x1e5   : > { %v4333_v48 = vpop.eup %4332  ;;  %4342 = vrcp.f32 %v2972_v45  ;;  %v2973_v49 = vadd.f32 1.0, %v4331_v46 }
 0x1e6   : > { %4344 = vrcp.f32 %v2974_v47  ;;  %v2975_v50 = vadd.f32 1.0, %v4333_v48  ;;  %v4335_v51 = vpop.eup %4334 }
 0x1e7   : > { %4346 = vrcp.f32 %v2973_v49  ;;  %v4337_v52 = vpop.eup %4336  ;;  %v3000_v53 = vadd.f32 1.0, %v4335_v51 }
 0x1e8   : > { %4348 = vrcp.f32 %v2975_v50  ;;  %v4339_v54 = vpop.eup %4338  ;;  %v3002_v32 = vadd.f32 1.0, %v4337_v52 }
 0x1e9   : > { %v4341_v55 = vpop.eup %4340  ;;  %4350 = vrcp.f32 %v3000_v53  ;;  %v3001_v61 = vadd.f32 1.0, %v4339_v54 }
 0x1ea   : > { %4352 = vrcp.f32 %v3002_v32  ;;  %v3003_v63 = vadd.f32 1.0, %v4341_v55 }
 0x1eb   : > { %4354 = vrcp.f32 %v3001_v61 }
 0x1ec   : > { %4356 = vrcp.f32 %v3003_v63 }
 0x1f0   : > { %v2568_v4 = vpop.f32.mrf.mxu0  ;;  %v2611_v6 = vpop.f32.mrf.mxu1 }
 0x1f1   : > { %v2569_v7 = vadd.f32 %v2568_v4, %v991_v0  ;;  %v2612_v8 = vadd.f32 %v2611_v6, %v999_v1  ;;  %v1019_v4 = vrot.slane %v5372_v62, %v5326_v60 }
 0x1f2   : > { %v4343_v14 = vpop.eup %4342  ;;  %v2570_v15 = vpop.f32.mrf.mxu0 }
 0x1f3   : > { %v2613_v3 = vpop.f32.mrf.mxu1  ;;  %v4345_v16 = vpop.eup %4344  ;;  %v3748_v17 = vmul.f32 -1.442695, %v2569_v7  ;;  %v3750_v18 = vmul.f32 -1.442695, %v2612_v8  ;;  %v2571_v19 = vadd.f32 %v2570_v15, %v995_v2 }
 0x1f4   : > { %v2614_v20 = vadd.f32 %v2613_v3, %v1003_v5  ;;  %v4347_v21 = vpop.eup %4346  ;;  %v2572_v22 = vpop.f32.mrf.mxu0 }
 0x1f5   : > { %v2615_v11 = vpop.f32.mrf.mxu1  ;;  %v4349_v23 = vpop.eup %4348  ;;  %v3826_v58 = vpack.c.bf16 %v4347_v21, %v4343_v14  ;;  %4358 = vpow2.f32 %v3748_v17  ;;  %v3749_v24 = vmul.f32 -1.442695, %v2571_v19  ;;  %v2573_v27 = vadd.f32 %v2572_v22, %v991_v0 }
 0x1f6   : > { %v3751_v25 = vmul.f32 -1.442695, %v2614_v20  ;;  %v3827_v26 = vpack.c.bf16 %v4349_v23, %v4345_v16  ;;  %4360 = vpow2.f32 %v3750_v18  ;;  %v2616_v28 = vadd.f32 %v2615_v11, %v999_v1  ;;  %v2574_v29 = vpop.f32.mrf.mxu0  ;;  %v4351_v31 = vpop.eup %4350 }
 0x1f7   : > { %v2617_v30 = vpop.f32.mrf.mxu1  ;;  %3302 = vst [vmem:[%s5338_s12 + $0x30] sm:$0xff] %v3826_v58  ;;  %4362 = vpow2.f32 %v3749_v24  ;;  %v2575_v33 = vadd.f32 %v2574_v29, %v995_v2  ;;  %v4353_v35 = vpop.eup %4352  ;;  %v3776_v36 = vmul.f32 -1.442695, %v2573_v27  ;;  %v1007_v1 = vrot.slane %v5372_v62, %v5317_v56 }
 0x1f8   : > { %v2618_v34 = vadd.f32 %v2617_v30, %v1003_v5  ;;  %3303 = vst [vmem:[%s5338_s12 + $0x38] sm:$0xff] %v3827_v26  ;;  %4364 = vpow2.f32 %v3751_v25  ;;  %v3778_v37 = vmul.f32 -1.442695, %v2616_v28  ;;  %v4355_v38 = vpop.eup %4354  ;;  %v1015_v2 = vrot.slane %v5372_v62, %v5320_v57 }
 0x1f9   : > { %v3777_v39 = vmul.f32 -1.442695, %v2575_v33  ;;  %v4357_v41 = vpop.eup %4356  ;;  %v3840_v42 = vpack.c.bf16 %v4355_v38, %v4351_v31  ;;  %4366 = vpow2.f32 %v3776_v36  ;;  %v1011_v5 = vrot.slane %v5372_v62, %v5323_v59 }
 0x1fa   : > { %v3779_v40 = vmul.f32 -1.442695, %v2618_v34  ;;  %v3841_v43 = vpack.c.bf16 %v4357_v41, %v4353_v35  ;;  %4368 = vpow2.f32 %v3778_v37 }
 0x1fb   : > { %3316 = vst [vmem:[%s5338_s12 + $0xa0] sm:$0xff] %v3840_v42  ;;  %4370 = vpow2.f32 %v3777_v39 }
 0x1fc   : > { %3317 = vst [vmem:[%s5338_s12 + $0xa8] sm:$0xff] %v3841_v43  ;;  %4372 = vpow2.f32 %v3779_v40 }
 0x202   : > { %v4359_v44 = vpop.eup %4358 }
 0x203   : > { %v4361_v45 = vpop.eup %4360  ;;  %v2976_v46 = vadd.f32 1.0, %v4359_v44 }
 0x204   : > { %v4363_v47 = vpop.eup %4362  ;;  %v2978_v48 = vadd.f32 1.0, %v4361_v45 }
 0x205   : > { %v4365_v49 = vpop.eup %4364  ;;  %4374 = vrcp.f32 %v2976_v46  ;;  %v2977_v50 = vadd.f32 1.0, %v4363_v47 }
 0x206   : > { %4376 = vrcp.f32 %v2978_v48  ;;  %v2979_v51 = vadd.f32 1.0, %v4365_v49  ;;  %v4367_v52 = vpop.eup %4366 }
 0x207   : > { %4378 = vrcp.f32 %v2977_v50  ;;  %v4369_v53 = vpop.eup %4368  ;;  %v3004_v54 = vadd.f32 1.0, %v4367_v52 }
 0x208   : > { %4380 = vrcp.f32 %v2979_v51  ;;  %v4371_v32 = vpop.eup %4370  ;;  %v3006_v55 = vadd.f32 1.0, %v4369_v53 }
 0x209   : > { %v4373_v61 = vpop.eup %4372  ;;  %4382 = vrcp.f32 %v3004_v54  ;;  %v3005_v63 = vadd.f32 1.0, %v4371_v32  ;;  %v919_v32 = vld [vmem:[%s5287_s19 + $0x18] sm:$0xf] }
 0x20a   : > { %4384 = vrcp.f32 %v3006_v55  ;;  %v3007_v0 = vadd.f32 1.0, %v4373_v61  ;;  %v1023_v61 = vrot.slane %v919_v32, %v5292_v9 }
 0x20b   : > { %4386 = vrcp.f32 %v3005_v63  ;;  %v1031_v63 = vrot.slane %v919_v32, %v5295_v10 }
 0x20c   : > { %4388 = vrcp.f32 %v3007_v0  ;;  %v1027_v0 = vrot.slane %v919_v32, %v5301_v12 }
 0x210   : > { %v2654_v6 = vpop.f32.mrf.mxu0  ;;  %v2697_v7 = vpop.f32.mrf.mxu1 }
 0x211   : > { %v2655_v8 = vadd.f32 %v2654_v6, %v1007_v1  ;;  %v2698_v14 = vadd.f32 %v2697_v7, %v1015_v2 }
 0x212   : > { %v4375_v15 = vpop.eup %4374  ;;  %v2656_v3 = vpop.f32.mrf.mxu0 }
 0x213   : > { %v2699_v16 = vpop.f32.mrf.mxu1  ;;  %v4377_v17 = vpop.eup %4376  ;;  %v3752_v18 = vmul.f32 -1.442695, %v2655_v8  ;;  %v3754_v19 = vmul.f32 -1.442695, %v2698_v14  ;;  %v2657_v56 = vadd.f32 %v2656_v3, %v1011_v5 }
 0x214   : > { %v2700_v20 = vadd.f32 %v2699_v16, %v1019_v4  ;;  %v4379_v57 = vpop.eup %4378  ;;  %v2658_v21 = vpop.f32.mrf.mxu0 }
 0x215   : > { %v2701_v22 = vpop.f32.mrf.mxu1  ;;  %v4381_v59 = vpop.eup %4380  ;;  %v3828_v11 = vpack.c.bf16 %v4379_v57, %v4375_v15  ;;  %4390 = vpow2.f32 %v3752_v18  ;;  %v3753_v60 = vmul.f32 -1.442695, %v2657_v56  ;;  %v2659_v58 = vadd.f32 %v2658_v21, %v1007_v1 }
 0x216   : > { %v3755_v62 = vmul.f32 -1.442695, %v2700_v20  ;;  %v3829_v23 = vpack.c.bf16 %v4381_v59, %v4377_v17  ;;  %4392 = vpow2.f32 %v3754_v19  ;;  %v2702_v24 = vadd.f32 %v2701_v22, %v1015_v2  ;;  %v2660_v25 = vpop.f32.mrf.mxu0  ;;  %v4383_v27 = vpop.eup %4382 }
 0x217   : > { %v2703_v26 = vpop.f32.mrf.mxu1  ;;  %3304 = vst [vmem:[%s5338_s12 + $0x40] sm:$0xff] %v3828_v11  ;;  %4394 = vpow2.f32 %v3753_v60  ;;  %v2661_v28 = vadd.f32 %v2660_v25, %v1011_v5  ;;  %v4385_v30 = vpop.eup %4384  ;;  %v3780_v31 = vmul.f32 -1.442695, %v2659_v58  ;;  %v1035_v1 = vrot.slane %v919_v32, %v5304_v13 }
 0x218   : > { %v2704_v29 = vadd.f32 %v2703_v26, %v1019_v4  ;;  %3305 = vst [vmem:[%s5338_s12 + $0x48] sm:$0xff] %v3829_v23  ;;  %4396 = vpow2.f32 %v3755_v62  ;;  %v3782_v33 = vmul.f32 -1.442695, %v2702_v24  ;;  %v4387_v34 = vpop.eup %4386 }
 0x219   : > { %v3781_v35 = vmul.f32 -1.442695, %v2661_v28  ;;  %v4389_v37 = vpop.eup %4388  ;;  %v3842_v38 = vpack.c.bf16 %v4387_v34, %v4383_v27  ;;  %4398 = vpow2.f32 %v3780_v31 }
 0x21a   : > { %v3783_v36 = vmul.f32 -1.442695, %v2704_v29  ;;  %v3843_v39 = vpack.c.bf16 %v4389_v37, %v4385_v30  ;;  %4400 = vpow2.f32 %v3782_v33 }
 0x21b   : > { %3318 = vst [vmem:[%s5338_s12 + $0xb0] sm:$0xff] %v3842_v38  ;;  %4402 = vpow2.f32 %v3781_v35 }
 0x21c   : > { %3319 = vst [vmem:[%s5338_s12 + $0xb8] sm:$0xff] %v3843_v39  ;;  %4404 = vpow2.f32 %v3783_v36 }
 0x222   : > { %v4391_v40 = vpop.eup %4390 }
 0x223   : > { %v4393_v41 = vpop.eup %4392  ;;  %v2980_v42 = vadd.f32 1.0, %v4391_v40 }
 0x224   : > { %v4395_v43 = vpop.eup %4394  ;;  %v2982_v44 = vadd.f32 1.0, %v4393_v41 }
 0x225   : > { %v4397_v45 = vpop.eup %4396  ;;  %4406 = vrcp.f32 %v2980_v42  ;;  %v2981_v46 = vadd.f32 1.0, %v4395_v43 }
 0x226   : > { %4408 = vrcp.f32 %v2982_v44  ;;  %v2983_v47 = vadd.f32 1.0, %v4397_v45  ;;  %v4399_v48 = vpop.eup %4398 }
 0x227   : > { %4410 = vrcp.f32 %v2981_v46  ;;  %v4401_v49 = vpop.eup %4400  ;;  %v3008_v50 = vadd.f32 1.0, %v4399_v48 }
 0x228   : > { %4412 = vrcp.f32 %v2983_v47  ;;  %v4403_v51 = vpop.eup %4402  ;;  %v3010_v52 = vadd.f32 1.0, %v4401_v49 }
 0x229   : > { %v4405_v53 = vpop.eup %4404  ;;  %4414 = vrcp.f32 %v3008_v50  ;;  %v3009_v54 = vadd.f32 1.0, %v4403_v51 }
 0x22a   : > { %4416 = vrcp.f32 %v3010_v52  ;;  %v3011_v55 = vadd.f32 1.0, %v4405_v53 }
 0x22b   : > { %4418 = vrcp.f32 %v3009_v54 }
 0x22c   : > { %4420 = vrcp.f32 %v3011_v55 }
 0x230   : > { %v2740_v2 = vpop.f32.mrf.mxu0  ;;  %v2783_v5 = vpop.f32.mrf.mxu1 }
 0x231   : > { %v2741_v4 = vadd.f32 %v2740_v2, %v1023_v61  ;;  %v2784_v6 = vadd.f32 %v2783_v5, %v1031_v63  ;;  %v3349_v2 = vld [vmem:[%s5338_s12] sm:$0xff] (%p4551_p6)  ;;  %v3351_v5 = vld [vmem:[%s5338_s12 + $0x8] sm:$0xff] (%p4551_p6) }
 0x232   : > { %v4407_v7 = vpop.eup %4406  ;;  %v2742_v8 = vpop.f32.mrf.mxu0  ;;  %3350 = vst [vmem:[%s5423_s25] sm:$0xff] (%p4551_p6), %v3349_v2  ;;  %3352 = vst [vmem:[%s5423_s25 + $0x8] sm:$0xff] (%p4551_p6), %v3351_v5 }
 0x233   : > { %v2785_v14 = vpop.f32.mrf.mxu1  ;;  %v4409_v15 = vpop.eup %4408  ;;  %v3756_v3 = vmul.f32 -1.442695, %v2741_v4  ;;  %v3758_v16 = vmul.f32 -1.442695, %v2784_v6  ;;  %v2743_v17 = vadd.f32 %v2742_v8, %v1027_v0  ;;  %v3353_v4 = vld [vmem:[%s5338_s12 + $0x10] sm:$0xff] (%p4551_p6)  ;;  %v3355_v6 = vld [vmem:[%s5338_s12 + $0x18] sm:$0xff] (%p4551_p6) }
 0x234   : > { %v2786_v18 = vadd.f32 %v2785_v14, %v1035_v1  ;;  %v4411_v9 = vpop.eup %4410  ;;  %v2744_v19 = vpop.f32.mrf.mxu0  ;;  %v3359_v8 = vld [vmem:[%s5338_s12 + $0x28] sm:$0xff] (%p4551_p6)  ;;  %v3361_v14 = vld [vmem:[%s5338_s12 + $0x30] sm:$0xff] (%p4551_p6)  ;;  %3354 = vst [vmem:[%s5423_s25 + $0x10] sm:$0xff] (%p4551_p6), %v3353_v4  ;;  %3356 = vst [vmem:[%s5423_s25 + $0x18] sm:$0xff] (%p4551_p6), %v3355_v6 }
 0x235   : > { %v2787_v10 = vpop.f32.mrf.mxu1  ;;  %v4413_v56 = vpop.eup %4412  ;;  %v3830_v12 = vpack.c.bf16 %v4411_v9, %v4407_v7  ;;  %4422 = vpow2.f32 %v3756_v3  ;;  %v3757_v13 = vmul.f32 -1.442695, %v2743_v17  ;;  %v2745_v21 = vadd.f32 %v2744_v19, %v1023_v61  ;;  %v3357_v7 = vld [vmem:[%s5338_s12 + $0x20] sm:$0xff] (%p4551_p6)  ;;  %3360 = vst [vmem:[%s5423_s25 + $0x28] sm:$0xff] (%p4551_p6), %v3359_v8  ;;  %3362 = vst [vmem:[%s5423_s25 + $0x30] sm:$0xff] (%p4551_p6), %v3361_v14 }
 0x236   : > { %v3759_v20 = vmul.f32 -1.442695, %v2786_v18  ;;  %v3831_v57 = vpack.c.bf16 %v4413_v56, %v4409_v15  ;;  %4424 = vpow2.f32 %v3758_v16  ;;  %v2788_v22 = vadd.f32 %v2787_v10, %v1031_v63  ;;  %v2746_v59 = vpop.f32.mrf.mxu0  ;;  %v4415_v60 = vpop.eup %4414  ;;  %v3363_v15 = vld [vmem:[%s5338_s12 + $0x38] sm:$0xff] (%p4551_p6)  ;;  %v3365_v3 = vld [vmem:[%s5338_s12 + $0x40] sm:$0xff] (%p4551_p6)  ;;  %3358 = vst [vmem:[%s5423_s25 + $0x20] sm:$0xff] (%p4551_p6), %v3357_v7  ;;  %v3367_v16 = vld [vmem:[%s5338_s12 + $0x48] sm:$0xff] (%p4551_p6) }
 0x237   : > { %v2789_v11 = vpop.f32.mrf.mxu1  ;;  %3306 = vst [vmem:[%s5338_s12 + $0x50] sm:$0xff] %v3830_v12  ;;  %4426 = vpow2.f32 %v3757_v13  ;;  %v2747_v62 = vadd.f32 %v2746_v59, %v1027_v0  ;;  %v4417_v58 = vpop.eup %4416  ;;  %v3784_v24 = vmul.f32 -1.442695, %v2745_v21  ;;  %3364 = vst [vmem:[%s5423_s25 + $0x38] sm:$0xff] (%p4551_p6), %v3363_v15  ;;  %v3377_v10 = vld [vmem:[%s5338_s12 + $0x70] sm:$0xff] (%p4551_p6)  ;;  %v3379_v56 = vld [vmem:[%s5338_s12 + $0x78] sm:$0xff] (%p4551_p6) }
 0x238   : > { %v2790_v23 = vadd.f32 %v2789_v11, %v1035_v1  ;;  %3307 = vst [vmem:[%s5338_s12 + $0x58] sm:$0xff] %v3831_v57  ;;  %4428 = vpow2.f32 %v3759_v20  ;;  %v3786_v25 = vmul.f32 -1.442695, %v2788_v22  ;;  %v4419_v26 = vpop.eup %4418  ;;  %3366 = vst [vmem:[%s5423_s25 + $0x40] sm:$0xff] (%p4551_p6), %v3365_v3  ;;  %v3381_v12 = vld [vmem:[%s5338_s12 + $0x80] sm:$0xff] (%p4551_p6)  ;;  %v3383_v13 = vld [vmem:[%s5338_s12 + $0x88] sm:$0xff] (%p4551_p6) }
 0x239   : > { %v3785_v27 = vmul.f32 -1.442695, %v2747_v62  ;;  %v4421_v29 = vpop.eup %4420  ;;  %v3844_v30 = vpack.c.bf16 %v4419_v26, %v4415_v60  ;;  %4430 = vpow2.f32 %v3784_v24  ;;  %3368 = vst [vmem:[%s5423_s25 + $0x48] sm:$0xff] (%p4551_p6), %v3367_v16  ;;  %3378 = vst [vmem:[%s5423_s25 + $0xe0] sm:$0xff] (%p4551_p6), %v3377_v10  ;;  %v3385_v20 = vld [vmem:[%s5338_s12 + $0x90] sm:$0xff] (%p4551_p6)  ;;  %v3387_v57 = vld [vmem:[%s5338_s12 + $0x98] sm:$0xff] (%p4551_p6) }
 0x23a   : > { %v3787_v28 = vmul.f32 -1.442695, %v2790_v23  ;;  %v3845_v31 = vpack.c.bf16 %v4421_v29, %v4417_v58  ;;  %4432 = vpow2.f32 %v3786_v25  ;;  %3380 = vst [vmem:[%s5423_s25 + $0xe8] sm:$0xff] (%p4551_p6), %v3379_v56  ;;  %3382 = vst [vmem:[%s5423_s25 + $0xf0] sm:$0xff] (%p4551_p6), %v3381_v12  ;;  %v3389_v21 = vld [vmem:[%s5338_s12 + $0xa0] sm:$0xff] (%p4551_p6)  ;;  %v3391_v22 = vld [vmem:[%s5338_s12 + $0xa8] sm:$0xff] (%p4551_p6) }
 0x23b   : > { %3320 = vst [vmem:[%s5338_s12 + $0xc0] sm:$0xff] %v3844_v30  ;;  %4434 = vpow2.f32 %v3785_v27  ;;  %3384 = vst [vmem:[%s5423_s25 + $0xf8] sm:$0xff] (%p4551_p6), %v3383_v13  ;;  %v3393_v59 = vld [vmem:[%s5338_s12 + $0xb0] sm:$0xff] (%p4551_p6)  ;;  %v3395_v11 = vld [vmem:[%s5338_s12 + $0xb8] sm:$0xff] (%p4551_p6) }
 0x23c   : > { %3321 = vst [vmem:[%s5338_s12 + $0xc8] sm:$0xff] %v3845_v31  ;;  %4436 = vpow2.f32 %v3787_v28  ;;  %3386 = vst [vmem:[%s5423_s25 + $0x100] sm:$0xff] (%p4551_p6), %v3385_v20 }
 0x23d   : > { %3388 = vst [vmem:[%s5423_s25 + $0x108] sm:$0xff] (%p4551_p6), %v3387_v57  ;;  %3390 = vst [vmem:[%s5423_s25 + $0x110] sm:$0xff] (%p4551_p6), %v3389_v21 }
 0x23e   : > { %v3369_v17 = vld [vmem:[%s5338_s12 + $0x50] sm:$0xff] (%p4551_p6)  ;;  %3392 = vst [vmem:[%s5423_s25 + $0x118] sm:$0xff] (%p4551_p6), %v3391_v22  ;;  %3394 = vst [vmem:[%s5423_s25 + $0x120] sm:$0xff] (%p4551_p6), %v3393_v59 }
 0x23f   : > { %v3371_v18 = vld [vmem:[%s5338_s12 + $0x58] sm:$0xff] (%p4551_p6)  ;;  %3370 = vst [vmem:[%s5423_s25 + $0x50] sm:$0xff] (%p4551_p6), %v3369_v17  ;;  %3396 = vst [vmem:[%s5423_s25 + $0x128] sm:$0xff] (%p4551_p6), %v3395_v11 }
 0x240   : > { %3372 = vst [vmem:[%s5423_s25 + $0x58] sm:$0xff] (%p4551_p6), %v3371_v18 }
 0x242   : > { %v4423_v33 = vpop.eup %4422  ;;  %v3397_v60 = vld [vmem:[%s5338_s12 + $0xc0] sm:$0xff] (%p4551_p6) }
 0x243   : > { %v4425_v34 = vpop.eup %4424  ;;  %v2984_v35 = vadd.f32 1.0, %v4423_v33  ;;  %v3399_v62 = vld [vmem:[%s5338_s12 + $0xc8] sm:$0xff] (%p4551_p6)  ;;  %3398 = vst [vmem:[%s5423_s25 + $0x130] sm:$0xff] (%p4551_p6), %v3397_v60 }
 0x244   : > { %v4427_v36 = vpop.eup %4426  ;;  %v2986_v37 = vadd.f32 1.0, %v4425_v34  ;;  %3400 = vst [vmem:[%s5423_s25 + $0x138] sm:$0xff] (%p4551_p6), %v3399_v62 }
 0x245   : > { %v4429_v38 = vpop.eup %4428  ;;  %4438 = vrcp.f32 %v2984_v35  ;;  %v2985_v39 = vadd.f32 1.0, %v4427_v36 }
 0x246   : > { %4440 = vrcp.f32 %v2986_v37  ;;  %v2987_v40 = vadd.f32 1.0, %v4429_v38  ;;  %v4431_v41 = vpop.eup %4430 }
 0x247   : > { %4442 = vrcp.f32 %v2985_v39  ;;  %v4433_v42 = vpop.eup %4432  ;;  %v3012_v43 = vadd.f32 1.0, %v4431_v41 }
 0x248   : > { %4444 = vrcp.f32 %v2987_v40  ;;  %v4435_v44 = vpop.eup %4434  ;;  %v3014_v45 = vadd.f32 1.0, %v4433_v42 }
 0x249   : > { %v4437_v46 = vpop.eup %4436  ;;  %4446 = vrcp.f32 %v3012_v43  ;;  %v3013_v47 = vadd.f32 1.0, %v4435_v44 }
 0x24a   : > { %4448 = vrcp.f32 %v3014_v45  ;;  %v3015_v48 = vadd.f32 1.0, %v4437_v46 }
 0x24b   : > { %4450 = vrcp.f32 %v3013_v47 }
 0x24c   : > { %4452 = vrcp.f32 %v3015_v48 }
 0x252   : > { %v4439_v49 = vpop.eup %4438 }
 0x253   : > { %v4441_v50 = vpop.eup %4440 }
 0x254   : > { %v4443_v51 = vpop.eup %4442 }
 0x255   : > { %v4445_v52 = vpop.eup %4444  ;;  %v3832_v53 = vpack.c.bf16 %v4443_v51, %v4439_v49 }
 0x256   : > { %v3833_v54 = vpack.c.bf16 %v4445_v52, %v4441_v50  ;;  %v4447_v32 = vpop.eup %4446 }
 0x257   : > { %3308 = vst [vmem:[%s5338_s12 + $0x60] sm:$0xff] %v3832_v53  ;;  %v4449_v55 = vpop.eup %4448 }
 0x258   : > { %3309 = vst [vmem:[%s5338_s12 + $0x68] sm:$0xff] %v3833_v54  ;;  %v4451_v61 = vpop.eup %4450  ;;  %3330 = sbr.rel (!%p4551_p6) target bundleno = 613 (0x265), region = 59 }
 0x259   : > { %v4453_v63 = vpop.eup %4452  ;;  %v3846_v0 = vpack.c.bf16 %v4451_v61, %v4447_v32 }
 0x25a   : > { %v3847_v1 = vpack.c.bf16 %v4453_v63, %v4449_v55 }
 0x25b   : > { %3322 = vst [vmem:[%s5338_s12 + $0xd0] sm:$0xff] %v3846_v0 }
 0x25c   : > { %3323 = vst [vmem:[%s5338_s12 + $0xd8] sm:$0xff] %v3847_v1 }
 0x25e   : > { %v3373_v9 = vld [vmem:[%s5338_s12 + $0x60] sm:$0xff] }
 0x25f   : > { %v3375_v19 = vld [vmem:[%s5338_s12 + $0x68] sm:$0xff]  ;;  %3374 = vst [vmem:[%s5423_s25 + $0x60] sm:$0xff] %v3373_v9 }
 0x260   : > { %3376 = vst [vmem:[%s5423_s25 + $0x68] sm:$0xff] %v3375_v19 }
 0x262   : > { %v3401_v23 = vld [vmem:[%s5338_s12 + $0xd0] sm:$0xff] }
 0x263   : > { %3402 = vst [vmem:[%s5423_s25 + $0x140] sm:$0xff] %v3401_v23  ;;  %v3403_v58 = vld [vmem:[%s5338_s12 + $0xd8] sm:$0xff] }
 0x264   : > { %3404 = vst [vmem:[%s5423_s25 + $0x148] sm:$0xff] %v3403_v58 }
 0x265 PF: > { %s13_s16 = sadd.s32 1, %s4493_s16   ;;  %s5495_s12 = smov %s4481_s13 }
 0x266   : > { %p10_p12 = scmp.ge.s32.totalorder %s13_s16, 4   ;;  %s5496_s13 = smov %s4556_s22 }
 0x267   : > { %s5497_s14 = smov %s4489_s15  ;;  %s5498_s15 = smov %s5500_s17 }
 0x268   :  { %12 = sbr.rel (!%p10_p12) target bundleno = 3 (0x3), region = 119 }

// kernel: sequential_autoencoder.2
= control target key start
LH: loop header
LB: loop body
LE: loop exit
PB: predicated region body
PF: predicated region fallthrough
CT: control target
= control target key end

     0   :  { %8 = vsyncpa [#allocation3], 0  ;;  %s7033_s0 = inlined_call_operand.vmem [shape: f32[16,7056], index: 0, kind: input, shape index: {}]   ;;  %s7034_s1 = inlined_call_operand.hbm [shape: bf16[7056,128], index: 1, kind: input, shape index: {}]   ;;  %s7035_s2 = inlined_call_operand.hbm [shape: f32[1,128], index: 2, kind: input, shape index: {}]   ;;  %s7036_s3 = inlined_call_operand.vmem [shape: bf16[16,128], index: 3, kind: output, shape index: {}]  }
   0x1   :  { %9 = vsyncpa [#allocation5], 0  ;;  %s6450_s12 = smov [#allocation2]  }
   0x2   :  { %s17_s13 = sshll.u32 %s6450_s12, 4  ;;  %s18_s13 = int_to_ptr.vmem [resolvable:$true] %s17_s13 }
   0x3   :  { %s6414_s14 = scalar_lea.vmem %s18_s13, 56448  ;;  %p6419_p1 = scmp.lt.s32.totalorder %s18_s13, %s18_s13 }
   0x4   :  { %p6415_p0 = scmp.ne.s32.totalorder %s18_s13, %s6414_s14  ;;  %p6420_p2 = scmp.lt.s32.totalorder %s6414_s14, %s6414_s14 }
   0x6   :  { %p6421_p3 = por %p6420_p2, %p6419_p1 }
   0x8   :  { %p6422_p4 = pnand %p6421_p3, %p6415_p0 }
   0xa   :  { %6425 = shalt.err (!%p6422_p4)
}
   0xb   :  { %s6451_s15 = smov 64   ;;  %s6452_s16 = smov 4  }
   0xc   :  { %23 = dma.hbm_to_vmem [thread:$0]  %s7034_s1, 56448, %s18_s13, [#allocation3], %s6451_s15, %s6451_s15, %s6452_s16  }
   0xd   :  { %s6453_s19 = smov [#allocation4]  }
   0xe   :  { %s30_s20 = sshll.u32 %s6453_s19, 4  ;;  %s31_s20 = int_to_ptr.vmem [resolvable:$true] %s30_s20 }
   0xf   :  { %s6434_s21 = scalar_lea.vmem %s31_s20, 16  ;;  %s6438_s22 = scalar_lea.vmem %s31_s20, 32 }
  0x10   :  { %p6435_p5 = scmp.ne.s32.totalorder %s31_s20, %s6434_s21  ;;  %p6439_p6 = scmp.lt.s32.totalorder %s31_s20, %s31_s20 }
  0x11   :  { %p6440_p7 = scmp.lt.s32.totalorder %s6438_s22, %s6434_s21 }
  0x13   :  { %p6441_p8 = por %p6440_p7, %p6439_p6 }
  0x15   :  { %p6442_p9 = pnand %p6441_p8, %p6435_p5 }
  0x17   :  { %6445 = shalt.err (!%p6442_p9)
}
  0x18   :  { %33 = dma.hbm_to_vmem [thread:$0]  %s7035_s2, 16, %s31_s20, [#allocation5]  }
  0x19   :  { %6446 = dma.done.wait [#allocation3], 56448  }
  0x1a   :  { %6447 = vsyncadd [#allocation3], 4294910848 }
  0x1b   :  { %6448 = dma.done.wait [#allocation5], 16  }
  0x1c   :  { %6449 = vsyncadd [#allocation5], 4294967280  ;;  %v5965_v0 = vld [vmem:[#allocation2 + $0x78] sm:$0xff]   ;;  %v5969_v4 = vld [vmem:[#allocation2 + $0x70] sm:$0xff]   ;;  %vm3744_vm0 = vcmask 130048  }
  0x1d   :  { %v5966_v1 = vld [vmem:[#allocation2 + $0xf8] sm:$0xff]   ;;  %5366 = vmatprep.subr.bf16.mxu0 %v5965_v0  ;;  %v5970_v5 = vld [vmem:[#allocation2 + $0xf0] sm:$0xff]   ;;  %v5973_v8 = vld [vmem:[#allocation2 + $0x68] sm:$0xff]  }
  0x1e   :  { %v5967_v2 = vld [vmem:[#allocation2 + $0x38] sm:$0xff]   ;;  %5388 = vmatprep.subr.bf16.mxu1 %v5966_v1  ;;  %v5971_v6 = vld [vmem:[#allocation2 + $0x30] sm:$0xff]   ;;  %v5974_v9 = vld [vmem:[#allocation2 + $0xe8] sm:$0xff]  }
  0x1f   :  { %v5968_v3 = vld [vmem:[#allocation2 + $0xb8] sm:$0xff]   ;;  %5367 = vmatpush3.bf16.msra.mxu0 %v5967_v2  ;;  %v5972_v7 = vld [vmem:[#allocation2 + $0xb0] sm:$0xff]   ;;  %v5975_v10 = vld [vmem:[#allocation2 + $0x28] sm:$0xff]  }
  0x20   :  { %5389 = vmatpush3.bf16.msra.mxu1 %v5968_v3  ;;  %5368 = vmatprep.subr.bf16.mxu0 %v5969_v4  ;;  %v5976_v11 = vld [vmem:[#allocation2 + $0xa8] sm:$0xff]   ;;  %v5977_v12 = vld [vmem:[#allocation2 + $0x60] sm:$0xff]   ;;  %v5981_v16 = vld [vmem:[#allocation2 + $0x58] sm:$0xff]  }
  0x21   :  { %5390 = vmatprep.subr.bf16.mxu1 %v5970_v5  ;;  %v5978_v13 = vld [vmem:[#allocation2 + $0xe0] sm:$0xff]   ;;  %v5982_v17 = vld [vmem:[#allocation2 + $0xd8] sm:$0xff]   ;;  %v5985_v20 = vld [vmem:[#allocation2 + $0x50] sm:$0xff]  }
  0x22   :  { %v5979_v14 = vld [vmem:[#allocation2 + $0x20] sm:$0xff]   ;;  %v5983_v18 = vld [vmem:[#allocation2 + $0x18] sm:$0xff]   ;;  %v5986_v21 = vld [vmem:[#allocation2 + $0xd0] sm:$0xff]  }
  0x23   :  { %5369 = vmatpush3.bf16.msra.mxu0 %v5971_v6  ;;  %v5980_v15 = vld [vmem:[#allocation2 + $0xa0] sm:$0xff]   ;;  %v5984_v19 = vld [vmem:[#allocation2 + $0x98] sm:$0xff]   ;;  %v5987_v22 = vld [vmem:[#allocation2 + $0x10] sm:$0xff]  }
  0x24   :  { %5391 = vmatpush3.bf16.msra.mxu1 %v5972_v7  ;;  %5370 = vmatprep.subr.bf16.mxu0 %v5973_v8  ;;  %v5988_v23 = vld [vmem:[#allocation2 + $0x90] sm:$0xff]   ;;  %v5989_v24 = vld [vmem:[#allocation2 + $0x48] sm:$0xff]   ;;  %v5993_v28 = vld [vmem:[#allocation2 + $0x40] sm:$0xff]  }
  0x25   :  { %5392 = vmatprep.subr.bf16.mxu1 %v5974_v9  ;;  %v5990_v25 = vld [vmem:[#allocation2 + $0xc8] sm:$0xff]   ;;  %v5994_v29 = vld [vmem:[#allocation2 + $0xc0] sm:$0xff]   ;;  %v44_v34 = vld [vmem:[%s7033_s0 + $0x18] sm:$0xff] }
  0x26   :  { %v5991_v26 = vld [vmem:[#allocation2 + $0x8] sm:$0xff]   ;;  %v5995_v30 = vld [vmem:[#allocation2] sm:$0xff]   ;;  %v100_v36 = vld [vmem:[%s7033_s0 + $0x1d8] sm:$0xff] }
  0x27   :  { %5371 = vmatpush3.bf16.msra.mxu0 %v5975_v10  ;;  %v5992_v27 = vld [vmem:[#allocation2 + $0x88] sm:$0xff]   ;;  %v5996_v31 = vld [vmem:[#allocation2 + $0x80] sm:$0xff]   ;;  %v156_v39 = vpack.c.bf16 %v100_v36, %v44_v34  ;;  %v43_v41 = vld [vmem:[%s7033_s0 + $0x10] sm:$0xff] }
  0x28   :  { %5393 = vmatpush3.bf16.msra.mxu1 %v5976_v11  ;;  %5372 = vmatprep.subr.bf16.mxu0 %v5977_v12  ;;  %v42_v32 = vld [vmem:[%s7033_s0 + $0x8] sm:$0xff]  ;;  %v41_v37 = vld [vmem:[%s7033_s0] sm:$0xff]  ;;  %v99_v42 = vld [vmem:[%s7033_s0 + $0x1d0] sm:$0xff] }
  0x29   :  { %5394 = vmatprep.subr.bf16.mxu1 %v5978_v13  ;;  %v98_v33 = vld [vmem:[%s7033_s0 + $0x1c8] sm:$0xff]  ;;  %v97_v38 = vld [vmem:[%s7033_s0 + $0x1c0] sm:$0xff]  ;;  %v155_v43 = vpack.c.bf16 %v99_v42, %v43_v41  ;;  %v5997_v44 = vld [vmem:[#allocation2 + $0x178] sm:$0xff]   ;;  %3821 = vmatprep.mubr.bf16.mxu1 %v156_v39 }
  0x2a   :  { %v154_v35 = vpack.c.bf16 %v98_v33, %v42_v32  ;;  %v153_v40 = vpack.c.bf16 %v97_v38, %v41_v37  ;;  %v5998_v45 = vld [vmem:[#allocation2 + $0x1f8] sm:$0xff]   ;;  %v6001_v48 = vld [vmem:[#allocation2 + $0x170] sm:$0xff]   ;;  %v6005_v52 = vld [vmem:[#allocation2 + $0x168] sm:$0xff]  }
  0x2b   :  { %5373 = vmatpush3.bf16.msra.mxu0 %v5979_v14  ;;  %v5999_v46 = vld [vmem:[#allocation2 + $0x138] sm:$0xff]   ;;  %v6002_v49 = vld [vmem:[#allocation2 + $0x1f0] sm:$0xff]   ;;  %v6006_v53 = vld [vmem:[#allocation2 + $0x1e8] sm:$0xff]  }
  0x2c   :  { %5395 = vmatpush3.bf16.msra.mxu1 %v5980_v15  ;;  %5374 = vmatprep.subr.bf16.mxu0 %v5981_v16  ;;  %v6000_v47 = vld [vmem:[#allocation2 + $0x1b8] sm:$0xff]   ;;  %v6003_v50 = vld [vmem:[#allocation2 + $0x130] sm:$0xff]   ;;  %v6007_v54 = vld [vmem:[#allocation2 + $0x128] sm:$0xff]  }
  0x2d   :  { %5396 = vmatprep.subr.bf16.mxu1 %v5982_v17  ;;  %3780 = vmatprep.mubr.bf16.mxu0 %v154_v35  ;;  %v6004_v51 = vld [vmem:[#allocation2 + $0x1b0] sm:$0xff]   ;;  %v6008_v55 = vld [vmem:[#allocation2 + $0x1a8] sm:$0xff]   ;;  %v6009_v56 = vld [vmem:[#allocation2 + $0x160] sm:$0xff]  }
  0x2e   :  { %v6010_v57 = vld [vmem:[#allocation2 + $0x1e0] sm:$0xff]   ;;  %v6013_v60 = vld [vmem:[#allocation2 + $0x158] sm:$0xff]   ;;  %v6017_v0 = vld [vmem:[#allocation2 + $0x150] sm:$0xff]  }
  0x2f   :  { %5375 = vmatpush3.bf16.msra.mxu0 %v5983_v18  ;;  %v6011_v58 = vld [vmem:[#allocation2 + $0x120] sm:$0xff]   ;;  %v6014_v61 = vld [vmem:[#allocation2 + $0x1d8] sm:$0xff]   ;;  %v6018_v1 = vld [vmem:[#allocation2 + $0x1d0] sm:$0xff]  }
  0x30   :  { %5397 = vmatpush3.bf16.msra.mxu1 %v5984_v19  ;;  %5376 = vmatprep.subr.bf16.mxu0 %v5985_v20  ;;  %v6012_v59 = vld [vmem:[#allocation2 + $0x1a0] sm:$0xff]   ;;  %v6015_v62 = vld [vmem:[#allocation2 + $0x118] sm:$0xff]   ;;  %v6019_v2 = vld [vmem:[#allocation2 + $0x110] sm:$0xff]  }
  0x31   :  { %5398 = vmatprep.subr.bf16.mxu1 %v5986_v21  ;;  %v6016_v63 = vld [vmem:[#allocation2 + $0x198] sm:$0xff]   ;;  %v6020_v3 = vld [vmem:[#allocation2 + $0x190] sm:$0xff]   ;;  %v6021_v4 = vld [vmem:[#allocation2 + $0x148] sm:$0xff]  }
  0x32   :  { %v6022_v5 = vld [vmem:[#allocation2 + $0x1c8] sm:$0xff]   ;;  %v6025_v8 = vld [vmem:[#allocation2 + $0x140] sm:$0xff]   ;;  %v48_v14 = vld [vmem:[%s7033_s0 + $0x38] sm:$0xff] }
  0x33   :  { %5377 = vmatpush3.bf16.msra.mxu0 %v5987_v22  ;;  %v6023_v6 = vld [vmem:[#allocation2 + $0x108] sm:$0xff]   ;;  %v6026_v9 = vld [vmem:[#allocation2 + $0x1c0] sm:$0xff]   ;;  %v104_v15 = vld [vmem:[%s7033_s0 + $0x1f8] sm:$0xff] }
  0x34   :  { %5399 = vmatpush3.bf16.msra.mxu1 %v5988_v23  ;;  %5378 = vmatprep.subr.bf16.mxu0 %v5989_v24  ;;  %v6024_v7 = vld [vmem:[#allocation2 + $0x188] sm:$0xff]   ;;  %v6027_v10 = vld [vmem:[#allocation2 + $0x100] sm:$0xff]   ;;  %v160_v17 = vpack.c.bf16 %v104_v15, %v48_v14  ;;  %v47_v20 = vld [vmem:[%s7033_s0 + $0x30] sm:$0xff] }
  0x35   :  { %5400 = vmatprep.subr.bf16.mxu1 %v5990_v25  ;;  %v6028_v11 = vld [vmem:[#allocation2 + $0x180] sm:$0xff]   ;;  %v46_v12 = vld [vmem:[%s7033_s0 + $0x28] sm:$0xff]  ;;  %v103_v22 = vld [vmem:[%s7033_s0 + $0x1f0] sm:$0xff] }
  0x36   :  { %v102_v13 = vld [vmem:[%s7033_s0 + $0x1e8] sm:$0xff]  ;;  %v45_v18 = vld [vmem:[%s7033_s0 + $0x20] sm:$0xff]  ;;  %v159_v23 = vpack.c.bf16 %v103_v22, %v47_v20  ;;  %v6029_v24 = vld [vmem:[#allocation2 + $0x278] sm:$0xff]  }
  0x37   :  { %5379 = vmatpush3.bf16.msra.mxu0 %v5991_v26  ;;  %v158_v16 = vpack.c.bf16 %v102_v13, %v46_v12  ;;  %v101_v19 = vld [vmem:[%s7033_s0 + $0x1e0] sm:$0xff]  ;;  %v6030_v25 = vld [vmem:[#allocation2 + $0x2f8] sm:$0xff]   ;;  %v6037_v32 = vld [vmem:[#allocation2 + $0x268] sm:$0xff]  }
  0x38   :  { %5401 = vmatpush3.bf16.msra.mxu1 %v5992_v27  ;;  %5380 = vmatprep.subr.bf16.mxu0 %v5993_v28  ;;  %v157_v21 = vpack.c.bf16 %v101_v19, %v45_v18  ;;  %v6031_v26 = vld [vmem:[#allocation2 + $0x238] sm:$0xff]   ;;  %v6033_v28 = vld [vmem:[#allocation2 + $0x270] sm:$0xff]   ;;  %v6038_v33 = vld [vmem:[#allocation2 + $0x2e8] sm:$0xff]  }
  0x39   :  { %5402 = vmatprep.subr.bf16.mxu1 %v5994_v29  ;;  %v6032_v27 = vld [vmem:[#allocation2 + $0x2b8] sm:$0xff]   ;;  %v6034_v29 = vld [vmem:[#allocation2 + $0x2f0] sm:$0xff]   ;;  %v6039_v34 = vld [vmem:[#allocation2 + $0x228] sm:$0xff]  }
  0x3a   :  { %v6040_v35 = vld [vmem:[#allocation2 + $0x2a8] sm:$0xff]   ;;  %v6041_v36 = vld [vmem:[#allocation2 + $0x260] sm:$0xff]   ;;  %v6046_v41 = vld [vmem:[#allocation2 + $0x2d8] sm:$0xff]  }
  0x3b   :  { %5381 = vmatpush3.bf16.msra.mxu0 %v5995_v30  ;;  %v6035_v30 = vld [vmem:[#allocation2 + $0x230] sm:$0xff]   ;;  %v6042_v37 = vld [vmem:[#allocation2 + $0x2e0] sm:$0xff]   ;;  %v6047_v42 = vld [vmem:[#allocation2 + $0x218] sm:$0xff]  }
  0x3c   :  { %5403 = vmatpush3.bf16.msra.mxu1 %v5996_v31  ;;  %5410 = vmatprep.subr.bf16.mxu0 %v5997_v44  ;;  %v6036_v31 = vld [vmem:[#allocation2 + $0x2b0] sm:$0xff]   ;;  %v6043_v38 = vld [vmem:[#allocation2 + $0x220] sm:$0xff]   ;;  %v6069_v12 = vld [vmem:[#allocation2 + $0x368] sm:$0xff]  }
  0x3d   :  { %5432 = vmatprep.subr.bf16.mxu1 %v5998_v45  ;;  %v6044_v39 = vld [vmem:[#allocation2 + $0x2a0] sm:$0xff]   ;;  %v6049_v44 = vld [vmem:[#allocation2 + $0x250] sm:$0xff]   ;;  %v6070_v13 = vld [vmem:[#allocation2 + $0x3e8] sm:$0xff]  }
  0x3e   :  { %3781 = vmatmul.mubr.bf16.vlgmr.msra.gmra.mxu0 %v153_v40  ;;  %v6045_v40 = vld [vmem:[#allocation2 + $0x258] sm:$0xff]   ;;  %v6050_v45 = vld [vmem:[#allocation2 + $0x2d0] sm:$0xff]   ;;  %v6071_v14 = vld [vmem:[#allocation2 + $0x328] sm:$0xff]  }
  0x3f   :  { %3822 = vmatmul.mubr.bf16.vlgmr.msra.gmra.mxu1 %v155_v43  ;;  %5411 = vmatpush3.bf16.msra.mxu0 %v5999_v46  ;;  %v6048_v43 = vld [vmem:[#allocation2 + $0x298] sm:$0xff]   ;;  %v6051_v46 = vld [vmem:[#allocation2 + $0x210] sm:$0xff]   ;;  %v6072_v15 = vld [vmem:[#allocation2 + $0x3a8] sm:$0xff]  }
  0x40   :  { %5433 = vmatpush3.bf16.msra.mxu1 %v6000_v47  ;;  %5412 = vmatprep.subr.bf16.mxu0 %v6001_v48  ;;  %v6052_v47 = vld [vmem:[#allocation2 + $0x290] sm:$0xff]   ;;  %v6053_v48 = vld [vmem:[#allocation2 + $0x248] sm:$0xff]   ;;  %v6075_v18 = vld [vmem:[#allocation2 + $0x320] sm:$0xff]  }
  0x41   :  { %5434 = vmatprep.subr.bf16.mxu1 %v6002_v49  ;;  %3862 = vmatprep.mubr.bf16.mxu0 %v158_v16  ;;  %v6054_v49 = vld [vmem:[#allocation2 + $0x2c8] sm:$0xff]   ;;  %v6073_v16 = vld [vmem:[#allocation2 + $0x360] sm:$0xff]   ;;  %v6077_v20 = vld [vmem:[#allocation2 + $0x358] sm:$0xff]  }
  0x42   :  { %3903 = vmatprep.mubr.bf16.mxu1 %v160_v17  ;;  %v6074_v17 = vld [vmem:[#allocation2 + $0x3e0] sm:$0xff]   ;;  %v6079_v22 = vld [vmem:[#allocation2 + $0x318] sm:$0xff]  }
  0x43   :  { %5413 = vmatpush3.bf16.msra.mxu0 %v6003_v50  ;;  %v6055_v50 = vld [vmem:[#allocation2 + $0x208] sm:$0xff]   ;;  %v6076_v19 = vld [vmem:[#allocation2 + $0x3a0] sm:$0xff]  }
  0x44   :  { %5435 = vmatpush3.bf16.msra.mxu1 %v6004_v51  ;;  %5414 = vmatprep.subr.bf16.mxu0 %v6005_v52  ;;  %v6056_v51 = vld [vmem:[#allocation2 + $0x288] sm:$0xff]   ;;  %v6057_v52 = vld [vmem:[#allocation2 + $0x240] sm:$0xff]  }
  0x45   :  { %5436 = vmatprep.subr.bf16.mxu1 %v6006_v53  ;;  %v6058_v53 = vld [vmem:[#allocation2 + $0x2c0] sm:$0xff]  }
  0x47   :  { %5415 = vmatpush3.bf16.msra.mxu0 %v6007_v54  ;;  %v6059_v54 = vld [vmem:[#allocation2 + $0x200] sm:$0xff]  }
  0x48   :  { %5437 = vmatpush3.bf16.msra.mxu1 %v6008_v55  ;;  %5416 = vmatprep.subr.bf16.mxu0 %v6009_v56  ;;  %v6060_v55 = vld [vmem:[#allocation2 + $0x280] sm:$0xff]   ;;  %v50_v56 = vld [vmem:[%s7033_s0 + $0x48] sm:$0xff] }
  0x49   :  { %5438 = vmatprep.subr.bf16.mxu1 %v6010_v57  ;;  %v106_v57 = vld [vmem:[%s7033_s0 + $0x208] sm:$0xff] }
  0x4b   :  { %5417 = vmatpush3.bf16.msra.mxu0 %v6011_v58  ;;  %v162_v58 = vpack.c.bf16 %v106_v57, %v50_v56  ;;  %v6101_v56 = vld [vmem:[#allocation2 + $0x468] sm:$0xff]  }
  0x4c   :  { %5439 = vmatpush3.bf16.msra.mxu1 %v6012_v59  ;;  %5418 = vmatprep.subr.bf16.mxu0 %v6013_v60  ;;  %v52_v59 = vld [vmem:[%s7033_s0 + $0x58] sm:$0xff]  ;;  %v6102_v57 = vld [vmem:[#allocation2 + $0x4e8] sm:$0xff]  }
  0x4d   :  { %5440 = vmatprep.subr.bf16.mxu1 %v6014_v61  ;;  %v108_v60 = vld [vmem:[%s7033_s0 + $0x218] sm:$0xff]  ;;  %v49_v61 = vld [vmem:[%s7033_s0 + $0x40] sm:$0xff] }
  0x4f   :  { %5419 = vmatpush3.bf16.msra.mxu0 %v6015_v62  ;;  %v164_v62 = vpack.c.bf16 %v108_v60, %v52_v59  ;;  %v6104_v59 = vld [vmem:[#allocation2 + $0x4a8] sm:$0xff]   ;;  %v6105_v60 = vld [vmem:[#allocation2 + $0x460] sm:$0xff]  }
  0x50   :  { %5441 = vmatpush3.bf16.msra.mxu1 %v6016_v63  ;;  %5420 = vmatprep.subr.bf16.mxu0 %v6017_v0  ;;  %v105_v63 = vld [vmem:[%s7033_s0 + $0x200] sm:$0xff]  ;;  %v51_v0 = vld [vmem:[%s7033_s0 + $0x50] sm:$0xff] }
  0x51   :  { %5442 = vmatprep.subr.bf16.mxu1 %v6018_v1  ;;  %v107_v1 = vld [vmem:[%s7033_s0 + $0x210] sm:$0xff] }
  0x53   :  { %5421 = vmatpush3.bf16.msra.mxu0 %v6019_v2  ;;  %v161_v2 = vpack.c.bf16 %v105_v63, %v49_v61  ;;  %v6106_v61 = vld [vmem:[#allocation2 + $0x4e0] sm:$0xff]  }
  0x54   :  { %5443 = vmatpush3.bf16.msra.mxu1 %v6020_v3  ;;  %5422 = vmatprep.subr.bf16.mxu0 %v6021_v4  ;;  %v163_v3 = vpack.c.bf16 %v107_v1, %v51_v0  ;;  %v6061_v4 = vld [vmem:[#allocation2 + $0x378] sm:$0xff]   ;;  %v6108_v63 = vld [vmem:[#allocation2 + $0x4a0] sm:$0xff]  }
  0x55   :  { %5444 = vmatprep.subr.bf16.mxu1 %v6022_v5  ;;  %v6062_v5 = vld [vmem:[#allocation2 + $0x3f8] sm:$0xff]  }
  0x56   :  { %v6109_v0 = vld [vmem:[#allocation2 + $0x458] sm:$0xff]  }
  0x57   :  { %5423 = vmatpush3.bf16.msra.mxu0 %v6023_v6  ;;  %v6063_v6 = vld [vmem:[#allocation2 + $0x338] sm:$0xff]  }
  0x58   :  { %5445 = vmatpush3.bf16.msra.mxu1 %v6024_v7  ;;  %5424 = vmatprep.subr.bf16.mxu0 %v6025_v8  ;;  %v6064_v7 = vld [vmem:[#allocation2 + $0x3b8] sm:$0xff]   ;;  %v6065_v8 = vld [vmem:[#allocation2 + $0x370] sm:$0xff]  }
  0x59   :  { %5446 = vmatprep.subr.bf16.mxu1 %v6026_v9  ;;  %v6066_v9 = vld [vmem:[#allocation2 + $0x3f0] sm:$0xff]   ;;  %v6110_v1 = vld [vmem:[#allocation2 + $0x4d8] sm:$0xff]  }
  0x5b   :  { %5425 = vmatpush3.bf16.msra.mxu0 %v6027_v10  ;;  %v6067_v10 = vld [vmem:[#allocation2 + $0x330] sm:$0xff]  }
  0x5c   :  { %5447 = vmatpush3.bf16.msra.mxu1 %v6028_v11  ;;  %5454 = vmatprep.subr.bf16.mxu0 %v6029_v24  ;;  %v6068_v11 = vld [vmem:[#allocation2 + $0x3b0] sm:$0xff]  }
  0x5d   :  { %5476 = vmatprep.subr.bf16.mxu1 %v6030_v25  ;;  %v6081_v24 = vld [vmem:[#allocation2 + $0x350] sm:$0xff]  }
  0x5e   :  { %3863 = vmatmul.mubr.bf16.vlgmr.msra.gmra.mxu0 %v157_v21  ;;  %v6078_v21 = vld [vmem:[#allocation2 + $0x3d8] sm:$0xff]   ;;  %v6082_v25 = vld [vmem:[#allocation2 + $0x3d0] sm:$0xff]  }
  0x5f   :  { %3904 = vmatmul.mubr.bf16.vlgmr.msra.gmra.mxu1 %v159_v23  ;;  %5455 = vmatpush3.bf16.msra.mxu0 %v6031_v26  ;;  %v6080_v23 = vld [vmem:[#allocation2 + $0x398] sm:$0xff]   ;;  %v6083_v26 = vld [vmem:[#allocation2 + $0x310] sm:$0xff]  }
  0x60   :  { %5477 = vmatpush3.bf16.msra.mxu1 %v6032_v27  ;;  %5456 = vmatprep.subr.bf16.mxu0 %v6033_v28  ;;  %v6084_v27 = vld [vmem:[#allocation2 + $0x390] sm:$0xff]   ;;  %v6085_v28 = vld [vmem:[#allocation2 + $0x348] sm:$0xff]  }
  0x61   :  { %5478 = vmatprep.subr.bf16.mxu1 %v6034_v29  ;;  %3944 = vmatprep.mubr.bf16.mxu0 %v162_v58  ;;  %v6086_v29 = vld [vmem:[#allocation2 + $0x3c8] sm:$0xff]  }
  0x62   :  { %3985 = vmatprep.mubr.bf16.mxu1 %v164_v62  ;;  %v6103_v58 = vld [vmem:[#allocation2 + $0x428] sm:$0xff]   ;;  %v6107_v62 = vld [vmem:[#allocation2 + $0x420] sm:$0xff]  }
  0x63   :  { %5457 = vmatpush3.bf16.msra.mxu0 %v6035_v30  ;;  %v6087_v30 = vld [vmem:[#allocation2 + $0x308] sm:$0xff]  }
  0x64   :  { %5479 = vmatpush3.bf16.msra.mxu1 %v6036_v31  ;;  %5458 = vmatprep.subr.bf16.mxu0 %v6037_v32  ;;  %v6088_v31 = vld [vmem:[#allocation2 + $0x388] sm:$0xff]   ;;  %v6089_v32 = vld [vmem:[#allocation2 + $0x340] sm:$0xff]  }
  0x65   :  { %5480 = vmatprep.subr.bf16.mxu1 %v6038_v33  ;;  %v6090_v33 = vld [vmem:[#allocation2 + $0x3c0] sm:$0xff]  }
  0x67   :  { %5459 = vmatpush3.bf16.msra.mxu0 %v6039_v34  ;;  %v6091_v34 = vld [vmem:[#allocation2 + $0x300] sm:$0xff]  }
  0x68   :  { %5481 = vmatpush3.bf16.msra.mxu1 %v6040_v35  ;;  %5460 = vmatprep.subr.bf16.mxu0 %v6041_v36  ;;  %v6092_v35 = vld [vmem:[#allocation2 + $0x380] sm:$0xff]   ;;  %v54_v36 = vld [vmem:[%s7033_s0 + $0x68] sm:$0xff] }
  0x69   :  { %5482 = vmatprep.subr.bf16.mxu1 %v6042_v37  ;;  %v110_v37 = vld [vmem:[%s7033_s0 + $0x228] sm:$0xff] }
  0x6b   :  { %5461 = vmatpush3.bf16.msra.mxu0 %v6043_v38  ;;  %v56_v38 = vld [vmem:[%s7033_s0 + $0x78] sm:$0xff] }
  0x6c   :  { %5483 = vmatpush3.bf16.msra.mxu1 %v6044_v39  ;;  %5462 = vmatprep.subr.bf16.mxu0 %v6045_v40  ;;  %v166_v39 = vpack.c.bf16 %v110_v37, %v54_v36  ;;  %v112_v40 = vld [vmem:[%s7033_s0 + $0x238] sm:$0xff]  ;;  %v6133_v36 = vld [vmem:[#allocation2 + $0x568] sm:$0xff]  }
  0x6d   :  { %5484 = vmatprep.subr.bf16.mxu1 %v6046_v41  ;;  %v53_v41 = vld [vmem:[%s7033_s0 + $0x60] sm:$0xff]  ;;  %v6134_v37 = vld [vmem:[#allocation2 + $0x5e8] sm:$0xff]  }
  0x6f   :  { %5463 = vmatpush3.bf16.msra.mxu0 %v6047_v42  ;;  %v109_v42 = vld [vmem:[%s7033_s0 + $0x220] sm:$0xff] }
  0x70   :  { %5485 = vmatpush3.bf16.msra.mxu1 %v6048_v43  ;;  %5464 = vmatprep.subr.bf16.mxu0 %v6049_v44  ;;  %v168_v43 = vpack.c.bf16 %v112_v40, %v56_v38  ;;  %v165_v44 = vpack.c.bf16 %v109_v42, %v53_v41  ;;  %v6135_v38 = vld [vmem:[#allocation2 + $0x528] sm:$0xff]   ;;  %v6137_v40 = vld [vmem:[#allocation2 + $0x560] sm:$0xff]  }
  0x71   :  { %5486 = vmatprep.subr.bf16.mxu1 %v6050_v45  ;;  %v55_v45 = vld [vmem:[%s7033_s0 + $0x70] sm:$0xff]  ;;  %v6138_v41 = vld [vmem:[#allocation2 + $0x5e0] sm:$0xff]  }
  0x72   :  { %v6139_v42 = vld [vmem:[#allocation2 + $0x520] sm:$0xff]  }
  0x73   :  { %5465 = vmatpush3.bf16.msra.mxu0 %v6051_v46  ;;  %v111_v46 = vld [vmem:[%s7033_s0 + $0x230] sm:$0xff] }
  0x74   :  { %5487 = vmatpush3.bf16.msra.mxu1 %v6052_v47  ;;  %5466 = vmatprep.subr.bf16.mxu0 %v6053_v48  ;;  %v167_v47 = vpack.c.bf16 %v111_v46, %v55_v45  ;;  %v6093_v48 = vld [vmem:[#allocation2 + $0x478] sm:$0xff]  }
  0x75   :  { %5488 = vmatprep.subr.bf16.mxu1 %v6054_v49  ;;  %v6094_v49 = vld [vmem:[#allocation2 + $0x4f8] sm:$0xff]  }
  0x76   :  { %v6142_v45 = vld [vmem:[#allocation2 + $0x5d8] sm:$0xff]  }
  0x77   :  { %5467 = vmatpush3.bf16.msra.mxu0 %v6055_v50  ;;  %v6095_v50 = vld [vmem:[#allocation2 + $0x438] sm:$0xff]  }
  0x78   :  { %5489 = vmatpush3.bf16.msra.mxu1 %v6056_v51  ;;  %5468 = vmatprep.subr.bf16.mxu0 %v6057_v52  ;;  %v6096_v51 = vld [vmem:[#allocation2 + $0x4b8] sm:$0xff]   ;;  %v6097_v52 = vld [vmem:[#allocation2 + $0x470] sm:$0xff]  }
  0x79   :  { %5490 = vmatprep.subr.bf16.mxu1 %v6058_v53  ;;  %v6098_v53 = vld [vmem:[#allocation2 + $0x4f0] sm:$0xff]   ;;  %v6143_v46 = vld [vmem:[#allocation2 + $0x518] sm:$0xff]  }
  0x7b   :  { %5469 = vmatpush3.bf16.msra.mxu0 %v6059_v54  ;;  %v6099_v54 = vld [vmem:[#allocation2 + $0x430] sm:$0xff]  }
  0x7c   :  { %5491 = vmatpush3.bf16.msra.mxu1 %v6060_v55  ;;  %5498 = vmatprep.subr.bf16.mxu0 %v6061_v4  ;;  %v6100_v55 = vld [vmem:[#allocation2 + $0x4b0] sm:$0xff]  }
  0x7d   :  { %5520 = vmatprep.subr.bf16.mxu1 %v6062_v5  ;;  %v6113_v4 = vld [vmem:[#allocation2 + $0x450] sm:$0xff]  }
  0x7e   :  { %3945 = vmatmul.mubr.bf16.vlgmr.msra.gmra.mxu0 %v161_v2  ;;  %v6111_v2 = vld [vmem:[#allocation2 + $0x418] sm:$0xff]   ;;  %v6114_v5 = vld [vmem:[#allocation2 + $0x4d0] sm:$0xff]  }
  0x7f   :  { %3986 = vmatmul.mubr.bf16.vlgmr.msra.gmra.mxu1 %v163_v3  ;;  %5499 = vmatpush3.bf16.msra.mxu0 %v6063_v6  ;;  %v6112_v3 = vld [vmem:[#allocation2 + $0x498] sm:$0xff]   ;;  %v6115_v6 = vld [vmem:[#allocation2 + $0x410] sm:$0xff]  }
  0x80   :  { %5521 = vmatpush3.bf16.msra.mxu1 %v6064_v7  ;;  %5500 = vmatprep.subr.bf16.mxu0 %v6065_v8  ;;  %v6116_v7 = vld [vmem:[#allocation2 + $0x490] sm:$0xff]   ;;  %v6117_v8 = vld [vmem:[#allocation2 + $0x448] sm:$0xff]  }
  0x81   :  { %5522 = vmatprep.subr.bf16.mxu1 %v6066_v9  ;;  %4026 = vmatprep.mubr.bf16.mxu0 %v166_v39  ;;  %v6118_v9 = vld [vmem:[#allocation2 + $0x4c8] sm:$0xff]  }
  0x82   :  { %4067 = vmatprep.mubr.bf16.mxu1 %v168_v43  ;;  %v6136_v39 = vld [vmem:[#allocation2 + $0x5a8] sm:$0xff]   ;;  %v6140_v43 = vld [vmem:[#allocation2 + $0x5a0] sm:$0xff]  }
  0x83   :  { %5501 = vmatpush3.bf16.msra.mxu0 %v6067_v10  ;;  %v6119_v10 = vld [vmem:[#allocation2 + $0x408] sm:$0xff]  }
  0x84   :  { %5523 = vmatpush3.bf16.msra.mxu1 %v6068_v11  ;;  %5502 = vmatprep.subr.bf16.mxu0 %v6069_v12  ;;  %v6120_v11 = vld [vmem:[#allocation2 + $0x488] sm:$0xff]   ;;  %v6121_v12 = vld [vmem:[#allocation2 + $0x440] sm:$0xff]  }
  0x85   :  { %5524 = vmatprep.subr.bf16.mxu1 %v6070_v13  ;;  %v6122_v13 = vld [vmem:[#allocation2 + $0x4c0] sm:$0xff]  }
  0x87   :  { %5503 = vmatpush3.bf16.msra.mxu0 %v6071_v14  ;;  %v6123_v14 = vld [vmem:[#allocation2 + $0x400] sm:$0xff]  }
  0x88   :  { %5525 = vmatpush3.bf16.msra.mxu1 %v6072_v15  ;;  %5504 = vmatprep.subr.bf16.mxu0 %v6073_v16  ;;  %v6124_v15 = vld [vmem:[#allocation2 + $0x480] sm:$0xff]   ;;  %v58_v16 = vld [vmem:[%s7033_s0 + $0x88] sm:$0xff] }
  0x89   :  { %5526 = vmatprep.subr.bf16.mxu1 %v6074_v17  ;;  %v114_v17 = vld [vmem:[%s7033_s0 + $0x248] sm:$0xff] }
  0x8b   :  { %5505 = vmatpush3.bf16.msra.mxu0 %v6075_v18  ;;  %v60_v18 = vld [vmem:[%s7033_s0 + $0x98] sm:$0xff] }
  0x8c   :  { %5527 = vmatpush3.bf16.msra.mxu1 %v6076_v19  ;;  %5506 = vmatprep.subr.bf16.mxu0 %v6077_v20  ;;  %v116_v19 = vld [vmem:[%s7033_s0 + $0x258] sm:$0xff]  ;;  %v170_v20 = vpack.c.bf16 %v114_v17, %v58_v16  ;;  %v6165_v16 = vld [vmem:[#allocation2 + $0x668] sm:$0xff]  }
  0x8d   :  { %5528 = vmatprep.subr.bf16.mxu1 %v6078_v21  ;;  %v172_v21 = vpack.c.bf16 %v116_v19, %v60_v18  ;;  %v6166_v17 = vld [vmem:[#allocation2 + $0x6e8] sm:$0xff]  }
  0x8e   :  { %v6167_v18 = vld [vmem:[#allocation2 + $0x628] sm:$0xff]  }
  0x8f   :  { %5507 = vmatpush3.bf16.msra.mxu0 %v6079_v22  ;;  %v57_v22 = vld [vmem:[%s7033_s0 + $0x80] sm:$0xff]  ;;  %v6168_v19 = vld [vmem:[#allocation2 + $0x6a8] sm:$0xff]  }
  0x90   :  { %5529 = vmatpush3.bf16.msra.mxu1 %v6080_v23  ;;  %5508 = vmatprep.subr.bf16.mxu0 %v6081_v24  ;;  %v113_v23 = vld [vmem:[%s7033_s0 + $0x240] sm:$0xff]  ;;  %v59_v24 = vld [vmem:[%s7033_s0 + $0x90] sm:$0xff] }
  0x91   :  { %5530 = vmatprep.subr.bf16.mxu1 %v6082_v25  ;;  %v169_v25 = vpack.c.bf16 %v113_v23, %v57_v22  ;;  %v6171_v22 = vld [vmem:[#allocation2 + $0x620] sm:$0xff]  }
  0x92   :  { %v6172_v23 = vld [vmem:[#allocation2 + $0x6a0] sm:$0xff]  }
  0x93   :  { %5509 = vmatpush3.bf16.msra.mxu0 %v6083_v26  ;;  %v115_v26 = vld [vmem:[%s7033_s0 + $0x250] sm:$0xff] }
  0x94   :  { %5531 = vmatpush3.bf16.msra.mxu1 %v6084_v27  ;;  %5510 = vmatprep.subr.bf16.mxu0 %v6085_v28  ;;  %v171_v27 = vpack.c.bf16 %v115_v26, %v59_v24  ;;  %v6125_v28 = vld [vmem:[#allocation2 + $0x578] sm:$0xff]  }
  0x95   :  { %5532 = vmatprep.subr.bf16.mxu1 %v6086_v29  ;;  %v6126_v29 = vld [vmem:[#allocation2 + $0x5f8] sm:$0xff]  }
  0x96   :  { %v6173_v24 = vld [vmem:[#allocation2 + $0x658] sm:$0xff]  }
  0x97   :  { %5511 = vmatpush3.bf16.msra.mxu0 %v6087_v30  ;;  %v6127_v30 = vld [vmem:[#allocation2 + $0x538] sm:$0xff]  }
  0x98   :  { %5533 = vmatpush3.bf16.msra.mxu1 %v6088_v31  ;;  %5512 = vmatprep.subr.bf16.mxu0 %v6089_v32  ;;  %v6128_v31 = vld [vmem:[#allocation2 + $0x5b8] sm:$0xff]   ;;  %v6129_v32 = vld [vmem:[#allocation2 + $0x570] sm:$0xff]  }
  0x99   :  { %5534 = vmatprep.subr.bf16.mxu1 %v6090_v33  ;;  %v6130_v33 = vld [vmem:[#allocation2 + $0x5f0] sm:$0xff]   ;;  %v6175_v26 = vld [vmem:[#allocation2 + $0x618] sm:$0xff]  }
  0x9b   :  { %5513 = vmatpush3.bf16.msra.mxu0 %v6091_v34  ;;  %v6131_v34 = vld [vmem:[#allocation2 + $0x530] sm:$0xff]  }
  0x9c   :  { %5535 = vmatpush3.bf16.msra.mxu1 %v6092_v35  ;;  %5542 = vmatprep.subr.bf16.mxu0 %v6093_v48  ;;  %v6132_v35 = vld [vmem:[#allocation2 + $0x5b0] sm:$0xff]  }
  0x9d   :  { %5564 = vmatprep.subr.bf16.mxu1 %v6094_v49  ;;  %v6145_v48 = vld [vmem:[#allocation2 + $0x550] sm:$0xff]  }
  0x9e   :  { %4027 = vmatmul.mubr.bf16.vlgmr.msra.gmra.mxu0 %v165_v44  ;;  %v6141_v44 = vld [vmem:[#allocation2 + $0x558] sm:$0xff]   ;;  %v6146_v49 = vld [vmem:[#allocation2 + $0x5d0] sm:$0xff]  }
  0x9f   :  { %4068 = vmatmul.mubr.bf16.vlgmr.msra.gmra.mxu1 %v167_v47  ;;  %5543 = vmatpush3.bf16.msra.mxu0 %v6095_v50  ;;  %v6144_v47 = vld [vmem:[#allocation2 + $0x598] sm:$0xff]   ;;  %v6147_v50 = vld [vmem:[#allocation2 + $0x510] sm:$0xff]  }
  0xa0   :  { %5565 = vmatpush3.bf16.msra.mxu1 %v6096_v51  ;;  %5544 = vmatprep.subr.bf16.mxu0 %v6097_v52  ;;  %v6148_v51 = vld [vmem:[#allocation2 + $0x590] sm:$0xff]   ;;  %v6149_v52 = vld [vmem:[#allocation2 + $0x548] sm:$0xff]  }
  0xa1   :  { %5566 = vmatprep.subr.bf16.mxu1 %v6098_v53  ;;  %4108 = vmatprep.mubr.bf16.mxu0 %v170_v20  ;;  %v6150_v53 = vld [vmem:[#allocation2 + $0x5c8] sm:$0xff]   ;;  %v6169_v20 = vld [vmem:[#allocation2 + $0x660] sm:$0xff]  }
  0xa2   :  { %4149 = vmatprep.mubr.bf16.mxu1 %v172_v21  ;;  %v6170_v21 = vld [vmem:[#allocation2 + $0x6e0] sm:$0xff]  }
  0xa3   :  { %5545 = vmatpush3.bf16.msra.mxu0 %v6099_v54  ;;  %v6151_v54 = vld [vmem:[#allocation2 + $0x508] sm:$0xff]  }
  0xa4   :  { %5567 = vmatpush3.bf16.msra.mxu1 %v6100_v55  ;;  %5546 = vmatprep.subr.bf16.mxu0 %v6101_v56  ;;  %v6152_v55 = vld [vmem:[#allocation2 + $0x588] sm:$0xff]   ;;  %v6153_v56 = vld [vmem:[#allocation2 + $0x540] sm:$0xff]  }
  0xa5   :  { %5568 = vmatprep.subr.bf16.mxu1 %v6102_v57  ;;  %v6154_v57 = vld [vmem:[#allocation2 + $0x5c0] sm:$0xff]  }
  0xa7   :  { %5547 = vmatpush3.bf16.msra.mxu0 %v6103_v58  ;;  %v6155_v58 = vld [vmem:[#allocation2 + $0x500] sm:$0xff]  }
  0xa8   :  { %5569 = vmatpush3.bf16.msra.mxu1 %v6104_v59  ;;  %5548 = vmatprep.subr.bf16.mxu0 %v6105_v60  ;;  %v6156_v59 = vld [vmem:[#allocation2 + $0x580] sm:$0xff]   ;;  %v62_v60 = vld [vmem:[%s7033_s0 + $0xa8] sm:$0xff] }
  0xa9   :  { %5570 = vmatprep.subr.bf16.mxu1 %v6106_v61  ;;  %v118_v61 = vld [vmem:[%s7033_s0 + $0x268] sm:$0xff] }
  0xab   :  { %5549 = vmatpush3.bf16.msra.mxu0 %v6107_v62  ;;  %v174_v62 = vpack.c.bf16 %v118_v61, %v62_v60  ;;  %v6197_v60 = vld [vmem:[#allocation2 + $0x768] sm:$0xff]  }
  0xac   :  { %5571 = vmatpush3.bf16.msra.mxu1 %v6108_v63  ;;  %5550 = vmatprep.subr.bf16.mxu0 %v6109_v0  ;;  %v64_v63 = vld [vmem:[%s7033_s0 + $0xb8] sm:$0xff]  ;;  %v6198_v61 = vld [vmem:[#allocation2 + $0x7e8] sm:$0xff]  }
  0xad   :  { %5572 = vmatprep.subr.bf16.mxu1 %v6110_v1  ;;  %v120_v0 = vld [vmem:[%s7033_s0 + $0x278] sm:$0xff]  ;;  %v61_v1 = vld [vmem:[%s7033_s0 + $0xa0] sm:$0xff] }
  0xaf   :  { %5551 = vmatpush3.bf16.msra.mxu0 %v6111_v2  ;;  %v176_v2 = vpack.c.bf16 %v120_v0, %v64_v63  ;;  %v6200_v63 = vld [vmem:[#allocation2 + $0x7a8] sm:$0xff]   ;;  %v6201_v0 = vld [vmem:[#allocation2 + $0x760] sm:$0xff]  }
  0xb0   :  { %5573 = vmatpush3.bf16.msra.mxu1 %v6112_v3  ;;  %5552 = vmatprep.subr.bf16.mxu0 %v6113_v4  ;;  %v117_v3 = vld [vmem:[%s7033_s0 + $0x260] sm:$0xff]  ;;  %v63_v4 = vld [vmem:[%s7033_s0 + $0xb0] sm:$0xff] }
  0xb1   :  { %5574 = vmatprep.subr.bf16.mxu1 %v6114_v5  ;;  %v119_v5 = vld [vmem:[%s7033_s0 + $0x270] sm:$0xff] }
  0xb3   :  { %5553 = vmatpush3.bf16.msra.mxu0 %v6115_v6  ;;  %v173_v6 = vpack.c.bf16 %v117_v3, %v61_v1  ;;  %v6202_v1 = vld [vmem:[#allocation2 + $0x7e0] sm:$0xff]  }
  0xb4   :  { %5575 = vmatpush3.bf16.msra.mxu1 %v6116_v7  ;;  %5554 = vmatprep.subr.bf16.mxu0 %v6117_v8  ;;  %v175_v7 = vpack.c.bf16 %v119_v5, %v63_v4  ;;  %v6157_v8 = vld [vmem:[#allocation2 + $0x678] sm:$0xff]   ;;  %v6204_v3 = vld [vmem:[#allocation2 + $0x7a0] sm:$0xff]  }
  0xb5   :  { %5576 = vmatprep.subr.bf16.mxu1 %v6118_v9  ;;  %v6158_v9 = vld [vmem:[#allocation2 + $0x6f8] sm:$0xff]  }
  0xb6   :  { %v6205_v4 = vld [vmem:[#allocation2 + $0x758] sm:$0xff]  }
  0xb7   :  { %5555 = vmatpush3.bf16.msra.mxu0 %v6119_v10  ;;  %v6159_v10 = vld [vmem:[#allocation2 + $0x638] sm:$0xff]  }
  0xb8   :  { %5577 = vmatpush3.bf16.msra.mxu1 %v6120_v11  ;;  %5556 = vmatprep.subr.bf16.mxu0 %v6121_v12  ;;  %v6160_v11 = vld [vmem:[#allocation2 + $0x6b8] sm:$0xff]   ;;  %v6161_v12 = vld [vmem:[#allocation2 + $0x670] sm:$0xff]  }
  0xb9   :  { %5578 = vmatprep.subr.bf16.mxu1 %v6122_v13  ;;  %v6162_v13 = vld [vmem:[#allocation2 + $0x6f0] sm:$0xff]   ;;  %v6206_v5 = vld [vmem:[#allocation2 + $0x7d8] sm:$0xff]  }
  0xbb   :  { %5557 = vmatpush3.bf16.msra.mxu0 %v6123_v14  ;;  %v6163_v14 = vld [vmem:[#allocation2 + $0x630] sm:$0xff]  }
  0xbc   :  { %5579 = vmatpush3.bf16.msra.mxu1 %v6124_v15  ;;  %5586 = vmatprep.subr.bf16.mxu0 %v6125_v28  ;;  %v6164_v15 = vld [vmem:[#allocation2 + $0x6b0] sm:$0xff]  }
  0xbd   :  { %5608 = vmatprep.subr.bf16.mxu1 %v6126_v29  ;;  %v6177_v28 = vld [vmem:[#allocation2 + $0x650] sm:$0xff]  }
  0xbe   :  { %4109 = vmatmul.mubr.bf16.vlgmr.msra.gmra.mxu0 %v169_v25  ;;  %v6174_v25 = vld [vmem:[#allocation2 + $0x6d8] sm:$0xff]   ;;  %v6178_v29 = vld [vmem:[#allocation2 + $0x6d0] sm:$0xff]  }
  0xbf   :  { %4150 = vmatmul.mubr.bf16.vlgmr.msra.gmra.mxu1 %v171_v27  ;;  %5587 = vmatpush3.bf16.msra.mxu0 %v6127_v30  ;;  %v6176_v27 = vld [vmem:[#allocation2 + $0x698] sm:$0xff]   ;;  %v6179_v30 = vld [vmem:[#allocation2 + $0x610] sm:$0xff]  }
  0xc0   :  { %5609 = vmatpush3.bf16.msra.mxu1 %v6128_v31  ;;  %5588 = vmatprep.subr.bf16.mxu0 %v6129_v32  ;;  %v6180_v31 = vld [vmem:[#allocation2 + $0x690] sm:$0xff]   ;;  %v6181_v32 = vld [vmem:[#allocation2 + $0x648] sm:$0xff]  }
  0xc1   :  { %5610 = vmatprep.subr.bf16.mxu1 %v6130_v33  ;;  %4190 = vmatprep.mubr.bf16.mxu0 %v174_v62  ;;  %v6182_v33 = vld [vmem:[#allocation2 + $0x6c8] sm:$0xff]  }
  0xc2   :  { %4231 = vmatprep.mubr.bf16.mxu1 %v176_v2  ;;  %v6199_v62 = vld [vmem:[#allocation2 + $0x728] sm:$0xff]   ;;  %v6203_v2 = vld [vmem:[#allocation2 + $0x720] sm:$0xff]  }
  0xc3   :  { %5589 = vmatpush3.bf16.msra.mxu0 %v6131_v34  ;;  %v6183_v34 = vld [vmem:[#allocation2 + $0x608] sm:$0xff]  }
  0xc4   :  { %5611 = vmatpush3.bf16.msra.mxu1 %v6132_v35  ;;  %5590 = vmatprep.subr.bf16.mxu0 %v6133_v36  ;;  %v6184_v35 = vld [vmem:[#allocation2 + $0x688] sm:$0xff]   ;;  %v6185_v36 = vld [vmem:[#allocation2 + $0x640] sm:$0xff]  }
  0xc5   :  { %5612 = vmatprep.subr.bf16.mxu1 %v6134_v37  ;;  %v6186_v37 = vld [vmem:[#allocation2 + $0x6c0] sm:$0xff]  }
  0xc7   :  { %5591 = vmatpush3.bf16.msra.mxu0 %v6135_v38  ;;  %v6187_v38 = vld [vmem:[#allocation2 + $0x600] sm:$0xff]  }
  0xc8   :  { %5613 = vmatpush3.bf16.msra.mxu1 %v6136_v39  ;;  %5592 = vmatprep.subr.bf16.mxu0 %v6137_v40  ;;  %v6188_v39 = vld [vmem:[#allocation2 + $0x680] sm:$0xff]   ;;  %v66_v40 = vld [vmem:[%s7033_s0 + $0xc8] sm:$0xff] }
  0xc9   :  { %5614 = vmatprep.subr.bf16.mxu1 %v6138_v41  ;;  %v122_v41 = vld [vmem:[%s7033_s0 + $0x288] sm:$0xff] }
  0xcb   :  { %5593 = vmatpush3.bf16.msra.mxu0 %v6139_v42  ;;  %v68_v42 = vld [vmem:[%s7033_s0 + $0xd8] sm:$0xff] }
  0xcc   :  { %5615 = vmatpush3.bf16.msra.mxu1 %v6140_v43  ;;  %5594 = vmatprep.subr.bf16.mxu0 %v6141_v44  ;;  %v178_v43 = vpack.c.bf16 %v122_v41, %v66_v40  ;;  %v124_v44 = vld [vmem:[%s7033_s0 + $0x298] sm:$0xff]  ;;  %v6229_v40 = vld [vmem:[#allocation2 + $0x868] sm:$0xff]  }
  0xcd   :  { %5616 = vmatprep.subr.bf16.mxu1 %v6142_v45  ;;  %v65_v45 = vld [vmem:[%s7033_s0 + $0xc0] sm:$0xff]  ;;  %v6230_v41 = vld [vmem:[#allocation2 + $0x8e8] sm:$0xff]  }
  0xcf   :  { %5595 = vmatpush3.bf16.msra.mxu0 %v6143_v46  ;;  %v121_v46 = vld [vmem:[%s7033_s0 + $0x280] sm:$0xff] }
  0xd0   :  { %5617 = vmatpush3.bf16.msra.mxu1 %v6144_v47  ;;  %5596 = vmatprep.subr.bf16.mxu0 %v6145_v48  ;;  %v180_v47 = vpack.c.bf16 %v124_v44, %v68_v42  ;;  %v177_v48 = vpack.c.bf16 %v121_v46, %v65_v45  ;;  %v6231_v42 = vld [vmem:[#allocation2 + $0x828] sm:$0xff]   ;;  %v6233_v44 = vld [vmem:[#allocation2 + $0x860] sm:$0xff]  }
  0xd1   :  { %5618 = vmatprep.subr.bf16.mxu1 %v6146_v49  ;;  %v67_v49 = vld [vmem:[%s7033_s0 + $0xd0] sm:$0xff]  ;;  %v6234_v45 = vld [vmem:[#allocation2 + $0x8e0] sm:$0xff]  }
  0xd2   :  { %v6235_v46 = vld [vmem:[#allocation2 + $0x820] sm:$0xff]  }
  0xd3   :  { %5597 = vmatpush3.bf16.msra.mxu0 %v6147_v50  ;;  %v123_v50 = vld [vmem:[%s7033_s0 + $0x290] sm:$0xff] }
  0xd4   :  { %5619 = vmatpush3.bf16.msra.mxu1 %v6148_v51  ;;  %5598 = vmatprep.subr.bf16.mxu0 %v6149_v52  ;;  %v179_v51 = vpack.c.bf16 %v123_v50, %v67_v49  ;;  %v6189_v52 = vld [vmem:[#allocation2 + $0x778] sm:$0xff]  }
  0xd5   :  { %5620 = vmatprep.subr.bf16.mxu1 %v6150_v53  ;;  %v6190_v53 = vld [vmem:[#allocation2 + $0x7f8] sm:$0xff]  }
  0xd6   :  { %v6238_v49 = vld [vmem:[#allocation2 + $0x8d8] sm:$0xff]  }
  0xd7   :  { %5599 = vmatpush3.bf16.msra.mxu0 %v6151_v54  ;;  %v6191_v54 = vld [vmem:[#allocation2 + $0x738] sm:$0xff]  }
  0xd8   :  { %5621 = vmatpush3.bf16.msra.mxu1 %v6152_v55  ;;  %5600 = vmatprep.subr.bf16.mxu0 %v6153_v56  ;;  %v6192_v55 = vld [vmem:[#allocation2 + $0x7b8] sm:$0xff]   ;;  %v6193_v56 = vld [vmem:[#allocation2 + $0x770] sm:$0xff]  }
  0xd9   :  { %5622 = vmatprep.subr.bf16.mxu1 %v6154_v57  ;;  %v6194_v57 = vld [vmem:[#allocation2 + $0x7f0] sm:$0xff]   ;;  %v6239_v50 = vld [vmem:[#allocation2 + $0x818] sm:$0xff]  }
  0xdb   :  { %5601 = vmatpush3.bf16.msra.mxu0 %v6155_v58  ;;  %v6195_v58 = vld [vmem:[#allocation2 + $0x730] sm:$0xff]  }
  0xdc   :  { %5623 = vmatpush3.bf16.msra.mxu1 %v6156_v59  ;;  %5630 = vmatprep.subr.bf16.mxu0 %v6157_v8  ;;  %v6196_v59 = vld [vmem:[#allocation2 + $0x7b0] sm:$0xff]  }
  0xdd   :  { %5652 = vmatprep.subr.bf16.mxu1 %v6158_v9  ;;  %v6209_v8 = vld [vmem:[#allocation2 + $0x750] sm:$0xff]  }
  0xde   :  { %4191 = vmatmul.mubr.bf16.vlgmr.msra.gmra.mxu0 %v173_v6  ;;  %v6207_v6 = vld [vmem:[#allocation2 + $0x718] sm:$0xff]   ;;  %v6210_v9 = vld [vmem:[#allocation2 + $0x7d0] sm:$0xff]  }
  0xdf   :  { %4232 = vmatmul.mubr.bf16.vlgmr.msra.gmra.mxu1 %v175_v7  ;;  %5631 = vmatpush3.bf16.msra.mxu0 %v6159_v10  ;;  %v6208_v7 = vld [vmem:[#allocation2 + $0x798] sm:$0xff]   ;;  %v6211_v10 = vld [vmem:[#allocation2 + $0x710] sm:$0xff]  }
  0xe0   :  { %5653 = vmatpush3.bf16.msra.mxu1 %v6160_v11  ;;  %5632 = vmatprep.subr.bf16.mxu0 %v6161_v12  ;;  %v6212_v11 = vld [vmem:[#allocation2 + $0x790] sm:$0xff]   ;;  %v6213_v12 = vld [vmem:[#allocation2 + $0x748] sm:$0xff]  }
  0xe1   :  { %5654 = vmatprep.subr.bf16.mxu1 %v6162_v13  ;;  %4272 = vmatprep.mubr.bf16.mxu0 %v178_v43  ;;  %v6214_v13 = vld [vmem:[#allocation2 + $0x7c8] sm:$0xff]  }
  0xe2   :  { %4313 = vmatprep.mubr.bf16.mxu1 %v180_v47  ;;  %v6232_v43 = vld [vmem:[#allocation2 + $0x8a8] sm:$0xff]   ;;  %v6236_v47 = vld [vmem:[#allocation2 + $0x8a0] sm:$0xff]  }
  0xe3   :  { %5633 = vmatpush3.bf16.msra.mxu0 %v6163_v14  ;;  %v6215_v14 = vld [vmem:[#allocation2 + $0x708] sm:$0xff]  }
  0xe4   :  { %5655 = vmatpush3.bf16.msra.mxu1 %v6164_v15  ;;  %5634 = vmatprep.subr.bf16.mxu0 %v6165_v16  ;;  %v6216_v15 = vld [vmem:[#allocation2 + $0x788] sm:$0xff]   ;;  %v6217_v16 = vld [vmem:[#allocation2 + $0x740] sm:$0xff]  }
  0xe5   :  { %5656 = vmatprep.subr.bf16.mxu1 %v6166_v17  ;;  %v6218_v17 = vld [vmem:[#allocation2 + $0x7c0] sm:$0xff]  }
  0xe7   :  { %5635 = vmatpush3.bf16.msra.mxu0 %v6167_v18  ;;  %v6219_v18 = vld [vmem:[#allocation2 + $0x700] sm:$0xff]  }
  0xe8   :  { %5657 = vmatpush3.bf16.msra.mxu1 %v6168_v19  ;;  %5636 = vmatprep.subr.bf16.mxu0 %v6169_v20  ;;  %v6220_v19 = vld [vmem:[#allocation2 + $0x780] sm:$0xff]   ;;  %v70_v20 = vld [vmem:[%s7033_s0 + $0xe8] sm:$0xff] }
  0xe9   :  { %5658 = vmatprep.subr.bf16.mxu1 %v6170_v21  ;;  %v126_v21 = vld [vmem:[%s7033_s0 + $0x2a8] sm:$0xff] }
  0xeb   :  { %5637 = vmatpush3.bf16.msra.mxu0 %v6171_v22  ;;  %v72_v22 = vld [vmem:[%s7033_s0 + $0xf8] sm:$0xff] }
  0xec   :  { %5659 = vmatpush3.bf16.msra.mxu1 %v6172_v23  ;;  %5638 = vmatprep.subr.bf16.mxu0 %v6173_v24  ;;  %v182_v23 = vpack.c.bf16 %v126_v21, %v70_v20  ;;  %v128_v24 = vld [vmem:[%s7033_s0 + $0x2b8] sm:$0xff]  ;;  %v6261_v20 = vld [vmem:[#allocation2 + $0x968] sm:$0xff]  }
  0xed   :  { %5660 = vmatprep.subr.bf16.mxu1 %v6174_v25  ;;  %v69_v25 = vld [vmem:[%s7033_s0 + $0xe0] sm:$0xff]  ;;  %v6262_v21 = vld [vmem:[#allocation2 + $0x9e8] sm:$0xff]  }
  0xef   :  { %5639 = vmatpush3.bf16.msra.mxu0 %v6175_v26  ;;  %v125_v26 = vld [vmem:[%s7033_s0 + $0x2a0] sm:$0xff] }
  0xf0   :  { %5661 = vmatpush3.bf16.msra.mxu1 %v6176_v27  ;;  %5640 = vmatprep.subr.bf16.mxu0 %v6177_v28  ;;  %v184_v27 = vpack.c.bf16 %v128_v24, %v72_v22  ;;  %v181_v28 = vpack.c.bf16 %v125_v26, %v69_v25  ;;  %v6263_v22 = vld [vmem:[#allocation2 + $0x928] sm:$0xff]   ;;  %v6265_v24 = vld [vmem:[#allocation2 + $0x960] sm:$0xff]  }
  0xf1   :  { %5662 = vmatprep.subr.bf16.mxu1 %v6178_v29  ;;  %v71_v29 = vld [vmem:[%s7033_s0 + $0xf0] sm:$0xff]  ;;  %v6266_v25 = vld [vmem:[#allocation2 + $0x9e0] sm:$0xff]  }
  0xf2   :  { %v6267_v26 = vld [vmem:[#allocation2 + $0x920] sm:$0xff]  }
  0xf3   :  { %5641 = vmatpush3.bf16.msra.mxu0 %v6179_v30  ;;  %v127_v30 = vld [vmem:[%s7033_s0 + $0x2b0] sm:$0xff] }
  0xf4   :  { %5663 = vmatpush3.bf16.msra.mxu1 %v6180_v31  ;;  %5642 = vmatprep.subr.bf16.mxu0 %v6181_v32  ;;  %v183_v31 = vpack.c.bf16 %v127_v30, %v71_v29  ;;  %v6221_v32 = vld [vmem:[#allocation2 + $0x878] sm:$0xff]  }
  0xf5   :  { %5664 = vmatprep.subr.bf16.mxu1 %v6182_v33  ;;  %v6222_v33 = vld [vmem:[#allocation2 + $0x8f8] sm:$0xff]  }
  0xf6   :  { %v6270_v29 = vld [vmem:[#allocation2 + $0x9d8] sm:$0xff]  }
  0xf7   :  { %5643 = vmatpush3.bf16.msra.mxu0 %v6183_v34  ;;  %v6223_v34 = vld [vmem:[#allocation2 + $0x838] sm:$0xff]  }
  0xf8   :  { %5665 = vmatpush3.bf16.msra.mxu1 %v6184_v35  ;;  %5644 = vmatprep.subr.bf16.mxu0 %v6185_v36  ;;  %v6224_v35 = vld [vmem:[#allocation2 + $0x8b8] sm:$0xff]   ;;  %v6225_v36 = vld [vmem:[#allocation2 + $0x870] sm:$0xff]  }
  0xf9   :  { %5666 = vmatprep.subr.bf16.mxu1 %v6186_v37  ;;  %v6226_v37 = vld [vmem:[#allocation2 + $0x8f0] sm:$0xff]   ;;  %v6271_v30 = vld [vmem:[#allocation2 + $0x918] sm:$0xff]  }
  0xfb   :  { %5645 = vmatpush3.bf16.msra.mxu0 %v6187_v38  ;;  %v6227_v38 = vld [vmem:[#allocation2 + $0x830] sm:$0xff]  }
  0xfc   :  { %5667 = vmatpush3.bf16.msra.mxu1 %v6188_v39  ;;  %5674 = vmatprep.subr.bf16.mxu0 %v6189_v52  ;;  %v6228_v39 = vld [vmem:[#allocation2 + $0x8b0] sm:$0xff]  }
  0xfd   :  { %5696 = vmatprep.subr.bf16.mxu1 %v6190_v53  ;;  %v6241_v52 = vld [vmem:[#allocation2 + $0x850] sm:$0xff]  }
  0xfe   :  { %4273 = vmatmul.mubr.bf16.vlgmr.msra.gmra.mxu0 %v177_v48  ;;  %v6237_v48 = vld [vmem:[#allocation2 + $0x858] sm:$0xff]   ;;  %v6242_v53 = vld [vmem:[#allocation2 + $0x8d0] sm:$0xff]  }
  0xff   :  { %4314 = vmatmul.mubr.bf16.vlgmr.msra.gmra.mxu1 %v179_v51  ;;  %5675 = vmatpush3.bf16.msra.mxu0 %v6191_v54  ;;  %v6240_v51 = vld [vmem:[#allocation2 + $0x898] sm:$0xff]   ;;  %v6243_v54 = vld [vmem:[#allocation2 + $0x810] sm:$0xff]  }
 0x100   :  { %5697 = vmatpush3.bf16.msra.mxu1 %v6192_v55  ;;  %5676 = vmatprep.subr.bf16.mxu0 %v6193_v56  ;;  %v6244_v55 = vld [vmem:[#allocation2 + $0x890] sm:$0xff]   ;;  %v6245_v56 = vld [vmem:[#allocation2 + $0x848] sm:$0xff]  }
 0x101   :  { %5698 = vmatprep.subr.bf16.mxu1 %v6194_v57  ;;  %4354 = vmatprep.mubr.bf16.mxu0 %v182_v23  ;;  %v6246_v57 = vld [vmem:[#allocation2 + $0x8c8] sm:$0xff]  }
 0x102   :  { %4395 = vmatprep.mubr.bf16.mxu1 %v184_v27  ;;  %v6264_v23 = vld [vmem:[#allocation2 + $0x9a8] sm:$0xff]   ;;  %v6268_v27 = vld [vmem:[#allocation2 + $0x9a0] sm:$0xff]  }
 0x103   :  { %5677 = vmatpush3.bf16.msra.mxu0 %v6195_v58  ;;  %v6247_v58 = vld [vmem:[#allocation2 + $0x808] sm:$0xff]  }
 0x104   :  { %5699 = vmatpush3.bf16.msra.mxu1 %v6196_v59  ;;  %5678 = vmatprep.subr.bf16.mxu0 %v6197_v60  ;;  %v6248_v59 = vld [vmem:[#allocation2 + $0x888] sm:$0xff]   ;;  %v6249_v60 = vld [vmem:[#allocation2 + $0x840] sm:$0xff]  }
 0x105   :  { %5700 = vmatprep.subr.bf16.mxu1 %v6198_v61  ;;  %v6250_v61 = vld [vmem:[#allocation2 + $0x8c0] sm:$0xff]  }
 0x107   :  { %5679 = vmatpush3.bf16.msra.mxu0 %v6199_v62  ;;  %v6251_v62 = vld [vmem:[#allocation2 + $0x800] sm:$0xff]  }
 0x108   :  { %5701 = vmatpush3.bf16.msra.mxu1 %v6200_v63  ;;  %5680 = vmatprep.subr.bf16.mxu0 %v6201_v0  ;;  %v6252_v63 = vld [vmem:[#allocation2 + $0x880] sm:$0xff]   ;;  %v74_v0 = vld [vmem:[%s7033_s0 + $0x108] sm:$0xff] }
 0x109   :  { %5702 = vmatprep.subr.bf16.mxu1 %v6202_v1  ;;  %v130_v1 = vld [vmem:[%s7033_s0 + $0x2c8] sm:$0xff] }
 0x10b   :  { %5681 = vmatpush3.bf16.msra.mxu0 %v6203_v2  ;;  %v76_v2 = vld [vmem:[%s7033_s0 + $0x118] sm:$0xff] }
 0x10c   :  { %5703 = vmatpush3.bf16.msra.mxu1 %v6204_v3  ;;  %5682 = vmatprep.subr.bf16.mxu0 %v6205_v4  ;;  %v132_v3 = vld [vmem:[%s7033_s0 + $0x2d8] sm:$0xff]  ;;  %v186_v4 = vpack.c.bf16 %v130_v1, %v74_v0  ;;  %v6293_v0 = vld [vmem:[#allocation2 + $0xa68] sm:$0xff]  }
 0x10d   :  { %5704 = vmatprep.subr.bf16.mxu1 %v6206_v5  ;;  %v188_v5 = vpack.c.bf16 %v132_v3, %v76_v2  ;;  %v6294_v1 = vld [vmem:[#allocation2 + $0xae8] sm:$0xff]  }
 0x10e   :  { %v6295_v2 = vld [vmem:[#allocation2 + $0xa28] sm:$0xff]  }
 0x10f   :  { %5683 = vmatpush3.bf16.msra.mxu0 %v6207_v6  ;;  %v73_v6 = vld [vmem:[%s7033_s0 + $0x100] sm:$0xff]  ;;  %v6296_v3 = vld [vmem:[#allocation2 + $0xaa8] sm:$0xff]  }
 0x110   :  { %5705 = vmatpush3.bf16.msra.mxu1 %v6208_v7  ;;  %5684 = vmatprep.subr.bf16.mxu0 %v6209_v8  ;;  %v129_v7 = vld [vmem:[%s7033_s0 + $0x2c0] sm:$0xff]  ;;  %v75_v8 = vld [vmem:[%s7033_s0 + $0x110] sm:$0xff] }
 0x111   :  { %5706 = vmatprep.subr.bf16.mxu1 %v6210_v9  ;;  %v185_v9 = vpack.c.bf16 %v129_v7, %v73_v6  ;;  %v6299_v6 = vld [vmem:[#allocation2 + $0xa20] sm:$0xff]  }
 0x112   :  { %v6300_v7 = vld [vmem:[#allocation2 + $0xaa0] sm:$0xff]  }
 0x113   :  { %5685 = vmatpush3.bf16.msra.mxu0 %v6211_v10  ;;  %v131_v10 = vld [vmem:[%s7033_s0 + $0x2d0] sm:$0xff] }
 0x114   :  { %5707 = vmatpush3.bf16.msra.mxu1 %v6212_v11  ;;  %5686 = vmatprep.subr.bf16.mxu0 %v6213_v12  ;;  %v187_v11 = vpack.c.bf16 %v131_v10, %v75_v8  ;;  %v6253_v12 = vld [vmem:[#allocation2 + $0x978] sm:$0xff]  }
 0x115   :  { %5708 = vmatprep.subr.bf16.mxu1 %v6214_v13  ;;  %v6254_v13 = vld [vmem:[#allocation2 + $0x9f8] sm:$0xff]  }
 0x116   :  { %v6301_v8 = vld [vmem:[#allocation2 + $0xa58] sm:$0xff]  }
 0x117   :  { %5687 = vmatpush3.bf16.msra.mxu0 %v6215_v14  ;;  %v6255_v14 = vld [vmem:[#allocation2 + $0x938] sm:$0xff]  }
 0x118   :  { %5709 = vmatpush3.bf16.msra.mxu1 %v6216_v15  ;;  %5688 = vmatprep.subr.bf16.mxu0 %v6217_v16  ;;  %v6256_v15 = vld [vmem:[#allocation2 + $0x9b8] sm:$0xff]   ;;  %v6257_v16 = vld [vmem:[#allocation2 + $0x970] sm:$0xff]  }
 0x119   :  { %5710 = vmatprep.subr.bf16.mxu1 %v6218_v17  ;;  %v6258_v17 = vld [vmem:[#allocation2 + $0x9f0] sm:$0xff]   ;;  %v6303_v10 = vld [vmem:[#allocation2 + $0xa18] sm:$0xff]  }
 0x11b   :  { %5689 = vmatpush3.bf16.msra.mxu0 %v6219_v18  ;;  %v6259_v18 = vld [vmem:[#allocation2 + $0x930] sm:$0xff]  }
 0x11c   :  { %5711 = vmatpush3.bf16.msra.mxu1 %v6220_v19  ;;  %5718 = vmatprep.subr.bf16.mxu0 %v6221_v32  ;;  %v6260_v19 = vld [vmem:[#allocation2 + $0x9b0] sm:$0xff]  }
 0x11d   :  { %5740 = vmatprep.subr.bf16.mxu1 %v6222_v33  ;;  %v6273_v32 = vld [vmem:[#allocation2 + $0x950] sm:$0xff]  }
 0x11e   :  { %4355 = vmatmul.mubr.bf16.vlgmr.msra.gmra.mxu0 %v181_v28  ;;  %v6269_v28 = vld [vmem:[#allocation2 + $0x958] sm:$0xff]   ;;  %v6274_v33 = vld [vmem:[#allocation2 + $0x9d0] sm:$0xff]  }
 0x11f   :  { %4396 = vmatmul.mubr.bf16.vlgmr.msra.gmra.mxu1 %v183_v31  ;;  %5719 = vmatpush3.bf16.msra.mxu0 %v6223_v34  ;;  %v6272_v31 = vld [vmem:[#allocation2 + $0x998] sm:$0xff]   ;;  %v6275_v34 = vld [vmem:[#allocation2 + $0x910] sm:$0xff]  }
 0x120   :  { %5741 = vmatpush3.bf16.msra.mxu1 %v6224_v35  ;;  %5720 = vmatprep.subr.bf16.mxu0 %v6225_v36  ;;  %v6276_v35 = vld [vmem:[#allocation2 + $0x990] sm:$0xff]   ;;  %v6277_v36 = vld [vmem:[#allocation2 + $0x948] sm:$0xff]  }
 0x121   :  { %5742 = vmatprep.subr.bf16.mxu1 %v6226_v37  ;;  %4436 = vmatprep.mubr.bf16.mxu0 %v186_v4  ;;  %v6278_v37 = vld [vmem:[#allocation2 + $0x9c8] sm:$0xff]   ;;  %v6297_v4 = vld [vmem:[#allocation2 + $0xa60] sm:$0xff]  }
 0x122   :  { %4477 = vmatprep.mubr.bf16.mxu1 %v188_v5  ;;  %v6298_v5 = vld [vmem:[#allocation2 + $0xae0] sm:$0xff]  }
 0x123   :  { %5721 = vmatpush3.bf16.msra.mxu0 %v6227_v38  ;;  %v6279_v38 = vld [vmem:[#allocation2 + $0x908] sm:$0xff]  }
 0x124   :  { %5743 = vmatpush3.bf16.msra.mxu1 %v6228_v39  ;;  %5722 = vmatprep.subr.bf16.mxu0 %v6229_v40  ;;  %v6280_v39 = vld [vmem:[#allocation2 + $0x988] sm:$0xff]   ;;  %v6281_v40 = vld [vmem:[#allocation2 + $0x940] sm:$0xff]  }
 0x125   :  { %5744 = vmatprep.subr.bf16.mxu1 %v6230_v41  ;;  %v6282_v41 = vld [vmem:[#allocation2 + $0x9c0] sm:$0xff]  }
 0x127   :  { %5723 = vmatpush3.bf16.msra.mxu0 %v6231_v42  ;;  %v6283_v42 = vld [vmem:[#allocation2 + $0x900] sm:$0xff]  }
 0x128   :  { %5745 = vmatpush3.bf16.msra.mxu1 %v6232_v43  ;;  %5724 = vmatprep.subr.bf16.mxu0 %v6233_v44  ;;  %v6284_v43 = vld [vmem:[#allocation2 + $0x980] sm:$0xff]   ;;  %v78_v44 = vld [vmem:[%s7033_s0 + $0x128] sm:$0xff] }
 0x129   :  { %5746 = vmatprep.subr.bf16.mxu1 %v6234_v45  ;;  %v134_v45 = vld [vmem:[%s7033_s0 + $0x2e8] sm:$0xff] }
 0x12b   :  { %5725 = vmatpush3.bf16.msra.mxu0 %v6235_v46  ;;  %v190_v46 = vpack.c.bf16 %v134_v45, %v78_v44  ;;  %v6325_v44 = vld [vmem:[#allocation2 + $0xb68] sm:$0xff]  }
 0x12c   :  { %5747 = vmatpush3.bf16.msra.mxu1 %v6236_v47  ;;  %5726 = vmatprep.subr.bf16.mxu0 %v6237_v48  ;;  %v80_v47 = vld [vmem:[%s7033_s0 + $0x138] sm:$0xff]  ;;  %v6326_v45 = vld [vmem:[#allocation2 + $0xbe8] sm:$0xff]  }
 0x12d   :  { %5748 = vmatprep.subr.bf16.mxu1 %v6238_v49  ;;  %v136_v48 = vld [vmem:[%s7033_s0 + $0x2f8] sm:$0xff]  ;;  %v77_v49 = vld [vmem:[%s7033_s0 + $0x120] sm:$0xff] }
 0x12f   :  { %5727 = vmatpush3.bf16.msra.mxu0 %v6239_v50  ;;  %v192_v50 = vpack.c.bf16 %v136_v48, %v80_v47  ;;  %v6328_v47 = vld [vmem:[#allocation2 + $0xba8] sm:$0xff]   ;;  %v6329_v48 = vld [vmem:[#allocation2 + $0xb60] sm:$0xff]  }
 0x130   :  { %5749 = vmatpush3.bf16.msra.mxu1 %v6240_v51  ;;  %5728 = vmatprep.subr.bf16.mxu0 %v6241_v52  ;;  %v133_v51 = vld [vmem:[%s7033_s0 + $0x2e0] sm:$0xff]  ;;  %v79_v52 = vld [vmem:[%s7033_s0 + $0x130] sm:$0xff] }
 0x131   :  { %5750 = vmatprep.subr.bf16.mxu1 %v6242_v53  ;;  %v135_v53 = vld [vmem:[%s7033_s0 + $0x2f0] sm:$0xff] }
 0x133   :  { %5729 = vmatpush3.bf16.msra.mxu0 %v6243_v54  ;;  %v189_v54 = vpack.c.bf16 %v133_v51, %v77_v49  ;;  %v6330_v49 = vld [vmem:[#allocation2 + $0xbe0] sm:$0xff]  }
 0x134   :  { %5751 = vmatpush3.bf16.msra.mxu1 %v6244_v55  ;;  %5730 = vmatprep.subr.bf16.mxu0 %v6245_v56  ;;  %v191_v55 = vpack.c.bf16 %v135_v53, %v79_v52  ;;  %v6285_v56 = vld [vmem:[#allocation2 + $0xa78] sm:$0xff]   ;;  %v6332_v51 = vld [vmem:[#allocation2 + $0xba0] sm:$0xff]  }
 0x135   :  { %5752 = vmatprep.subr.bf16.mxu1 %v6246_v57  ;;  %v6286_v57 = vld [vmem:[#allocation2 + $0xaf8] sm:$0xff]  }
 0x136   :  { %v6333_v52 = vld [vmem:[#allocation2 + $0xb58] sm:$0xff]  }
 0x137   :  { %5731 = vmatpush3.bf16.msra.mxu0 %v6247_v58  ;;  %v6287_v58 = vld [vmem:[#allocation2 + $0xa38] sm:$0xff]  }
 0x138   :  { %5753 = vmatpush3.bf16.msra.mxu1 %v6248_v59  ;;  %5732 = vmatprep.subr.bf16.mxu0 %v6249_v60  ;;  %v6288_v59 = vld [vmem:[#allocation2 + $0xab8] sm:$0xff]   ;;  %v6289_v60 = vld [vmem:[#allocation2 + $0xa70] sm:$0xff]  }
 0x139   :  { %5754 = vmatprep.subr.bf16.mxu1 %v6250_v61  ;;  %v6290_v61 = vld [vmem:[#allocation2 + $0xaf0] sm:$0xff]   ;;  %v6334_v53 = vld [vmem:[#allocation2 + $0xbd8] sm:$0xff]  }
 0x13b   :  { %5733 = vmatpush3.bf16.msra.mxu0 %v6251_v62  ;;  %v6291_v62 = vld [vmem:[#allocation2 + $0xa30] sm:$0xff]  }
 0x13c   :  { %5755 = vmatpush3.bf16.msra.mxu1 %v6252_v63  ;;  %5762 = vmatprep.subr.bf16.mxu0 %v6253_v12  ;;  %v6292_v63 = vld [vmem:[#allocation2 + $0xab0] sm:$0xff]  }
 0x13d   :  { %5784 = vmatprep.subr.bf16.mxu1 %v6254_v13  ;;  %v6305_v12 = vld [vmem:[#allocation2 + $0xa50] sm:$0xff]  }
 0x13e   :  { %4437 = vmatmul.mubr.bf16.vlgmr.msra.gmra.mxu0 %v185_v9  ;;  %v6302_v9 = vld [vmem:[#allocation2 + $0xad8] sm:$0xff]   ;;  %v6306_v13 = vld [vmem:[#allocation2 + $0xad0] sm:$0xff]  }
 0x13f   :  { %4478 = vmatmul.mubr.bf16.vlgmr.msra.gmra.mxu1 %v187_v11  ;;  %5763 = vmatpush3.bf16.msra.mxu0 %v6255_v14  ;;  %v6304_v11 = vld [vmem:[#allocation2 + $0xa98] sm:$0xff]   ;;  %v6307_v14 = vld [vmem:[#allocation2 + $0xa10] sm:$0xff]  }
 0x140   :  { %5785 = vmatpush3.bf16.msra.mxu1 %v6256_v15  ;;  %5764 = vmatprep.subr.bf16.mxu0 %v6257_v16  ;;  %v6308_v15 = vld [vmem:[#allocation2 + $0xa90] sm:$0xff]   ;;  %v6309_v16 = vld [vmem:[#allocation2 + $0xa48] sm:$0xff]  }
 0x141   :  { %5786 = vmatprep.subr.bf16.mxu1 %v6258_v17  ;;  %4518 = vmatprep.mubr.bf16.mxu0 %v190_v46  ;;  %v6310_v17 = vld [vmem:[#allocation2 + $0xac8] sm:$0xff]  }
 0x142   :  { %4559 = vmatprep.mubr.bf16.mxu1 %v192_v50  ;;  %v6327_v46 = vld [vmem:[#allocation2 + $0xb28] sm:$0xff]   ;;  %v6331_v50 = vld [vmem:[#allocation2 + $0xb20] sm:$0xff]  }
 0x143   :  { %5765 = vmatpush3.bf16.msra.mxu0 %v6259_v18  ;;  %v6311_v18 = vld [vmem:[#allocation2 + $0xa08] sm:$0xff]  }
 0x144   :  { %5787 = vmatpush3.bf16.msra.mxu1 %v6260_v19  ;;  %5766 = vmatprep.subr.bf16.mxu0 %v6261_v20  ;;  %v6312_v19 = vld [vmem:[#allocation2 + $0xa88] sm:$0xff]   ;;  %v6313_v20 = vld [vmem:[#allocation2 + $0xa40] sm:$0xff]  }
 0x145   :  { %5788 = vmatprep.subr.bf16.mxu1 %v6262_v21  ;;  %v6314_v21 = vld [vmem:[#allocation2 + $0xac0] sm:$0xff]  }
 0x147   :  { %5767 = vmatpush3.bf16.msra.mxu0 %v6263_v22  ;;  %v6315_v22 = vld [vmem:[#allocation2 + $0xa00] sm:$0xff]  }
 0x148   :  { %5789 = vmatpush3.bf16.msra.mxu1 %v6264_v23  ;;  %5768 = vmatprep.subr.bf16.mxu0 %v6265_v24  ;;  %v6316_v23 = vld [vmem:[#allocation2 + $0xa80] sm:$0xff]   ;;  %v82_v24 = vld [vmem:[%s7033_s0 + $0x148] sm:$0xff] }
 0x149   :  { %5790 = vmatprep.subr.bf16.mxu1 %v6266_v25  ;;  %v138_v25 = vld [vmem:[%s7033_s0 + $0x308] sm:$0xff] }
 0x14b   :  { %5769 = vmatpush3.bf16.msra.mxu0 %v6267_v26  ;;  %v84_v26 = vld [vmem:[%s7033_s0 + $0x158] sm:$0xff] }
 0x14c   :  { %5791 = vmatpush3.bf16.msra.mxu1 %v6268_v27  ;;  %5770 = vmatprep.subr.bf16.mxu0 %v6269_v28  ;;  %v194_v27 = vpack.c.bf16 %v138_v25, %v82_v24  ;;  %v140_v28 = vld [vmem:[%s7033_s0 + $0x318] sm:$0xff]  ;;  %v6357_v24 = vld [vmem:[#allocation2 + $0xc68] sm:$0xff]  }
 0x14d   :  { %5792 = vmatprep.subr.bf16.mxu1 %v6270_v29  ;;  %v81_v29 = vld [vmem:[%s7033_s0 + $0x140] sm:$0xff]  ;;  %v6358_v25 = vld [vmem:[#allocation2 + $0xce8] sm:$0xff]  }
 0x14f   :  { %5771 = vmatpush3.bf16.msra.mxu0 %v6271_v30  ;;  %v137_v30 = vld [vmem:[%s7033_s0 + $0x300] sm:$0xff] }
 0x150   :  { %5793 = vmatpush3.bf16.msra.mxu1 %v6272_v31  ;;  %5772 = vmatprep.subr.bf16.mxu0 %v6273_v32  ;;  %v196_v31 = vpack.c.bf16 %v140_v28, %v84_v26  ;;  %v193_v32 = vpack.c.bf16 %v137_v30, %v81_v29  ;;  %v6359_v26 = vld [vmem:[#allocation2 + $0xc28] sm:$0xff]   ;;  %v6361_v28 = vld [vmem:[#allocation2 + $0xc60] sm:$0xff]  }
 0x151   :  { %5794 = vmatprep.subr.bf16.mxu1 %v6274_v33  ;;  %v83_v33 = vld [vmem:[%s7033_s0 + $0x150] sm:$0xff]  ;;  %v6362_v29 = vld [vmem:[#allocation2 + $0xce0] sm:$0xff]  }
 0x152   :  { %v6363_v30 = vld [vmem:[#allocation2 + $0xc20] sm:$0xff]  }
 0x153   :  { %5773 = vmatpush3.bf16.msra.mxu0 %v6275_v34  ;;  %v139_v34 = vld [vmem:[%s7033_s0 + $0x310] sm:$0xff] }
 0x154   :  { %5795 = vmatpush3.bf16.msra.mxu1 %v6276_v35  ;;  %5774 = vmatprep.subr.bf16.mxu0 %v6277_v36  ;;  %v195_v35 = vpack.c.bf16 %v139_v34, %v83_v33  ;;  %v6317_v36 = vld [vmem:[#allocation2 + $0xb78] sm:$0xff]  }
 0x155   :  { %5796 = vmatprep.subr.bf16.mxu1 %v6278_v37  ;;  %v6318_v37 = vld [vmem:[#allocation2 + $0xbf8] sm:$0xff]  }
 0x156   :  { %v6366_v33 = vld [vmem:[#allocation2 + $0xcd8] sm:$0xff]  }
 0x157   :  { %5775 = vmatpush3.bf16.msra.mxu0 %v6279_v38  ;;  %v6319_v38 = vld [vmem:[#allocation2 + $0xb38] sm:$0xff]  }
 0x158   :  { %5797 = vmatpush3.bf16.msra.mxu1 %v6280_v39  ;;  %5776 = vmatprep.subr.bf16.mxu0 %v6281_v40  ;;  %v6320_v39 = vld [vmem:[#allocation2 + $0xbb8] sm:$0xff]   ;;  %v6321_v40 = vld [vmem:[#allocation2 + $0xb70] sm:$0xff]  }
 0x159   :  { %5798 = vmatprep.subr.bf16.mxu1 %v6282_v41  ;;  %v6322_v41 = vld [vmem:[#allocation2 + $0xbf0] sm:$0xff]   ;;  %v6367_v34 = vld [vmem:[#allocation2 + $0xc18] sm:$0xff]  }
 0x15b   :  { %5777 = vmatpush3.bf16.msra.mxu0 %v6283_v42  ;;  %v6323_v42 = vld [vmem:[#allocation2 + $0xb30] sm:$0xff]  }
 0x15c   :  { %5799 = vmatpush3.bf16.msra.mxu1 %v6284_v43  ;;  %5806 = vmatprep.subr.bf16.mxu0 %v6285_v56  ;;  %v6324_v43 = vld [vmem:[#allocation2 + $0xbb0] sm:$0xff]  }
 0x15d   :  { %5828 = vmatprep.subr.bf16.mxu1 %v6286_v57  ;;  %v6337_v56 = vld [vmem:[#allocation2 + $0xb50] sm:$0xff]  }
 0x15e   :  { %4519 = vmatmul.mubr.bf16.vlgmr.msra.gmra.mxu0 %v189_v54  ;;  %v6335_v54 = vld [vmem:[#allocation2 + $0xb18] sm:$0xff]   ;;  %v6338_v57 = vld [vmem:[#allocation2 + $0xbd0] sm:$0xff]  }
 0x15f   :  { %4560 = vmatmul.mubr.bf16.vlgmr.msra.gmra.mxu1 %v191_v55  ;;  %5807 = vmatpush3.bf16.msra.mxu0 %v6287_v58  ;;  %v6336_v55 = vld [vmem:[#allocation2 + $0xb98] sm:$0xff]   ;;  %v6339_v58 = vld [vmem:[#allocation2 + $0xb10] sm:$0xff]  }
 0x160   :  { %5829 = vmatpush3.bf16.msra.mxu1 %v6288_v59  ;;  %5808 = vmatprep.subr.bf16.mxu0 %v6289_v60  ;;  %v6340_v59 = vld [vmem:[#allocation2 + $0xb90] sm:$0xff]   ;;  %v6341_v60 = vld [vmem:[#allocation2 + $0xb48] sm:$0xff]  }
 0x161   :  { %5830 = vmatprep.subr.bf16.mxu1 %v6290_v61  ;;  %4600 = vmatprep.mubr.bf16.mxu0 %v194_v27  ;;  %v6342_v61 = vld [vmem:[#allocation2 + $0xbc8] sm:$0xff]  }
 0x162   :  { %4641 = vmatprep.mubr.bf16.mxu1 %v196_v31  ;;  %v6360_v27 = vld [vmem:[#allocation2 + $0xca8] sm:$0xff]   ;;  %v6364_v31 = vld [vmem:[#allocation2 + $0xca0] sm:$0xff]  }
 0x163   :  { %5809 = vmatpush3.bf16.msra.mxu0 %v6291_v62  ;;  %v6343_v62 = vld [vmem:[#allocation2 + $0xb08] sm:$0xff]  }
 0x164   :  { %5831 = vmatpush3.bf16.msra.mxu1 %v6292_v63  ;;  %5810 = vmatprep.subr.bf16.mxu0 %v6293_v0  ;;  %v6344_v63 = vld [vmem:[#allocation2 + $0xb88] sm:$0xff]   ;;  %v6345_v0 = vld [vmem:[#allocation2 + $0xb40] sm:$0xff]  }
 0x165   :  { %5832 = vmatprep.subr.bf16.mxu1 %v6294_v1  ;;  %v6346_v1 = vld [vmem:[#allocation2 + $0xbc0] sm:$0xff]  }
 0x167   :  { %5811 = vmatpush3.bf16.msra.mxu0 %v6295_v2  ;;  %v6347_v2 = vld [vmem:[#allocation2 + $0xb00] sm:$0xff]  }
 0x168   :  { %5833 = vmatpush3.bf16.msra.mxu1 %v6296_v3  ;;  %5812 = vmatprep.subr.bf16.mxu0 %v6297_v4  ;;  %v6348_v3 = vld [vmem:[#allocation2 + $0xb80] sm:$0xff]   ;;  %v86_v4 = vld [vmem:[%s7033_s0 + $0x168] sm:$0xff] }
 0x169   :  { %5834 = vmatprep.subr.bf16.mxu1 %v6298_v5  ;;  %v142_v5 = vld [vmem:[%s7033_s0 + $0x328] sm:$0xff] }
 0x16b   :  { %5813 = vmatpush3.bf16.msra.mxu0 %v6299_v6  ;;  %v88_v6 = vld [vmem:[%s7033_s0 + $0x178] sm:$0xff] }
 0x16c   :  { %5835 = vmatpush3.bf16.msra.mxu1 %v6300_v7  ;;  %5814 = vmatprep.subr.bf16.mxu0 %v6301_v8  ;;  %v144_v7 = vld [vmem:[%s7033_s0 + $0x338] sm:$0xff]  ;;  %v198_v8 = vpack.c.bf16 %v142_v5, %v86_v4  ;;  %v6388_v4 = vld [vmem:[#allocation2 + $0xd28] sm:$0xff]  }
 0x16d   :  { %5836 = vmatprep.subr.bf16.mxu1 %v6302_v9  ;;  %v200_v9 = vpack.c.bf16 %v144_v7, %v88_v6  ;;  %v6389_v5 = vld [vmem:[#allocation2 + $0xda8] sm:$0xff]   ;;  %v6390_v6 = vld [vmem:[#allocation2 + $0xd60] sm:$0xff]  }
 0x16e   :  { %v6391_v7 = vld [vmem:[#allocation2 + $0xd20] sm:$0xff]  }
 0x16f   :  { %5815 = vmatpush3.bf16.msra.mxu0 %v6303_v10  ;;  %v85_v10 = vld [vmem:[%s7033_s0 + $0x160] sm:$0xff] }
 0x170   :  { %5837 = vmatpush3.bf16.msra.mxu1 %v6304_v11  ;;  %5816 = vmatprep.subr.bf16.mxu0 %v6305_v12  ;;  %v141_v11 = vld [vmem:[%s7033_s0 + $0x320] sm:$0xff]  ;;  %v87_v12 = vld [vmem:[%s7033_s0 + $0x170] sm:$0xff] }
 0x171   :  { %5838 = vmatprep.subr.bf16.mxu1 %v6306_v13  ;;  %v197_v13 = vpack.c.bf16 %v141_v11, %v85_v10  ;;  %v6394_v10 = vld [vmem:[#allocation2 + $0xd18] sm:$0xff]  }
 0x172   :  { %v6395_v11 = vld [vmem:[#allocation2 + $0xd98] sm:$0xff]  }
 0x173   :  { %5817 = vmatpush3.bf16.msra.mxu0 %v6307_v14  ;;  %v143_v14 = vld [vmem:[%s7033_s0 + $0x330] sm:$0xff] }
 0x174   :  { %5839 = vmatpush3.bf16.msra.mxu1 %v6308_v15  ;;  %5818 = vmatprep.subr.bf16.mxu0 %v6309_v16  ;;  %v199_v15 = vpack.c.bf16 %v143_v14, %v87_v12  ;;  %v6349_v16 = vld [vmem:[#allocation2 + $0xc78] sm:$0xff]   ;;  %v6396_v12 = vld [vmem:[#allocation2 + $0xd50] sm:$0xff]  }
 0x175   :  { %5840 = vmatprep.subr.bf16.mxu1 %v6310_v17  ;;  %v6350_v17 = vld [vmem:[#allocation2 + $0xcf8] sm:$0xff]   ;;  %v6398_v14 = vld [vmem:[#allocation2 + $0xd90] sm:$0xff]  }
 0x177   :  { %5819 = vmatpush3.bf16.msra.mxu0 %v6311_v18  ;;  %v6351_v18 = vld [vmem:[#allocation2 + $0xc38] sm:$0xff]  }
 0x178   :  { %5841 = vmatpush3.bf16.msra.mxu1 %v6312_v19  ;;  %5820 = vmatprep.subr.bf16.mxu0 %v6313_v20  ;;  %v6352_v19 = vld [vmem:[#allocation2 + $0xcb8] sm:$0xff]   ;;  %v6353_v20 = vld [vmem:[#allocation2 + $0xc70] sm:$0xff]  }
 0x179   :  { %5842 = vmatprep.subr.bf16.mxu1 %v6314_v21  ;;  %v6354_v21 = vld [vmem:[#allocation2 + $0xcf0] sm:$0xff]  }
 0x17b   :  { %5821 = vmatpush3.bf16.msra.mxu0 %v6315_v22  ;;  %v6355_v22 = vld [vmem:[#allocation2 + $0xc30] sm:$0xff]  }
 0x17c   :  { %5843 = vmatpush3.bf16.msra.mxu1 %v6316_v23  ;;  %5850 = vmatprep.subr.bf16.mxu0 %v6317_v36  ;;  %v6356_v23 = vld [vmem:[#allocation2 + $0xcb0] sm:$0xff]  }
 0x17d   :  { %5872 = vmatprep.subr.bf16.mxu1 %v6318_v37  ;;  %v6369_v36 = vld [vmem:[#allocation2 + $0xc50] sm:$0xff]  }
 0x17e   :  { %4601 = vmatmul.mubr.bf16.vlgmr.msra.gmra.mxu0 %v193_v32  ;;  %v6365_v32 = vld [vmem:[#allocation2 + $0xc58] sm:$0xff]   ;;  %v6370_v37 = vld [vmem:[#allocation2 + $0xcd0] sm:$0xff]  }
 0x17f   :  { %4642 = vmatmul.mubr.bf16.vlgmr.msra.gmra.mxu1 %v195_v35  ;;  %5851 = vmatpush3.bf16.msra.mxu0 %v6319_v38  ;;  %v6368_v35 = vld [vmem:[#allocation2 + $0xc98] sm:$0xff]   ;;  %v6371_v38 = vld [vmem:[#allocation2 + $0xc10] sm:$0xff]  }
 0x180   :  { %5873 = vmatpush3.bf16.msra.mxu1 %v6320_v39  ;;  %5852 = vmatprep.subr.bf16.mxu0 %v6321_v40  ;;  %v6372_v39 = vld [vmem:[#allocation2 + $0xc90] sm:$0xff]   ;;  %v6373_v40 = vld [vmem:[#allocation2 + $0xc48] sm:$0xff]  }
 0x181   :  { %5874 = vmatprep.subr.bf16.mxu1 %v6322_v41  ;;  %4682 = vmatprep.mubr.bf16.mxu0 %v198_v8  ;;  %v6374_v41 = vld [vmem:[#allocation2 + $0xcc8] sm:$0xff]   ;;  %v6392_v8 = vld [vmem:[#allocation2 + $0xda0] sm:$0xff]  }
 0x182   :  { %4723 = vmatprep.mubr.bf16.mxu1 %v200_v9  ;;  %v6393_v9 = vld [vmem:[#allocation2 + $0xd58] sm:$0xff]  }
 0x183   :  { %5853 = vmatpush3.bf16.msra.mxu0 %v6323_v42  ;;  %v6375_v42 = vld [vmem:[#allocation2 + $0xc08] sm:$0xff]  }
 0x184   :  { %5875 = vmatpush3.bf16.msra.mxu1 %v6324_v43  ;;  %5854 = vmatprep.subr.bf16.mxu0 %v6325_v44  ;;  %v6376_v43 = vld [vmem:[#allocation2 + $0xc88] sm:$0xff]   ;;  %v6377_v44 = vld [vmem:[#allocation2 + $0xc40] sm:$0xff]  }
 0x185   :  { %5876 = vmatprep.subr.bf16.mxu1 %v6326_v45  ;;  %v6378_v45 = vld [vmem:[#allocation2 + $0xcc0] sm:$0xff]  }
 0x187   :  { %5855 = vmatpush3.bf16.msra.mxu0 %v6327_v46  ;;  %v6379_v46 = vld [vmem:[#allocation2 + $0xc00] sm:$0xff]  }
 0x188   :  { %5877 = vmatpush3.bf16.msra.mxu1 %v6328_v47  ;;  %5856 = vmatprep.subr.bf16.mxu0 %v6329_v48  ;;  %v6380_v47 = vld [vmem:[#allocation2 + $0xc80] sm:$0xff]   ;;  %v90_v48 = vld [vmem:[%s7033_s0 + $0x188] sm:$0xff] }
 0x189   :  { %5878 = vmatprep.subr.bf16.mxu1 %v6330_v49  ;;  %v146_v49 = vld [vmem:[%s7033_s0 + $0x348] sm:$0xff] }
 0x18b   :  { %5857 = vmatpush3.bf16.msra.mxu0 %v6331_v50  ;;  %v202_v50 = vpack.c.bf16 %v146_v49, %v90_v48 }
 0x18c   :  { %5879 = vmatpush3.bf16.msra.mxu1 %v6332_v51  ;;  %5858 = vmatprep.subr.bf16.mxu0 %v6333_v52  ;;  %v92_v51 = vld [vmem:[%s7033_s0 + $0x198] sm:$0xff] }
 0x18d   :  { %5880 = vmatprep.subr.bf16.mxu1 %v6334_v53  ;;  %v148_v52 = vld [vmem:[%s7033_s0 + $0x358] sm:$0xff]  ;;  %v89_v53 = vld [vmem:[%s7033_s0 + $0x180] sm:$0xff] }
 0x18f   :  { %5859 = vmatpush3.bf16.msra.mxu0 %v6335_v54  ;;  %v204_v54 = vpack.c.bf16 %v148_v52, %v92_v51 }
 0x190   :  { %5881 = vmatpush3.bf16.msra.mxu1 %v6336_v55  ;;  %5860 = vmatprep.subr.bf16.mxu0 %v6337_v56  ;;  %v145_v55 = vld [vmem:[%s7033_s0 + $0x340] sm:$0xff]  ;;  %v91_v56 = vld [vmem:[%s7033_s0 + $0x190] sm:$0xff] }
 0x191   :  { %5882 = vmatprep.subr.bf16.mxu1 %v6338_v57  ;;  %v147_v57 = vld [vmem:[%s7033_s0 + $0x350] sm:$0xff] }
 0x193   :  { %5861 = vmatpush3.bf16.msra.mxu0 %v6339_v58  ;;  %v201_v58 = vpack.c.bf16 %v145_v55, %v89_v53 }
 0x194   :  { %5883 = vmatpush3.bf16.msra.mxu1 %v6340_v59  ;;  %5862 = vmatprep.subr.bf16.mxu0 %v6341_v60  ;;  %v203_v59 = vpack.c.bf16 %v147_v57, %v91_v56  ;;  %v6381_v60 = vld [vmem:[#allocation2 + $0xd78] sm:$0xff]  }
 0x195   :  { %5884 = vmatprep.subr.bf16.mxu1 %v6342_v61  ;;  %v6454_v61 = vmov 0  }
 0x197   :  { %5863 = vmatpush3.bf16.msra.mxu0 %v6343_v62  ;;  %v6382_v62 = vld [vmem:[#allocation2 + $0xd38] sm:$0xff]  }
 0x198   :  { %5885 = vmatpush3.bf16.msra.mxu1 %v6344_v63  ;;  %5864 = vmatprep.subr.bf16.mxu0 %v6345_v0  ;;  %v6383_v63 = vld [vmem:[#allocation2 + $0xdb8] sm:$0xff]   ;;  %v6384_v0 = vld [vmem:[#allocation2 + $0xd70] sm:$0xff]  }
 0x199   :  { %5886 = vmatprep.subr.bf16.mxu1 %v6346_v1  ;;  %v6385_v1 = vld [vmem:[#allocation2 + $0xd30] sm:$0xff]  }
 0x19b   :  { %5865 = vmatpush3.bf16.msra.mxu0 %v6347_v2  ;;  %v6386_v2 = vld [vmem:[#allocation2 + $0xdb0] sm:$0xff]  }
 0x19c   :  { %5887 = vmatpush3.bf16.msra.mxu1 %v6348_v3  ;;  %5894 = vmatprep.subr.bf16.mxu0 %v6349_v16  ;;  %v6387_v3 = vld [vmem:[#allocation2 + $0xd68] sm:$0xff]  }
 0x19d   :  { %5916 = vmatprep.subr.bf16.mxu1 %v6350_v17  ;;  %v6400_v16 = vld [vmem:[#allocation2 + $0xd08] sm:$0xff]  }
 0x19e   :  { %4683 = vmatmul.mubr.bf16.vlgmr.msra.gmra.mxu0 %v197_v13  ;;  %v6397_v13 = vld [vmem:[#allocation2 + $0xd10] sm:$0xff]   ;;  %v6401_v17 = vld [vmem:[#allocation2 + $0xd88] sm:$0xff]  }
 0x19f   :  { %4724 = vmatmul.mubr.bf16.vlgmr.msra.gmra.mxu1 %v199_v15  ;;  %5895 = vmatpush3.bf16.msra.mxu0 %v6351_v18  ;;  %v6399_v15 = vld [vmem:[#allocation2 + $0xd48] sm:$0xff]  }
 0x1a0   :  { %5917 = vmatpush3.bf16.msra.mxu1 %v6352_v19  ;;  %5896 = vmatprep.subr.bf16.mxu0 %v6353_v20  ;;  %v94_v18 = vld [vmem:[%s7033_s0 + $0x1a8] sm:$0xff]  ;;  %v6402_v20 = vld [vmem:[#allocation2 + $0xd40] sm:$0xff]  }
 0x1a1   :  { %5918 = vmatprep.subr.bf16.mxu1 %v6354_v21  ;;  %4764 = vmatprep.mubr.bf16.mxu0 %v202_v50  ;;  %v150_v19 = vld [vmem:[%s7033_s0 + $0x368] sm:$0xff] }
 0x1a2   :  { %4805 = vmatprep.mubr.bf16.mxu1 %v204_v54  ;;  %v206_v21 = vpack.c.bf16 %v150_v19, %v94_v18 }
 0x1a3   :  { %5897 = vmatpush3.bf16.msra.mxu0 %v6355_v22  ;;  %v96_v22 = vld [vmem:[%s7033_s0 + $0x1b8] sm:$0xff] }
 0x1a4   :  { %5919 = vmatpush3.bf16.msra.mxu1 %v6356_v23  ;;  %5898 = vmatprep.subr.bf16.mxu0 %v6357_v24  ;;  %v152_v23 = vld [vmem:[%s7033_s0 + $0x378] sm:$0xff]  ;;  %v6403_v24 = vld [vmem:[#allocation2 + $0xd00] sm:$0xff]  }
 0x1a5   :  { %5920 = vmatprep.subr.bf16.mxu1 %v6358_v25  ;;  %v208_v25 = vpack.c.bf16 %v152_v23, %v96_v22 }
 0x1a7   :  { %5899 = vmatpush3.bf16.msra.mxu0 %v6359_v26  ;;  %v6404_v26 = vld [vmem:[#allocation2 + $0xd80] sm:$0xff]  }
 0x1a8   :  { %5921 = vmatpush3.bf16.msra.mxu1 %v6360_v27  ;;  %5900 = vmatprep.subr.bf16.mxu0 %v6361_v28  ;;  %v93_v27 = vld [vmem:[%s7033_s0 + $0x1a0] sm:$0xff] }
 0x1a9   :  { %5922 = vmatprep.subr.bf16.mxu1 %v6362_v29  ;;  %v149_v28 = vld [vmem:[%s7033_s0 + $0x360] sm:$0xff] }
 0x1aa   :  { %v205_v29 = vpack.c.bf16 %v149_v28, %v93_v27 }
 0x1ab   :  { %5901 = vmatpush3.bf16.msra.mxu0 %v6363_v30  ;;  %v6405_v30 = vld [vmem:[#allocation2 + $0xdc0] sm:$0xff]  }
 0x1ac   :  { %5923 = vmatpush3.bf16.msra.mxu1 %v6364_v31  ;;  %5902 = vmatprep.subr.bf16.mxu0 %v6365_v32  ;;  %v95_v31 = vld [vmem:[%s7033_s0 + $0x1b0] sm:$0xff] }
 0x1ad   :  { %5924 = vmatprep.subr.bf16.mxu1 %v6366_v33  ;;  %v151_v32 = vld [vmem:[%s7033_s0 + $0x370] sm:$0xff] }
 0x1ae   :  { %v207_v33 = vpack.c.bf16 %v151_v32, %v95_v31  ;;  %v4914_v31 = vld [vmem:[#allocation4] ss:$0 sm:$0xff] }
 0x1af   :  { %5903 = vmatpush3.bf16.msra.mxu0 %v6367_v34  ;;  %v5382_v34 = vpop.f32.mrf.mxu0 }
 0x1b0   :  { %5925 = vmatpush3.bf16.msra.mxu1 %v6368_v35  ;;  %5904 = vmatprep.subr.bf16.mxu0 %v6369_v36  ;;  %v6826_v36 = vpop.f32.mrf.mxu1 }
 0x1b1   :  { %5926 = vmatprep.subr.bf16.mxu1 %v6370_v37  ;;  %v5383_v35 = vpop.f32.mrf.mxu0 }
 0x1b3   :  { %5905 = vmatpush3.bf16.msra.mxu0 %v6371_v38  ;;  %v6828_v37 = vpop.f32.mrf.mxu0  ;;  %v5405_v38 = vpop.f32.mrf.mxu1 }
 0x1b4   :  { %5927 = vmatpush3.bf16.msra.mxu1 %v6372_v39  ;;  %5906 = vmatprep.subr.bf16.mxu0 %v6373_v40 }
 0x1b5   :  { %5928 = vmatprep.subr.bf16.mxu1 %v6374_v41  ;;  %v5386_v39 = vpop.f32.mrf.mxu0  ;;  %v6830_v40 = vpop.f32.mrf.mxu1 }
 0x1b7   :  { %5907 = vmatpush3.bf16.msra.mxu0 %v6375_v42  ;;  %v5426_v41 = vpop.f32.mrf.mxu0  ;;  %v6832_v42 = vpop.f32.mrf.mxu1 }
 0x1b8   :  { %5929 = vmatpush3.bf16.msra.mxu1 %v6376_v43  ;;  %5908 = vmatprep.subr.bf16.mxu0 %v6377_v44 }
 0x1b9   :  { %5930 = vmatprep.subr.bf16.mxu1 %v6378_v45  ;;  %v5427_v43 = vpop.f32.mrf.mxu0  ;;  %v6834_v44 = vpop.f32.mrf.mxu1 }
 0x1bb   :  { %5909 = vmatpush3.bf16.msra.mxu0 %v6379_v46  ;;  %v6836_v45 = vpop.f32.mrf.mxu0  ;;  %v6838_v46 = vpop.f32.mrf.mxu1 }
 0x1bc   :  { %5931 = vmatpush3.bf16.msra.mxu1 %v6380_v47  ;;  %5938 = vmatprep.subr.bf16.mxu0 %v6381_v60 }
 0x1bd   :  { %4855 = vmatprep.subr.bf16.mxu1 %v6454_v61  ;;  %v6840_v47 = vpop.f32.mrf.mxu0  ;;  %v6842_v48 = vpop.f32.mrf.mxu1 }
 0x1be   :  { %4765 = vmatmul.mubr.bf16.vlgmr.msra.gmra.mxu0 %v201_v58 }
 0x1bf   :  { %4806 = vmatmul.mubr.bf16.vlgmr.msra.gmra.mxu1 %v203_v59  ;;  %5939 = vmatpush3.bf16.msra.mxu0 %v6382_v62  ;;  %v6844_v49 = vpop.f32.mrf.mxu0  ;;  %v6846_v50 = vpop.f32.mrf.mxu1 }
 0x1c0   :  { %4856 = vmatpush1.bf16.msra.mxu1 %v6383_v63  ;;  %5940 = vmatprep.subr.bf16.mxu0 %v6384_v0 }
 0x1c1   :  { %4857 = vmatprep.subr.bf16.mxu1 %v6454_v61  ;;  %4846 = vmatprep.mubr.bf16.mxu0 %v206_v21  ;;  %v6848_v51 = vpop.f32.mrf.mxu0  ;;  %v6850_v52 = vpop.f32.mrf.mxu1 }
 0x1c2   :  { %5356 = vmatprep.mubr.msk.bf16.mxu1 %vm3744_vm0, %v208_v25 }
 0x1c3   :  { %5941 = vmatpush3.bf16.msra.mxu0 %v6385_v1  ;;  %v6852_v53 = vpop.f32.mrf.mxu0  ;;  %v6854_v54 = vpop.f32.mrf.mxu1 }
 0x1c4   :  { %4858 = vmatpush1.bf16.msra.mxu1 %v6386_v2  ;;  %5942 = vmatprep.subr.bf16.mxu0 %v6387_v3 }
 0x1c5   :  { %4859 = vmatprep.subr.bf16.mxu1 %v6454_v61  ;;  %v6856_v55 = vpop.f32.mrf.mxu0  ;;  %v6858_v56 = vpop.f32.mrf.mxu1 }
 0x1c7   :  { %5943 = vmatpush3.bf16.msra.mxu0 %v6388_v4  ;;  %v6860_v57 = vpop.f32.mrf.mxu0  ;;  %v6862_v58 = vpop.f32.mrf.mxu1 }
 0x1c8   :  { %4860 = vmatpush1.bf16.msra.mxu1 %v6389_v5  ;;  %5944 = vmatprep.subr.bf16.mxu0 %v6390_v6 }
 0x1c9   :  { %4861 = vmatprep.subr.bf16.mxu1 %v6454_v61  ;;  %v6864_v59 = vpop.f32.mrf.mxu0  ;;  %v6866_v60 = vpop.f32.mrf.mxu1 }
 0x1cb   :  { %5945 = vmatpush3.bf16.msra.mxu0 %v6391_v7  ;;  %v6870_v62 = vpop.f32.mrf.mxu1 }
 0x1cc   :  { %4862 = vmatpush1.bf16.msra.mxu1 %v6392_v8  ;;  %5946 = vmatprep.subr.bf16.mxu0 %v6393_v9 }
 0x1cd   :  { %4863 = vmatprep.subr.bf16.mxu1 %v6454_v61  ;;  %v6874_v0 = vpop.f32.mrf.mxu1 }
 0x1cf   :  { %5947 = vmatpush3.bf16.msra.mxu0 %v6394_v10  ;;  %v6878_v2 = vpop.f32.mrf.mxu1 }
 0x1d0   :  { %4864 = vmatpush1.bf16.msra.mxu1 %v6395_v11  ;;  %5948 = vmatprep.subr.bf16.mxu0 %v6396_v12 }
 0x1d1   :  { %4865 = vmatprep.subr.bf16.mxu1 %v6454_v61  ;;  %v6882_v4 = vpop.f32.mrf.mxu1 }
 0x1d3   :  { %5949 = vmatpush3.bf16.msra.mxu0 %v6397_v13  ;;  %v6886_v6 = vpop.f32.mrf.mxu1 }
 0x1d4   :  { %4866 = vmatpush1.bf16.msra.mxu1 %v6398_v14  ;;  %5950 = vmatprep.subr.bf16.mxu0 %v6399_v15 }
 0x1d5   :  { %4867 = vmatprep.subr.bf16.mxu1 %v6454_v61  ;;  %v6890_v8 = vpop.f32.mrf.mxu1 }
 0x1d7   :  { %5951 = vmatpush3.bf16.msra.mxu0 %v6400_v16  ;;  %v6894_v10 = vpop.f32.mrf.mxu1 }
 0x1d8   :  { %4868 = vmatpush1.bf16.msra.mxu1 %v6401_v17  ;;  %5952 = vmatprep.subr.bf16.mxu0 %v6402_v20 }
 0x1d9   :  { %4869 = vmatprep.subr.bf16.mxu1 %v6454_v61  ;;  %v6898_v12 = vpop.f32.mrf.mxu1 }
 0x1db   :  { %5953 = vmatpush3.bf16.msra.mxu0 %v6403_v24  ;;  %v6902_v14 = vpop.f32.mrf.mxu1 }
 0x1dc   :  { %4870 = vmatpush1.bf16.msra.mxu1 %v6404_v26 }
 0x1dd   :  { %4885 = vmatprep.subr.bf16.mxu1 %v6454_v61  ;;  %v6868_v61 = vpop.f32.mrf.mxu0  ;;  %v6906_v16 = vpop.f32.mrf.mxu1 }
 0x1de   :  { %4847 = vmatmul.mubr.bf16.vlgmr.msra.gmra.mxu0 %v205_v29 }
 0x1df   :  { %v6872_v63 = vpop.f32.mrf.mxu0  ;;  %v6910_v18 = vpop.f32.mrf.mxu1 }
 0x1e0   :  { %4886 = vmatpush2.bf16.msra.mxu1 %v6405_v30  ;;  %v5384_v30 = vadd.f32 %v5383_v35, %v5382_v34  ;;  %v5409_v35 = vadd.f32 %v6832_v42, %v6830_v40  ;;  %v5453_v40 = vadd.f32 %v6846_v50, %v6842_v48  ;;  %v5497_v48 = vadd.f32 %v6862_v58, %v6858_v56 }
 0x1e1   :  { %v6876_v1 = vpop.f32.mrf.mxu0  ;;  %v6914_v20 = vpop.f32.mrf.mxu1  ;;  %v5541_v56 = vadd.f32 %v6878_v2, %v6874_v0  ;;  %v5585_v0 = vadd.f32 %v6894_v10, %v6890_v8 }
 0x1e2   :  { %7037 = vst [vmem:[#allocation8_spill] sm:$0xff] %v6914_v20 }
 0x1e3   :  { %4888 = vmatmul.mubr.bf16.vlgmr.msra.gmra.mxu1 %v207_v33  ;;  %v6880_v3 = vpop.f32.mrf.mxu0  ;;  %v6918_v22 = vpop.f32.mrf.mxu1 }
 0x1e4   :  { %7039 = vst [vmem:[#allocation10_spill] sm:$0xff] %v6918_v22 }
 0x1e5   :  { %v6884_v5 = vpop.f32.mrf.mxu0  ;;  %v6922_v24 = vpop.f32.mrf.mxu1 }
 0x1e6   :  { %7041 = vst [vmem:[#allocation12_spill] sm:$0xff] %v6922_v24  ;;  %v5387_v24 = vadd.f32 %v5386_v39, %v6828_v37  ;;  %v5431_v37 = vadd.f32 %v6840_v47, %v6836_v45  ;;  %v5475_v45 = vadd.f32 %v6856_v55, %v6852_v53  ;;  %v5519_v53 = vadd.f32 %v6872_v63, %v6868_v61 }
 0x1e7   :  { %v6888_v7 = vpop.f32.mrf.mxu0  ;;  %v6926_v26 = vpop.f32.mrf.mxu1 }
 0x1e8   :  { %7043 = vst [vmem:[#allocation14_spill] sm:$0xff] %v6926_v26  ;;  %v5563_v61 = vadd.f32 %v6888_v7, %v6884_v5 }
 0x1e9   :  { %v6892_v9 = vpop.f32.mrf.mxu0  ;;  %v6930_v28 = vpop.f32.mrf.mxu1  ;;  %v7047_v10 = vld [vmem:[#allocation8_spill] sm:$0xff] }
 0x1ea   :  { %7045 = vst [vmem:[#allocation16_spill] sm:$0xff] %v6930_v28  ;;  %v3786_v28 = vadd.f32 %v5387_v24, %v4914_v31 }
 0x1eb   :  { %v6896_v11 = vpop.f32.mrf.mxu0  ;;  %v6934_v32 = vpop.f32.mrf.mxu1 }
 0x1ec   :  { %v3827_v39 = vadd.f32 %v5409_v35, %v3786_v28 }
 0x1ed   :  { %v6900_v13 = vpop.f32.mrf.mxu0 }
 0x1ef   :  { %v6904_v15 = vpop.f32.mrf.mxu0 }
 0x1f0   :  { %v5607_v5 = vadd.f32 %v6904_v15, %v6900_v13 }
 0x1f1   :  { %v6908_v17 = vpop.f32.mrf.mxu0 }
 0x1f3   :  { %v6912_v19 = vpop.f32.mrf.mxu0 }
 0x1f4   :  { %v5648_v7 = vadd.f32 %v6912_v19, %v6908_v17 }
 0x1f5   :  { %v6916_v21 = vpop.f32.mrf.mxu0 }
 0x1f6   :  { %7038 = vst [vmem:[#allocation9_spill] sm:$0xff] %v6916_v21  ;;  %v3783_v21 = vadd.f32 %v5384_v30, %v4914_v31 }
 0x1f7   :  { %v6920_v23 = vpop.f32.mrf.mxu0 }
 0x1f8   :  { %7040 = vst [vmem:[#allocation11_spill] sm:$0xff] %v6920_v23  ;;  %v5406_v23 = vadd.f32 %v5405_v38, %v6826_v36  ;;  %v5450_v36 = vadd.f32 %v6838_v46, %v6834_v44  ;;  %v5494_v44 = vadd.f32 %v6854_v54, %v6850_v52  ;;  %v5538_v52 = vadd.f32 %v6870_v62, %v6866_v60 }
 0x1f9   :  { %v6924_v25 = vpop.f32.mrf.mxu0  ;;  %v5582_v60 = vadd.f32 %v6886_v6, %v6882_v4  ;;  %v5626_v4 = vadd.f32 %v6902_v14, %v6898_v12 }
 0x1fa   :  { %7042 = vst [vmem:[#allocation13_spill] sm:$0xff] %v6924_v25  ;;  %v6940_v25 = vpop.f32.mrf.mxu1  ;;  %v3824_v22 = vadd.f32 %v5406_v23, %v3783_v21  ;;  %v3868_v23 = vadd.f32 %v5431_v37, %v3827_v39 }
 0x1fb   :  { %v6928_v27 = vpop.f32.mrf.mxu0 }
 0x1fc   :  { %7044 = vst [vmem:[#allocation15_spill] sm:$0xff] %v6928_v27  ;;  %v5428_v27 = vadd.f32 %v5427_v43, %v5426_v41  ;;  %v6944_v20 = vpop.f32.mrf.mxu1  ;;  %v5472_v41 = vadd.f32 %v6848_v51, %v6844_v49  ;;  %v3909_v47 = vadd.f32 %v5453_v40, %v3868_v23  ;;  %v5516_v49 = vadd.f32 %v6864_v59, %v6860_v57 }
 0x1fd   :  { %v6932_v29 = vpop.f32.mrf.mxu0  ;;  %v5560_v59 = vadd.f32 %v6880_v3, %v6876_v1  ;;  %v5604_v1 = vadd.f32 %v6896_v11, %v6892_v9  ;;  %v7049_v12 = vld [vmem:[#allocation9_spill] sm:$0xff] }
 0x1fe   :  { %v3950_v28 = vadd.f32 %v5475_v45, %v3909_v47 }
 0x1ff   :  { %v6936_v33 = vpop.f32.mrf.mxu0  ;;  %v6954_v38 = vpop.f32.mrf.mxu1  ;;  %v7050_v14 = vld [vmem:[#allocation11_spill] sm:$0xff] }
 0x200   :  { %7046 = vst [vmem:[#allocation17_spill] sm:$0xff] %v6936_v33  ;;  %v3865_v33 = vadd.f32 %v5428_v27, %v3824_v22  ;;  %v3991_v57 = vadd.f32 %v5497_v48, %v3950_v28  ;;  %v5651_v47 = vadd.f32 %v7050_v14, %v7049_v12 }
 0x201   :  { %v6942_v26 = vpop.f32.mrf.mxu0  ;;  %v6960_v24 = vpop.f32.mrf.mxu1 }
 0x202   :  { %v3906_v21 = vadd.f32 %v5450_v36, %v3865_v33  ;;  %v4032_v33 = vadd.f32 %v5519_v53, %v3991_v57  ;;  %v7054_v53 = vld [vmem:[#allocation14_spill] sm:$0xff] }
 0x203   :  { %v6946_v34 = vpop.f32.mrf.mxu0  ;;  %v6972_v51 = vpop.f32.mrf.mxu1 }
 0x204   :  { %v3947_v42 = vadd.f32 %v5472_v41, %v3906_v21  ;;  %v4073_v63 = vadd.f32 %v5541_v56, %v4032_v33 }
 0x205   :  { %v6958_v43 = vpop.f32.mrf.mxu0  ;;  %v6982_v54 = vpop.f32.mrf.mxu1 }
 0x206   :  { %v3988_v27 = vadd.f32 %v5494_v44, %v3947_v42  ;;  %v4114_v37 = vadd.f32 %v5563_v61, %v4073_v63  ;;  %v5629_v42 = vadd.f32 %v6910_v18, %v6906_v16  ;;  %v7048_v44 = vld [vmem:[#allocation10_spill] sm:$0xff]  ;;  %v7055_v18 = vld [vmem:[#allocation16_spill] sm:$0xff]  ;;  %v5736_v61 = vadd.f32 %v6946_v34, %v6942_v26 }
 0x207   :  { %v6968_v46 = vpop.f32.mrf.mxu0  ;;  %v5670_v45 = vadd.f32 %v7048_v44, %v7047_v10 }
 0x208   :  { %v4029_v50 = vadd.f32 %v5516_v49, %v3988_v27  ;;  %v4155_v6 = vadd.f32 %v5585_v0, %v4114_v37  ;;  %v7051_v49 = vld [vmem:[#allocation13_spill] sm:$0xff]  ;;  %v7052_v27 = vld [vmem:[#allocation15_spill] sm:$0xff]  ;;  %v5717_v0 = vadd.f32 %v6944_v20, %v6940_v25 }
 0x209   :  { %v5692_v17 = vadd.f32 %v7052_v27, %v7051_v49 }
 0x20a   :  { %v4070_v31 = vadd.f32 %v5538_v52, %v4029_v50  ;;  %v4196_v23 = vadd.f32 %v5607_v5, %v4155_v6  ;;  %v7053_v52 = vld [vmem:[#allocation12_spill] sm:$0xff] }
 0x20b   :  { %v5673_v57 = vadd.f32 %v7054_v53, %v7053_v52 }
 0x20c   :  { %v4111_v58 = vadd.f32 %v5560_v59, %v4070_v31  ;;  %v4237_v15 = vadd.f32 %v5629_v42, %v4196_v23  ;;  %v5714_v59 = vadd.f32 %v6934_v32, %v7055_v18  ;;  %v7056_v31 = vld [vmem:[#allocation17_spill] sm:$0xff]  ;;  %v5758_v32 = vadd.f32 %v6960_v24, %v6954_v38 }
 0x20d   :  { %v5695_v33 = vadd.f32 %v7056_v31, %v6932_v29  ;;  %v5739_v29 = vadd.f32 %v6968_v46, %v6958_v43  ;;  %v5761_v23 = vadd.f32 %v6982_v54, %v6972_v51 }
 0x20e   :  { %v4152_v36 = vadd.f32 %v5582_v60, %v4111_v58  ;;  %v4278_v48 = vadd.f32 %v5651_v47, %v4237_v15 }
 0x210   :  { %v4193_v2 = vadd.f32 %v5604_v1, %v4152_v36  ;;  %v4319_v60 = vadd.f32 %v5673_v57, %v4278_v48 }
 0x212   :  { %v4234_v21 = vadd.f32 %v5626_v4, %v4193_v2  ;;  %v4360_v1 = vadd.f32 %v5695_v33, %v4319_v60 }
 0x214   :  { %v4275_v8 = vadd.f32 %v5648_v7, %v4234_v21  ;;  %v4401_v5 = vadd.f32 %v5717_v0, %v4360_v1 }
 0x216   :  { %v4316_v28 = vadd.f32 %v5670_v45, %v4275_v8  ;;  %v4442_v34 = vadd.f32 %v5739_v29, %v4401_v5 }
 0x218   :  { %v4357_v16 = vadd.f32 %v5692_v17, %v4316_v28  ;;  %v4483_v38 = vadd.f32 %v5761_v23, %v4442_v34 }
 0x21a   :  { %v4398_v63 = vadd.f32 %v5714_v59, %v4357_v16 }
 0x21c   :  { %v4439_v2 = vadd.f32 %v5736_v61, %v4398_v63 }
 0x21e   :  { %v6974_v22 = vpop.f32.mrf.mxu0  ;;  %v4480_v26 = vadd.f32 %v5758_v32, %v4439_v2 }
 0x21f   :  { %v6986_v30 = vpop.f32.mrf.mxu1 }
 0x220   :  { %v5779_v55 = vpop.f32.mrf.mxu0 }
 0x221   :  { %v5801_v62 = vpop.f32.mrf.mxu1  ;;  %v5780_v6 = vadd.f32 %v5779_v55, %v6974_v22 }
 0x222   :  { %v5781_v35 = vpop.f32.mrf.mxu0  ;;  %v5802_v20 = vadd.f32 %v5801_v62, %v6986_v30 }
 0x223   :  { %v5803_v39 = vpop.f32.mrf.mxu1  ;;  %v4521_v42 = vadd.f32 %v5780_v6, %v4480_v26 }
 0x224   :  { %v5782_v3 = vpop.f32.mrf.mxu0 }
 0x225   :  { %v5804_v9 = vpop.f32.mrf.mxu1  ;;  %v5783_v25 = vadd.f32 %v5782_v3, %v5781_v35  ;;  %v4562_v46 = vadd.f32 %v5802_v20, %v4521_v42 }
 0x226   :  { %v5805_v45 = vadd.f32 %v5804_v9, %v5803_v39 }
 0x227   :  { %v4524_v44 = vadd.f32 %v5783_v25, %v4483_v38 }
 0x229   :  { %v4565_v15 = vadd.f32 %v5805_v45, %v4524_v44 }
 0x23e   :  { %v5822_v41 = vpop.f32.mrf.mxu0 }
 0x23f   :  { %v5844_v40 = vpop.f32.mrf.mxu1 }
 0x240   :  { %v5823_v11 = vpop.f32.mrf.mxu0 }
 0x241   :  { %v5845_v19 = vpop.f32.mrf.mxu1  ;;  %v5824_v24 = vadd.f32 %v5823_v11, %v5822_v41 }
 0x242   :  { %v5825_v13 = vpop.f32.mrf.mxu0  ;;  %v5846_v55 = vadd.f32 %v5845_v19, %v5844_v40 }
 0x243   :  { %v5847_v56 = vpop.f32.mrf.mxu1  ;;  %v4603_v22 = vadd.f32 %v5824_v24, %v4562_v46 }
 0x244   :  { %v5826_v50 = vpop.f32.mrf.mxu0 }
 0x245   :  { %v5848_v36 = vpop.f32.mrf.mxu1  ;;  %v5827_v12 = vadd.f32 %v5826_v50, %v5825_v13  ;;  %v4644_v54 = vadd.f32 %v5846_v55, %v4603_v22 }
 0x246   :  { %v5849_v35 = vadd.f32 %v5848_v36, %v5847_v56 }
 0x247   :  { %v4606_v27 = vadd.f32 %v5827_v12, %v4565_v15 }
 0x249   :  { %v4647_v17 = vadd.f32 %v5849_v35, %v4606_v27 }
 0x25e   :  { %v5866_v58 = vpop.f32.mrf.mxu0 }
 0x25f   :  { %v5888_v4 = vpop.f32.mrf.mxu1 }
 0x260   :  { %v5867_v37 = vpop.f32.mrf.mxu0 }
 0x261   :  { %v5889_v21 = vpop.f32.mrf.mxu1  ;;  %v5868_v49 = vadd.f32 %v5867_v37, %v5866_v58 }
 0x262   :  { %v5869_v7 = vpop.f32.mrf.mxu0  ;;  %v5890_v3 = vadd.f32 %v5889_v21, %v5888_v4 }
 0x263   :  { %v5891_v10 = vpop.f32.mrf.mxu1  ;;  %v4685_v62 = vadd.f32 %v5868_v49, %v4644_v54 }
 0x264   :  { %v5870_v8 = vpop.f32.mrf.mxu0 }
 0x265   :  { %v5892_v14 = vpop.f32.mrf.mxu1  ;;  %v5871_v41 = vadd.f32 %v5870_v8, %v5869_v7  ;;  %v4726_v39 = vadd.f32 %v5890_v3, %v4685_v62 }
 0x266   :  { %v5893_v13 = vadd.f32 %v5892_v14, %v5891_v10 }
 0x267   :  { %v4688_v9 = vadd.f32 %v5871_v41, %v4647_v17 }
 0x269   :  { %v4729_v57 = vadd.f32 %v5893_v13, %v4688_v9 }
 0x27e   :  { %v5910_v43 = vpop.f32.mrf.mxu0 }
 0x27f   :  { %v5932_v51 = vpop.f32.mrf.mxu1 }
 0x280   :  { %v5911_v47 = vpop.f32.mrf.mxu0 }
 0x281   :  { %v5933_v11 = vpop.f32.mrf.mxu1  ;;  %v5912_v28 = vadd.f32 %v5911_v47, %v5910_v43 }
 0x282   :  { %v5913_v30 = vpop.f32.mrf.mxu0  ;;  %v5934_v50 = vadd.f32 %v5933_v11, %v5932_v51 }
 0x283   :  { %v5935_v40 = vpop.f32.mrf.mxu1  ;;  %v4767_v19 = vadd.f32 %v5912_v28, %v4726_v39 }
 0x284   :  { %v5914_v48 = vpop.f32.mrf.mxu0 }
 0x285   :  { %v5915_v52 = vadd.f32 %v5914_v48, %v5913_v30  ;;  %v5936_v16 = vpop.f32.mrf.mxu1  ;;  %v4808_v59 = vadd.f32 %v5934_v50, %v4767_v19 }
 0x286   :  { %v5937_v60 = vadd.f32 %v5936_v16, %v5935_v40 }
 0x287   :  { %v4770_v31 = vadd.f32 %v5915_v52, %v4729_v57 }
 0x289   :  { %v4811_v36 = vadd.f32 %v5937_v60, %v4770_v31 }
 0x29e   :  { %v5954_v53 = vpop.f32.mrf.mxu0 }
 0x2a0   :  { %v5955_v18 = vpop.f32.mrf.mxu0 }
 0x2a1   :  { %v5956_v33 = vadd.f32 %v5955_v18, %v5954_v53 }
 0x2a2   :  { %v5957_v56 = vpop.f32.mrf.mxu0 }
 0x2a3   :  { %v4889_v58 = vpop.f32.mrf.mxu1  ;;  %v4849_v61 = vadd.f32 %v5956_v33, %v4808_v59 }
 0x2a4   :  { %v5958_v63 = vpop.f32.mrf.mxu0 }
 0x2a5   :  { %v4891_v1 = vpop.f32.mrf.mxu1  ;;  %v5959_v37 = vadd.f32 %v5958_v63, %v5957_v56  ;;  %v4890_v2 = vadd.f32 %v4889_v58, %v4849_v61 }
 0x2a7   :  { %v4892_v0 = vpop.f32.mrf.mxu1  ;;  %v4852_v32 = vadd.f32 %v5959_v37, %v4811_v36  ;;  %v4896_v5 = vmax.f32 %v4890_v2, 0.0 }
 0x2a9   :  { %v4894_v29 = vpop.f32.mrf.mxu1  ;;  %v4893_v4 = vadd.f32 %v4892_v0, %v4852_v32 }
 0x2ab   :  { %v4897_v6 = vmax.f32 %v4893_v4, 0.0 }
 0x2ad   :  { %v5364_v7 = vpack.c.bf16 %v4897_v6, %v4896_v5 }
 0x2af   :  { %5365 = vst [vmem:[%s7036_s3] sm:$0xff] %v5364_v7  }
 0x2b0   :  { %4912 = vsyncpa [#allocation3], 1 }
 0x2b1   :  { %4913 = vsyncpa [#allocation5], 1 }

</bundles_post_ra>
